<compile_context>
chip_gen: v5e
topology: v5e:2x2
jax: 0.10.0
libtpu: 0.0.40
codegen_flags: <defaults>
</compile_context>

<pallas_src>
import functools
import math

import jax
import jax.numpy as jnp
from jax.experimental import pallas as pl
from jax.experimental.pallas import tpu as pltpu


# ------------------------- generation-aware sizing -------------------------

def _vmem_capacity_bytes():
    try:
        return int(pltpu.get_tpu_info().vmem_capacity_bytes)
    except Exception:
        return 64 * 1024 * 1024  # conservative (v7x-sized) fallback


_VMEM_CAP = _vmem_capacity_bytes()
if _VMEM_CAP >= 96 * 1024 * 1024:
    # v5e / v6e: 128 MiB physical VMEM -> big tiles, cut weight re-streaming.
    _VMEM_LIMIT = 100 * 1024 * 1024
    _TM_TGT, _TN_TGT, _TF_TGT = 512, 512, 1024
else:
    # v7x: 64 MiB per TensorCore -> keep double-buffered tiles well inside 32 MiB.
    _VMEM_LIMIT = 32 * 1024 * 1024
    _TM_TGT, _TN_TGT, _TF_TGT = 256, 256, 512


def _pick_tile(dim, target, align):
    """Largest multiple of `align` <= target that evenly divides `dim`; else full dim.

    Note: the full-dim fallback is only hit for awkward sizes; targets above are sized
    so the common (128-aligned) cases stay inside the scoped-VMEM budget.
    """
    if dim <= target:
        return dim
    t = (target // align) * align
    while t >= align:
        if dim % t == 0:
            return t
        t -= align
    return dim


def _heads_per_step(num_heads, head_dim, seq_len):
    """How many heads each attention grid step processes."""
    if seq_len <= 256:
        return num_heads  # short S: fewer, fatter steps amortize per-step overhead
    for hps in range(1, num_heads + 1):
        if num_heads % hps == 0 and (hps * head_dim) % 128 == 0:
            return hps     # keep the lane dimension 128-aligned
    return num_heads


# ------------------------------ Pallas kernels ------------------------------

def _ln_qkv_kernel(x_ref, g_ref, b_ref, w_ref, bias_ref, o_ref, xn_ref, *, eps):
    # Fused pre-LN + QKV projection.  LN statistics computed once per row tile
    # (j == 0) and cached in a bf16 VMEM scratch; j axis is "arbitrary".
    j = pl.program_id(1)

    @pl.when(j == 0)
    def _():
        x = x_ref[...].astype(jnp.float32)
        mu = jnp.mean(x, axis=-1, keepdims=True)
        var = jnp.mean(jnp.square(x - mu), axis=-1, keepdims=True)
        xn = (x - mu) * jax.lax.rsqrt(var + eps) * g_ref[...] + b_ref[...]
        xn_ref[...] = xn.astype(jnp.bfloat16)

    y = jnp.dot(xn_ref[...], w_ref[...], preferred_element_type=jnp.float32)
    o_ref[...] = (y + bias_ref[...]).astype(o_ref.dtype)


def _attn_out_kernel(q_ref, k_ref, v_ref, m_ref, wo_ref, bo_ref, r_ref, o_ref,
                     acc_ref, *, heads_per_step, head_dim):
    # Attention with the output projection fused.  Grid = (batch, head groups).
    # Per head: softmax(q k^T + mask) v, then ctx @ Wo[h] accumulated into an
    # (S, D) f32 scratch.  Bias + residual added on the last head group; the
    # residual buffer is aliased to the output.
    g = pl.program_id(1)

    @pl.when(g == 0)
    def _():
        acc_ref[...] = jnp.zeros_like(acc_ref)

    mask = m_ref[0]  # (1, S) additive bias, broadcasts over query rows

    for hh in range(heads_per_step):                      # static unroll (small H)
        sl = pl.ds(hh * head_dim, head_dim)
        q = q_ref[0, :, sl]                               # (S, Dh) bf16, scale folded in
        k = k_ref[0, :, sl]                               # (S, Dh) bf16
        v = v_ref[0, :, sl]                               # (S, Dh) bf16
        s = jax.lax.dot_general(q, k, (((1,), (1,)), ((), ())),
                                preferred_element_type=jnp.float32)   # (S, S)
        s = s + mask
        s = s - jnp.max(s, axis=-1, keepdims=True)
        p = jnp.exp(s)
        p = p * pl.reciprocal(jnp.sum(p, axis=-1, keepdims=True), approx=True)
        ctx = jnp.dot(p.astype(jnp.bfloat16), v,
                      preferred_element_type=jnp.float32)              # (S, Dh)
        acc_ref[...] += jnp.dot(ctx.astype(jnp.bfloat16), wo_ref[sl, :],
                                preferred_element_type=jnp.float32)    # (S, D)

    @pl.when(g == pl.num_programs(1) - 1)
    def _():
        o_ref[0] = (acc_ref[...] + bo_ref[...]
                    + r_ref[0].astype(jnp.float32)).astype(o_ref.dtype)


def _ln_ffn_kernel(x_ref, g_ref, bt_ref, w1_ref, b1_ref, w2_ref, b2_ref, *rest,
                   eps, final_ln):
    # Fused pre-LN + FFN (+ optional encoder-final LayerNorm on the epilogue).
    # Grid = (row tiles, d_ff tiles); the (tm, tf) hidden activation never leaves
    # VMEM; residual + b2 (+ final LN) applied on the last d_ff tile.
    if final_ln:
        gf_ref, bf_ref, o_ref, acc_ref, xn_ref = rest
    else:
        o_ref, acc_ref, xn_ref = rest

    f = pl.program_id(1)

    @pl.when(f == 0)
    def _():
        x = x_ref[...].astype(jnp.float32)
        mu = jnp.mean(x, axis=-1, keepdims=True)
        var = jnp.mean(jnp.square(x - mu), axis=-1, keepdims=True)
        xn = (x - mu) * jax.lax.rsqrt(var + eps) * g_ref[...] + bt_ref[...]
        xn_ref[...] = xn.astype(jnp.bfloat16)
        acc_ref[...] = jnp.zeros_like(acc_ref)

    h = jnp.dot(xn_ref[...], w1_ref[...], preferred_element_type=jnp.float32)
    h = jnp.maximum(h + b1_ref[...], 0.0).astype(jnp.bfloat16)
    acc_ref[...] += jnp.dot(h, w2_ref[...], preferred_element_type=jnp.float32)

    @pl.when(f == pl.num_programs(1) - 1)
    def _():
        y = acc_ref[...] + b2_ref[...] + x_ref[...].astype(jnp.float32)
        if final_ln:
            mu = jnp.mean(y, axis=-1, keepdims=True)
            var = jnp.mean(jnp.square(y - mu), axis=-1, keepdims=True)
            y = (y - mu) * jax.lax.rsqrt(var + eps) * gf_ref[...] + bf_ref[...]
        o_ref[...] = y.astype(o_ref.dtype)


def _layernorm_kernel(x_ref, g_ref, b_ref, o_ref, *, eps):
    # Only used for the degenerate zero-layer Encoder.
    x = x_ref[...].astype(jnp.float32)
    mu = jnp.mean(x, axis=-1, keepdims=True)
    var = jnp.mean(jnp.square(x - mu), axis=-1, keepdims=True)
    o_ref[...] = ((x - mu) * jax.lax.rsqrt(var + eps) * g_ref[...]
                  + b_ref[...]).astype(o_ref.dtype)


# ------------------------------ Pallas wrappers ------------------------------

def ln_qkv_proj(x2d, gamma, beta, wqkv, bqkv, eps=1e-6):
    M, D = x2d.shape
    N = wqkv.shape[1]
    tm = _pick_tile(M, _TM_TGT, 8)
    tn = _pick_tile(N, _TN_TGT, 128)
    return pl.pallas_call(
        functools.partial(_ln_qkv_kernel, eps=eps),
        out_shape=jax.ShapeDtypeStruct((M, N), jnp.bfloat16),
        grid=(M // tm, N // tn),
        in_specs=[
            pl.BlockSpec((tm, D), lambda i, j: (i, 0)),
            pl.BlockSpec((1, D), lambda i, j: (0, 0)),
            pl.BlockSpec((1, D), lambda i, j: (0, 0)),
            pl.BlockSpec((D, tn), lambda i, j: (0, j)),
            pl.BlockSpec((1, tn), lambda i, j: (0, j)),
        ],
        out_specs=pl.BlockSpec((tm, tn), lambda i, j: (i, j)),
        scratch_shapes=[pltpu.VMEM((tm, D), jnp.bfloat16)],   # cached normalized rows
        compiler_params=pltpu.CompilerParams(
            dimension_semantics=("parallel", "arbitrary"),
            vmem_limit_bytes=_VMEM_LIMIT,
        ),
    )(x2d, gamma.reshape(1, D), beta.reshape(1, D), wqkv, bqkv.reshape(1, N))


def attention_out(qkv, mask_bias, wo, bo, resid, B, S, D, H):
    # qkv: (B, S, 3D) bf16, softmax scale already folded into the q projection.
    # resid: (B, S, D) f32, aliased to the output (updated residual stream).
    Dh = D // H
    hps = _heads_per_step(H, Dh, S)
    n_groups = H // hps

    def head_spec(part):
        # Head-group g of q/k/v sliced straight out of the (B, S, 3D) buffer.
        return pl.BlockSpec((1, S, hps * Dh),
                            lambda b, g, _p=part: (b, 0, _p * n_groups + g))

    return pl.pallas_call(
        functools.partial(_attn_out_kernel, heads_per_step=hps, head_dim=Dh),
        out_shape=jax.ShapeDtypeStruct((B, S, D), resid.dtype),
        grid=(B, n_groups),
        in_specs=[
            head_spec(0),                                          # q
            head_spec(1),                                          # k
            head_spec(2),                                          # v
            pl.BlockSpec((1, 1, S), lambda b, g: (b, 0, 0)),       # additive mask bias
            pl.BlockSpec((hps * Dh, D), lambda b, g: (g, 0)),      # Wo rows of this group
            pl.BlockSpec((1, D), lambda b, g: (0, 0)),             # bo
            pl.BlockSpec((1, S, D), lambda b, g: (b, 0, 0)),       # residual
        ],
        out_specs=pl.BlockSpec((1, S, D), lambda b, g: (b, 0, 0)),
        scratch_shapes=[pltpu.VMEM((S, D), jnp.float32)],          # Wo accumulator
        input_output_aliases={6: 0},   # residual buffer reused as the output
        compiler_params=pltpu.CompilerParams(
            dimension_semantics=("parallel", "arbitrary"),
            vmem_limit_bytes=_VMEM_LIMIT,
        ),
    )(qkv, qkv, qkv, mask_bias, wo, bo.reshape(1, D), resid)


def ln_ffn(x2d, gamma, beta, w1, b1, w2, b2, final_g=None, final_b=None, eps=1e-6):
    M, D = x2d.shape
    F = w1.shape[1]
    tm = _pick_tile(M, _TM_TGT, 8)
    tf = _pick_tile(F, _TF_TGT, 128)
    final_ln = final_g is not None

    in_specs = [
        pl.BlockSpec((tm, D), lambda i, f: (i, 0)),
        pl.BlockSpec((1, D), lambda i, f: (0, 0)),
        pl.BlockSpec((1, D), lambda i, f: (0, 0)),
        pl.BlockSpec((D, tf), lambda i, f: (0, f)),
        pl.BlockSpec((1, tf), lambda i, f: (0, f)),
        pl.BlockSpec((tf, D), lambda i, f: (f, 0)),
        pl.BlockSpec((1, D), lambda i, f: (0, 0)),
    ]
    args = [x2d, gamma.reshape(1, D), beta.reshape(1, D),
            w1, b1.reshape(1, F), w2, b2.reshape(1, D)]
    if final_ln:
        in_specs += [pl.BlockSpec((1, D), lambda i, f: (0, 0)),
                     pl.BlockSpec((1, D), lambda i, f: (0, 0))]
        args += [final_g.reshape(1, D), final_b.reshape(1, D)]

    return pl.pallas_call(
        functools.partial(_ln_ffn_kernel, eps=eps, final_ln=final_ln),
        out_shape=jax.ShapeDtypeStruct((M, D), x2d.dtype),
        grid=(M // tm, F // tf),
        in_specs=in_specs,
        out_specs=pl.BlockSpec((tm, D), lambda i, f: (i, 0)),
        scratch_shapes=[pltpu.VMEM((tm, D), jnp.float32),     # f32 accumulator
                        pltpu.VMEM((tm, D), jnp.bfloat16)],   # normalized row tile
        input_output_aliases={0: 0},   # output overwrites the residual stream in place
        compiler_params=pltpu.CompilerParams(
            dimension_semantics=("parallel", "arbitrary"),
            vmem_limit_bytes=_VMEM_LIMIT,
        ),
    )(*args)


def layer_norm(x2d, gamma, beta, eps=1e-6):
    # Fallback for a zero-layer Encoder (normally the final LN is fused into ln_ffn).
    M, D = x2d.shape
    tm = _pick_tile(M, _TM_TGT, 8)
    return pl.pallas_call(
        functools.partial(_layernorm_kernel, eps=eps),
        out_shape=jax.ShapeDtypeStruct((M, D), x2d.dtype),
        grid=(M // tm,),
        in_specs=[
            pl.BlockSpec((tm, D), lambda i: (i, 0)),
            pl.BlockSpec((1, D), lambda i: (0, 0)),
            pl.BlockSpec((1, D), lambda i: (0, 0)),
        ],
        out_specs=pl.BlockSpec((tm, D), lambda i: (i, 0)),
        compiler_params=pltpu.CompilerParams(
            dimension_semantics=("parallel",),
            vmem_limit_bytes=_VMEM_LIMIT,
        ),
    )(x2d, gamma.reshape(1, D), beta.reshape(1, D))


# ------------------------------ Encoder forward ------------------------------

def encoder_forward(params, x, mask, num_heads):
    B, S, D = x.shape
    M = B * S
    x2 = x.reshape(M, D)
    # Additive mask bias, shared across layers/heads: 0 = keep, -1e9 = masked.
    mask_bias = ((mask.astype(jnp.float32) - 1.0) * 1e9).reshape(B, 1, S)

    layers = params["layers"]
    if not layers:
        return layer_norm(x2, params["lnf_g"], params["lnf_b"]).reshape(B, S, D)

    for li, lp in enumerate(layers):
        last = li == len(layers) - 1
        # --- self-attention sublayer: LN1 fused into QKV; Wo + residual fused in ---
        qkv = ln_qkv_proj(x2, lp["ln1_g"], lp["ln1_b"],
                          lp["wqkv"], lp["bqkv"]).reshape(B, S, 3 * D)
        x2 = attention_out(qkv, mask_bias, lp["wo"], lp["bo"],
                           x2.reshape(B, S, D), B, S, D, num_heads).reshape(M, D)
        # --- feed-forward sublayer: LN2 + Linear1 + ReLU + Linear2 + residual fused;
        #     the encoder's final LayerNorm is fused into the last layer's epilogue ---
        x2 = ln_ffn(x2, lp["ln2_g"], lp["ln2_b"],
                    lp["w1"], lp["b1"], lp["w2"], lp["b2"],
                    final_g=params["lnf_g"] if last else None,
                    final_b=params["lnf_b"] if last else None)

    return x2.reshape(B, S, D)


# ------------------------------ Parameter init ------------------------------

def init_params(key, num_layers, d_model, d_ff, num_heads):
    head_dim = d_model // num_heads
    scale = 1.0 / math.sqrt(head_dim)

    def dense(k, fan_in, fan_out):
        bound = 1.0 / math.sqrt(fan_in)
        kw, kb = jax.random.split(k)
        w = jax.random.uniform(kw, (fan_in, fan_out), jnp.float32, -bound, bound)
        b = jax.random.uniform(kb, (fan_out,), jnp.float32, -bound, bound)
        return w, b

    layers = []
    for _ in range(num_layers):
        key, *ks = jax.random.split(key, 7)
        wq, bq = dense(ks[0], d_model, d_model)
        wk, bk = dense(ks[1], d_model, d_model)
        wv, bv = dense(ks[2], d_model, d_model)
        wo, bo = dense(ks[3], d_model, d_model)
        w1, b1 = dense(ks[4], d_model, d_ff)
        w2, b2 = dense(ks[5], d_ff, d_model)
        # Fold the 1/sqrt(head_dim) softmax scale into the q projection.
        wqkv = jnp.concatenate([wq * scale, wk, wv], axis=1).astype(jnp.bfloat16)
        bqkv = jnp.concatenate([bq * scale, bk, bv], axis=0)
        layers.append(dict(
            ln1_g=jnp.ones((d_model,), jnp.float32),
            ln1_b=jnp.zeros((d_model,), jnp.float32),
            ln2_g=jnp.ones((d_model,), jnp.float32),
            ln2_b=jnp.zeros((d_model,), jnp.float32),
            wqkv=wqkv,                       # (D, 3D) bf16, q columns pre-scaled
            bqkv=bqkv,                       # (3D,)  f32
            wo=wo.astype(jnp.bfloat16), bo=bo,
            w1=w1.astype(jnp.bfloat16), b1=b1,
            w2=w2.astype(jnp.bfloat16), b2=b2,
        ))
    return dict(
        layers=layers,
        lnf_g=jnp.ones((d_model,), jnp.float32),
        lnf_b=jnp.zeros((d_model,), jnp.float32),
    )


# ------------------------------ Main ------------------------------

if __name__ == "__main__":
    # Small but TPU-layout-friendly shapes: head_dim = D // H = 128 (lane-aligned).
    B, S, D, H, DFF, L = 2, 8, 256, 2, 512, 2

    key = jax.random.PRNGKey(0)
    k_x, k_p = jax.random.split(key)
    x = jax.random.normal(k_x, (B, S, D), jnp.float32)
    # padding mask: last two positions of batch 1 are masked out (0 = pad, 1 = keep)
    mask = jnp.ones((B, S), jnp.float32).at[1, -2:].set(0.0)

    params = init_params(k_p, L, D, DFF, H)

    fwd = jax.jit(functools.partial(encoder_forward, num_heads=H))
    out = jax.block_until_ready(fwd(params, x, mask))

    assert out.shape == (B, S, D) and bool(jnp.all(jnp.isfinite(out)))
    print("KERNEL_OK")
</pallas_src>

<mosaic_0001>
module attributes {stable_mosaic.version = 11 : i64} {
  func.func @_ln_qkv_kernel(%arg0: i32, %arg1: i32, %arg2: memref<16x256xf32, #tpu.memory_space<vmem>>, %arg3: memref<1x256xf32, #tpu.memory_space<vmem>>, %arg4: memref<1x256xf32, #tpu.memory_space<vmem>>, %arg5: memref<256x256xbf16, #tpu.memory_space<vmem>>, %arg6: memref<1x256xf32, #tpu.memory_space<vmem>>, %arg7: memref<16x256xbf16, #tpu.memory_space<vmem>>, %arg8: memref<16x256xbf16, #tpu.memory_space<vmem>>) attributes {dimension_semantics = [#tpu.dimension_semantics<parallel>, #tpu.dimension_semantics<arbitrary>], iteration_bounds = array<i64: 1, 3>, scalar_prefetch = 0 : i64, scratch_operands = 1 : i64, tpu.core_type = #tpu.core_type<tc>, window_params = [{transform_indices = @transform_0, window_bounds = array<i64: 16, 256>}, {pipeline_mode = #tpu.pipeline_mode<synchronous>, transform_indices = @transform_1, window_bounds = array<i64: 1, 256>}, {pipeline_mode = #tpu.pipeline_mode<synchronous>, transform_indices = @transform_2, window_bounds = array<i64: 1, 256>}, {transform_indices = @transform_3, window_bounds = array<i64: 256, 256>}, {transform_indices = @transform_4, window_bounds = array<i64: 1, 256>}, {transform_indices = @transform_5, window_bounds = array<i64: 16, 256>}]} {
    %c0_i32 = arith.constant 0 : i32
    %0 = arith.cmpi eq, %arg1, %c0_i32 : i32
    %1 = arith.extui %0 : i1 to i32
    %c0_i32_0 = arith.constant 0 : i32
    %2 = arith.cmpi ne, %1, %c0_i32_0 : i32
    scf.if %2 {
      %c0_8 = arith.constant 0 : index
      %c0_9 = arith.constant 0 : index
      %11 = vector.load %arg2[%c0_8, %c0_9] : memref<16x256xf32, #tpu.memory_space<vmem>>, vector<16x256xf32>
      %cst_10 = arith.constant dense<0.000000e+00> : vector<16xf32>
      %12 = vector.multi_reduction <add>, %11, %cst_10 [1] : vector<16x256xf32> to vector<16xf32>
      %13 = vector.shape_cast %12 : vector<16xf32> to vector<16x1xf32>
      %cst_11 = arith.constant 2.560000e+02 : f32
      %14 = vector.broadcast %cst_11 : f32 to vector<16x1xf32>
      %15 = arith.divf %13, %14 : vector<16x1xf32>
      %16 = vector.broadcast %15 : vector<16x1xf32> to vector<16x256xf32>
      %17 = arith.subf %11, %16 : vector<16x256xf32>
      %18 = arith.mulf %17, %17 : vector<16x256xf32>
      %cst_12 = arith.constant dense<0.000000e+00> : vector<16xf32>
      %19 = vector.multi_reduction <add>, %18, %cst_12 [1] : vector<16x256xf32> to vector<16xf32>
      %20 = vector.shape_cast %19 : vector<16xf32> to vector<16x1xf32>
      %cst_13 = arith.constant 2.560000e+02 : f32
      %21 = vector.broadcast %cst_13 : f32 to vector<16x1xf32>
      %22 = arith.divf %20, %21 : vector<16x1xf32>
      %23 = vector.broadcast %15 : vector<16x1xf32> to vector<16x256xf32>
      %24 = arith.subf %11, %23 : vector<16x256xf32>
      %cst_14 = arith.constant 9.99999997E-7 : f32
      %25 = vector.broadcast %cst_14 : f32 to vector<16x1xf32>
      %26 = arith.addf %22, %25 : vector<16x1xf32>
      %27 = math.rsqrt %26 : vector<16x1xf32>
      %28 = vector.broadcast %27 : vector<16x1xf32> to vector<16x256xf32>
      %29 = arith.mulf %24, %28 : vector<16x256xf32>
      %c0_15 = arith.constant 0 : index
      %c0_16 = arith.constant 0 : index
      %30 = vector.load %arg3[%c0_15, %c0_16] : memref<1x256xf32, #tpu.memory_space<vmem>>, vector<1x256xf32>
      %31 = vector.broadcast %30 : vector<1x256xf32> to vector<16x256xf32>
      %32 = arith.mulf %29, %31 : vector<16x256xf32>
      %c0_17 = arith.constant 0 : index
      %c0_18 = arith.constant 0 : index
      %33 = vector.load %arg4[%c0_17, %c0_18] : memref<1x256xf32, #tpu.memory_space<vmem>>, vector<1x256xf32>
      %34 = vector.broadcast %33 : vector<1x256xf32> to vector<16x256xf32>
      %35 = arith.addf %32, %34 : vector<16x256xf32>
      %36 = arith.truncf %35 : vector<16x256xf32> to vector<16x256xbf16>
      %c0_19 = arith.constant 0 : index
      %c0_20 = arith.constant 0 : index
      %37 = vector.load %arg8[%c0_19, %c0_20] : memref<16x256xbf16, #tpu.memory_space<vmem>>, vector<16x256xbf16>
      tpu.vector_store %arg8[%c0_19, %c0_20], %36 {strides = array<i32>} : memref<16x256xbf16, #tpu.memory_space<vmem>>, vector<16x256xbf16>,
    } else {
    }
    %c0 = arith.constant 0 : index
    %c0_1 = arith.constant 0 : index
    %3 = vector.load %arg8[%c0, %c0_1] : memref<16x256xbf16, #tpu.memory_space<vmem>>, vector<16x256xbf16>
    %c0_2 = arith.constant 0 : index
    %c0_3 = arith.constant 0 : index
    %4 = vector.load %arg5[%c0_2, %c0_3] : memref<256x256xbf16, #tpu.memory_space<vmem>>, vector<256x256xbf16>
    %cst = arith.constant dense<0.000000e+00> : vector<16x256xf32>
    %5 = tpu.matmul %3, %4, %cst {dimension_numbers = #tpu.dot_dimension_numbers<[1], [0], [0], [1], [0, 0, 1, 1], [], []>} : vector<16x256xbf16>, vector<256x256xbf16>, vector<16x256xf32> -> vector<16x256xf32>
    %c0_4 = arith.constant 0 : index
    %c0_5 = arith.constant 0 : index
    %6 = vector.load %arg6[%c0_4, %c0_5] : memref<1x256xf32, #tpu.memory_space<vmem>>, vector<1x256xf32>
    %7 = vector.broadcast %6 : vector<1x256xf32> to vector<16x256xf32>
    %8 = arith.addf %5, %7 : vector<16x256xf32>
    %9 = arith.truncf %8 : vector<16x256xf32> to vector<16x256xbf16>
    %c0_6 = arith.constant 0 : index
    %c0_7 = arith.constant 0 : index
    %10 = vector.load %arg7[%c0_6, %c0_7] : memref<16x256xbf16, #tpu.memory_space<vmem>>, vector<16x256xbf16>
    tpu.vector_store %arg7[%c0_6, %c0_7], %9 {strides = array<i32>} : memref<16x256xbf16, #tpu.memory_space<vmem>>, vector<16x256xbf16>,
    return
  }
  func.func @transform_0(%arg0: i32, %arg1: i32) -> (i32, i32) {
    %c0_i32 = arith.constant 0 : i32
    %c0_i32_0 = arith.constant 0 : i32
    return %arg0, %c0_i32 : i32, i32
  }
  func.func @transform_1(%arg0: i32, %arg1: i32) -> (i32, i32) {
    %c0_i32 = arith.constant 0 : i32
    %c0_i32_0 = arith.constant 0 : i32
    %c0_i32_1 = arith.constant 0 : i32
    return %c0_i32, %c0_i32_0 : i32, i32
  }
  func.func @transform_2(%arg0: i32, %arg1: i32) -> (i32, i32) {
    %c0_i32 = arith.constant 0 : i32
    %c0_i32_0 = arith.constant 0 : i32
    %c0_i32_1 = arith.constant 0 : i32
    return %c0_i32, %c0_i32_0 : i32, i32
  }
  func.func @transform_3(%arg0: i32, %arg1: i32) -> (i32, i32) {
    %c0_i32 = arith.constant 0 : i32
    %c0_i32_0 = arith.constant 0 : i32
    return %c0_i32, %arg1 : i32, i32
  }
  func.func @transform_4(%arg0: i32, %arg1: i32) -> (i32, i32) {
    %c0_i32 = arith.constant 0 : i32
    %c0_i32_0 = arith.constant 0 : i32
    return %c0_i32, %arg1 : i32, i32
  }
  func.func @transform_5(%arg0: i32, %arg1: i32) -> (i32, i32) {
    %c0_i32 = arith.constant 0 : i32
    return %arg0, %arg1 : i32, i32
  }
}

module attributes {stable_mosaic.version = 11 : i64} {
  func.func @_ln_ffn_kernel(%arg0: i32, %arg1: i32, %arg2: memref<16x256xf32, #tpu.memory_space<vmem>>, %arg3: memref<1x256xf32, #tpu.memory_space<vmem>>, %arg4: memref<1x256xf32, #tpu.memory_space<vmem>>, %arg5: memref<256x512xbf16, #tpu.memory_space<vmem>>, %arg6: memref<1x512xf32, #tpu.memory_space<vmem>>, %arg7: memref<512x256xbf16, #tpu.memory_space<vmem>>, %arg8: memref<1x256xf32, #tpu.memory_space<vmem>>, %arg9: memref<16x256xf32, #tpu.memory_space<vmem>>, %arg10: memref<16x256xf32, #tpu.memory_space<vmem>>, %arg11: memref<16x256xbf16, #tpu.memory_space<vmem>>) attributes {dimension_semantics = [#tpu.dimension_semantics<parallel>, #tpu.dimension_semantics<arbitrary>], iteration_bounds = array<i64: 1, 1>, scalar_prefetch = 0 : i64, scratch_operands = 2 : i64, tpu.core_type = #tpu.core_type<tc>, window_params = [{transform_indices = @transform_0, window_bounds = array<i64: 16, 256>}, {pipeline_mode = #tpu.pipeline_mode<synchronous>, transform_indices = @transform_1, window_bounds = array<i64: 1, 256>}, {pipeline_mode = #tpu.pipeline_mode<synchronous>, transform_indices = @transform_2, window_bounds = array<i64: 1, 256>}, {transform_indices = @transform_3, window_bounds = array<i64: 256, 512>}, {transform_indices = @transform_4, window_bounds = array<i64: 1, 512>}, {transform_indices = @transform_5, window_bounds = array<i64: 512, 256>}, {pipeline_mode = #tpu.pipeline_mode<synchronous>, transform_indices = @transform_6, window_bounds = array<i64: 1, 256>}, {transform_indices = @transform_7, window_bounds = array<i64: 16, 256>}]} {
    %c0_i32 = arith.constant 0 : i32
    %0 = arith.cmpi eq, %arg1, %c0_i32 : i32
    %1 = arith.extui %0 : i1 to i32
    %c0_i32_0 = arith.constant 0 : i32
    %2 = arith.cmpi ne, %1, %c0_i32_0 : i32
    scf.if %2 {
      %c0_16 = arith.constant 0 : index
      %c0_17 = arith.constant 0 : index
      %20 = vector.load %arg2[%c0_16, %c0_17] : memref<16x256xf32, #tpu.memory_space<vmem>>, vector<16x256xf32>
      %cst_18 = arith.constant dense<0.000000e+00> : vector<16xf32>
      %21 = vector.multi_reduction <add>, %20, %cst_18 [1] : vector<16x256xf32> to vector<16xf32>
      %22 = vector.shape_cast %21 : vector<16xf32> to vector<16x1xf32>
      %cst_19 = arith.constant 2.560000e+02 : f32
      %23 = vector.broadcast %cst_19 : f32 to vector<16x1xf32>
      %24 = arith.divf %22, %23 : vector<16x1xf32>
      %25 = vector.broadcast %24 : vector<16x1xf32> to vector<16x256xf32>
      %26 = arith.subf %20, %25 : vector<16x256xf32>
      %27 = arith.mulf %26, %26 : vector<16x256xf32>
      %cst_20 = arith.constant dense<0.000000e+00> : vector<16xf32>
      %28 = vector.multi_reduction <add>, %27, %cst_20 [1] : vector<16x256xf32> to vector<16xf32>
      %29 = vector.shape_cast %28 : vector<16xf32> to vector<16x1xf32>
      %cst_21 = arith.constant 2.560000e+02 : f32
      %30 = vector.broadcast %cst_21 : f32 to vector<16x1xf32>
      %31 = arith.divf %29, %30 : vector<16x1xf32>
      %32 = vector.broadcast %24 : vector<16x1xf32> to vector<16x256xf32>
      %33 = arith.subf %20, %32 : vector<16x256xf32>
      %cst_22 = arith.constant 9.99999997E-7 : f32
      %34 = vector.broadcast %cst_22 : f32 to vector<16x1xf32>
      %35 = arith.addf %31, %34 : vector<16x1xf32>
      %36 = math.rsqrt %35 : vector<16x1xf32>
      %37 = vector.broadcast %36 : vector<16x1xf32> to vector<16x256xf32>
      %38 = arith.mulf %33, %37 : vector<16x256xf32>
      %c0_23 = arith.constant 0 : index
      %c0_24 = arith.constant 0 : index
      %39 = vector.load %arg3[%c0_23, %c0_24] : memref<1x256xf32, #tpu.memory_space<vmem>>, vector<1x256xf32>
      %40 = vector.broadcast %39 : vector<1x256xf32> to vector<16x256xf32>
      %41 = arith.mulf %38, %40 : vector<16x256xf32>
      %c0_25 = arith.constant 0 : index
      %c0_26 = arith.constant 0 : index
      %42 = vector.load %arg4[%c0_25, %c0_26] : memref<1x256xf32, #tpu.memory_space<vmem>>, vector<1x256xf32>
      %43 = vector.broadcast %42 : vector<1x256xf32> to vector<16x256xf32>
      %44 = arith.addf %41, %43 : vector<16x256xf32>
      %45 = arith.truncf %44 : vector<16x256xf32> to vector<16x256xbf16>
      %c0_27 = arith.constant 0 : index
      %c0_28 = arith.constant 0 : index
      %46 = vector.load %arg11[%c0_27, %c0_28] : memref<16x256xbf16, #tpu.memory_space<vmem>>, vector<16x256xbf16>
      tpu.vector_store %arg11[%c0_27, %c0_28], %45 {strides = array<i32>} : memref<16x256xbf16, #tpu.memory_space<vmem>>, vector<16x256xbf16>,
      %cst_29 = arith.constant 0.000000e+00 : f32
      %47 = vector.broadcast %cst_29 : f32 to vector<16x256xf32>
      %c0_30 = arith.constant 0 : index
      %c0_31 = arith.constant 0 : index
      %48 = vector.load %arg10[%c0_30, %c0_31] : memref<16x256xf32, #tpu.memory_space<vmem>>, vector<16x256xf32>
      tpu.vector_store %arg10[%c0_30, %c0_31], %47 {strides = array<i32>} : memref<16x256xf32, #tpu.memory_space<vmem>>, vector<16x256xf32>,
    } else {
    }
    %c0 = arith.constant 0 : index
    %c0_1 = arith.constant 0 : index
    %3 = vector.load %arg11[%c0, %c0_1] : memref<16x256xbf16, #tpu.memory_space<vmem>>, vector<16x256xbf16>
    %c0_2 = arith.constant 0 : index
    %c0_3 = arith.constant 0 : index
    %4 = vector.load %arg5[%c0_2, %c0_3] : memref<256x512xbf16, #tpu.memory_space<vmem>>, vector<256x512xbf16>
    %cst = arith.constant dense<0.000000e+00> : vector<16x512xf32>
    %5 = tpu.matmul %3, %4, %cst {dimension_numbers = #tpu.dot_dimension_numbers<[1], [0], [0], [1], [0, 0, 1, 1], [], []>} : vector<16x256xbf16>, vector<256x512xbf16>, vector<16x512xf32> -> vector<16x512xf32>
    %c0_4 = arith.constant 0 : index
    %c0_5 = arith.constant 0 : index
    %6 = vector.load %arg6[%c0_4, %c0_5] : memref<1x512xf32, #tpu.memory_space<vmem>>, vector<1x512xf32>
    %7 = vector.broadcast %6 : vector<1x512xf32> to vector<16x512xf32>
    %8 = arith.addf %5, %7 : vector<16x512xf32>
    %cst_6 = arith.constant 0.000000e+00 : f32
    %9 = vector.broadcast %cst_6 : f32 to vector<16x512xf32>
    %10 = arith.maximumf %8, %9 : vector<16x512xf32>
    %11 = arith.truncf %10 : vector<16x512xf32> to vector<16x512xbf16>
    %c0_7 = arith.constant 0 : index
    %c0_8 = arith.constant 0 : index
    %12 = vector.load %arg10[%c0_7, %c0_8] : memref<16x256xf32, #tpu.memory_space<vmem>>, vector<16x256xf32>
    %c0_9 = arith.constant 0 : index
    %c0_10 = arith.constant 0 : index
    %13 = vector.load %arg7[%c0_9, %c0_10] : memref<512x256xbf16, #tpu.memory_space<vmem>>, vector<512x256xbf16>
    %cst_11 = arith.constant dense<0.000000e+00> : vector<16x256xf32>
    %14 = tpu.matmul %11, %13, %cst_11 {dimension_numbers = #tpu.dot_dimension_numbers<[1], [0], [0], [1], [0, 0, 1, 1], [], []>} : vector<16x512xbf16>, vector<512x256xbf16>, vector<16x256xf32> -> vector<16x256xf32>
    %15 = arith.addf %12, %14 : vector<16x256xf32>
    %c0_12 = arith.constant 0 : index
    %c0_13 = arith.constant 0 : index
    %16 = vector.load %arg10[%c0_12, %c0_13] : memref<16x256xf32, #tpu.memory_space<vmem>>, vector<16x256xf32>
    tpu.vector_store %arg10[%c0_12, %c0_13], %15 {strides = array<i32>} : memref<16x256xf32, #tpu.memory_space<vmem>>, vector<16x256xf32>,
    %c0_i32_14 = arith.constant 0 : i32
    %17 = arith.cmpi eq, %arg1, %c0_i32_14 : i32
    %18 = arith.extui %17 : i1 to i32
    %c0_i32_15 = arith.constant 0 : i32
    %19 = arith.cmpi ne, %18, %c0_i32_15 : i32
    scf.if %19 {
      %c0_16 = arith.constant 0 : index
      %c0_17 = arith.constant 0 : index
      %20 = vector.load %arg10[%c0_16, %c0_17] : memref<16x256xf32, #tpu.memory_space<vmem>>, vector<16x256xf32>
      %c0_18 = arith.constant 0 : index
      %c0_19 = arith.constant 0 : index
      %21 = vector.load %arg8[%c0_18, %c0_19] : memref<1x256xf32, #tpu.memory_space<vmem>>, vector<1x256xf32>
      %22 = vector.broadcast %21 : vector<1x256xf32> to vector<16x256xf32>
      %23 = arith.addf %20, %22 : vector<16x256xf32>
      %c0_20 = arith.constant 0 : index
      %c0_21 = arith.constant 0 : index
      %24 = vector.load %arg2[%c0_20, %c0_21] : memref<16x256xf32, #tpu.memory_space<vmem>>, vector<16x256xf32>
      %25 = arith.addf %23, %24 : vector<16x256xf32>
      %c0_22 = arith.constant 0 : index
      %c0_23 = arith.constant 0 : index
      %26 = vector.load %arg9[%c0_22, %c0_23] : memref<16x256xf32, #tpu.memory_space<vmem>>, vector<16x256xf32>
      tpu.vector_store %arg9[%c0_22, %c0_23], %25 {strides = array<i32>} : memref<16x256xf32, #tpu.memory_space<vmem>>, vector<16x256xf32>,
    } else {
    }
    return
  }
  func.func @transform_0(%arg0: i32, %arg1: i32) -> (i32, i32) {
    %c0_i32 = arith.constant 0 : i32
    %c0_i32_0 = arith.constant 0 : i32
    return %arg0, %c0_i32 : i32, i32
  }
  func.func @transform_1(%arg0: i32, %arg1: i32) -> (i32, i32) {
    %c0_i32 = arith.constant 0 : i32
    %c0_i32_0 = arith.constant 0 : i32
    %c0_i32_1 = arith.constant 0 : i32
    return %c0_i32, %c0_i32_0 : i32, i32
  }
  func.func @transform_2(%arg0: i32, %arg1: i32) -> (i32, i32) {
    %c0_i32 = arith.constant 0 : i32
    %c0_i32_0 = arith.constant 0 : i32
    %c0_i32_1 = arith.constant 0 : i32
    return %c0_i32, %c0_i32_0 : i32, i32
  }
  func.func @transform_3(%arg0: i32, %arg1: i32) -> (i32, i32) {
    %c0_i32 = arith.constant 0 : i32
    %c0_i32_0 = arith.constant 0 : i32
    return %c0_i32, %arg1 : i32, i32
  }
  func.func @transform_4(%arg0: i32, %arg1: i32) -> (i32, i32) {
    %c0_i32 = arith.constant 0 : i32
    %c0_i32_0 = arith.constant 0 : i32
    return %c0_i32, %arg1 : i32, i32
  }
  func.func @transform_5(%arg0: i32, %arg1: i32) -> (i32, i32) {
    %c0_i32 = arith.constant 0 : i32
    %c0_i32_0 = arith.constant 0 : i32
    return %arg1, %c0_i32 : i32, i32
  }
  func.func @transform_6(%arg0: i32, %arg1: i32) -> (i32, i32) {
    %c0_i32 = arith.constant 0 : i32
    %c0_i32_0 = arith.constant 0 : i32
    %c0_i32_1 = arith.constant 0 : i32
    return %c0_i32, %c0_i32_0 : i32, i32
  }
  func.func @transform_7(%arg0: i32, %arg1: i32) -> (i32, i32) {
    %c0_i32 = arith.constant 0 : i32
    %c0_i32_0 = arith.constant 0 : i32
    return %arg0, %c0_i32 : i32, i32
  }
}

module attributes {stable_mosaic.version = 11 : i64} {
  func.func @_attn_out_kernel(%arg0: i32, %arg1: i32, %arg2: memref<1x8x256xbf16, #tpu.memory_space<vmem>>, %arg3: memref<1x8x256xbf16, #tpu.memory_space<vmem>>, %arg4: memref<1x8x256xbf16, #tpu.memory_space<vmem>>, %arg5: memref<1x1x8xf32, #tpu.memory_space<vmem>>, %arg6: memref<256x256xbf16, #tpu.memory_space<vmem>>, %arg7: memref<1x256xf32, #tpu.memory_space<vmem>>, %arg8: memref<1x8x256xf32, #tpu.memory_space<vmem>>, %arg9: memref<1x8x256xf32, #tpu.memory_space<vmem>>, %arg10: memref<8x256xf32, #tpu.memory_space<vmem>>) attributes {dimension_semantics = [#tpu.dimension_semantics<parallel>, #tpu.dimension_semantics<arbitrary>], iteration_bounds = array<i64: 2, 1>, scalar_prefetch = 0 : i64, scratch_operands = 1 : i64, tpu.core_type = #tpu.core_type<tc>, window_params = [{transform_indices = @transform_0, window_bounds = array<i64: 1, 8, 256>}, {transform_indices = @transform_1, window_bounds = array<i64: 1, 8, 256>}, {transform_indices = @transform_2, window_bounds = array<i64: 1, 8, 256>}, {transform_indices = @transform_3, window_bounds = array<i64: 1, 1, 8>}, {transform_indices = @transform_4, window_bounds = array<i64: 256, 256>}, {pipeline_mode = #tpu.pipeline_mode<synchronous>, transform_indices = @transform_5, window_bounds = array<i64: 1, 256>}, {transform_indices = @transform_6, window_bounds = array<i64: 1, 8, 256>}, {transform_indices = @transform_7, window_bounds = array<i64: 1, 8, 256>}]} {
    %c0_i32 = arith.constant 0 : i32
    %0 = arith.cmpi eq, %arg1, %c0_i32 : i32
    %1 = arith.extui %0 : i1 to i32
    %c0_i32_0 = arith.constant 0 : i32
    %2 = arith.cmpi ne, %1, %c0_i32_0 : i32
    scf.if %2 {
      %cst_43 = arith.constant 0.000000e+00 : f32
      %62 = vector.broadcast %cst_43 : f32 to vector<8x256xf32>
      %c0_44 = arith.constant 0 : index
      %c0_45 = arith.constant 0 : index
      %63 = vector.load %arg10[%c0_44, %c0_45] : memref<8x256xf32, #tpu.memory_space<vmem>>, vector<8x256xf32>
      tpu.vector_store %arg10[%c0_44, %c0_45], %62 {strides = array<i32>} : memref<8x256xf32, #tpu.memory_space<vmem>>, vector<8x256xf32>,
    } else {
    }
    %c0 = arith.constant 0 : index
    %c0_1 = arith.constant 0 : index
    %c0_2 = arith.constant 0 : index
    %3 = vector.load %arg5[%c0, %c0_1, %c0_2] : memref<1x1x8xf32, #tpu.memory_space<vmem>>, vector<1x1x8xf32>
    %4 = vector.shape_cast %3 : vector<1x1x8xf32> to vector<1x8xf32>
    %c0_3 = arith.constant 0 : index
    %c0_4 = arith.constant 0 : index
    %c0_5 = arith.constant 0 : index
    %5 = vector.load %arg2[%c0_3, %c0_4, %c0_5] : memref<1x8x256xbf16, #tpu.memory_space<vmem>>, vector<1x8x128xbf16>
    %6 = vector.shape_cast %5 : vector<1x8x128xbf16> to vector<8x128xbf16>
    %c0_6 = arith.constant 0 : index
    %c0_7 = arith.constant 0 : index
    %c0_8 = arith.constant 0 : index
    %7 = vector.load %arg3[%c0_6, %c0_7, %c0_8] : memref<1x8x256xbf16, #tpu.memory_space<vmem>>, vector<1x8x128xbf16>
    %8 = vector.shape_cast %7 : vector<1x8x128xbf16> to vector<8x128xbf16>
    %c0_9 = arith.constant 0 : index
    %c0_10 = arith.constant 0 : index
    %c0_11 = arith.constant 0 : index
    %9 = vector.load %arg4[%c0_9, %c0_10, %c0_11] : memref<1x8x256xbf16, #tpu.memory_space<vmem>>, vector<1x8x128xbf16>
    %10 = vector.shape_cast %9 : vector<1x8x128xbf16> to vector<8x128xbf16>
    %cst = arith.constant dense<0.000000e+00> : vector<8x8xf32>
    %11 = tpu.matmul %6, %8, %cst {dimension_numbers = #tpu.dot_dimension_numbers<[1], [1], [0], [0], [0, 0, 1, 0], [], []>} : vector<8x128xbf16>, vector<8x128xbf16>, vector<8x8xf32> -> vector<8x8xf32>
    %12 = vector.broadcast %4 : vector<1x8xf32> to vector<8x8xf32>
    %13 = arith.addf %11, %12 : vector<8x8xf32>
    %cst_12 = arith.constant dense<0xFF800000> : vector<8xf32>
    %14 = vector.multi_reduction <maximumf>, %13, %cst_12 [1] : vector<8x8xf32> to vector<8xf32>
    %15 = vector.shape_cast %14 : vector<8xf32> to vector<8x1xf32>
    %16 = vector.broadcast %15 : vector<8x1xf32> to vector<8x8xf32>
    %17 = arith.subf %13, %16 : vector<8x8xf32>
    %18 = math.exp %17 : vector<8x8xf32>
    %cst_13 = arith.constant dense<0.000000e+00> : vector<8xf32>
    %19 = vector.multi_reduction <add>, %18, %cst_13 [1] : vector<8x8xf32> to vector<8xf32>
    %20 = vector.shape_cast %19 : vector<8xf32> to vector<8x1xf32>
    %21 = tpu.reciprocal %20 {approx = true} : vector<8x1xf32> -> vector<8x1xf32>
    %22 = vector.broadcast %21 : vector<8x1xf32> to vector<8x8xf32>
    %23 = arith.mulf %18, %22 : vector<8x8xf32>
    %24 = arith.truncf %23 : vector<8x8xf32> to vector<8x8xbf16>
    %cst_14 = arith.constant dense<0.000000e+00> : vector<8x128xf32>
    %25 = tpu.matmul %24, %10, %cst_14 {dimension_numbers = #tpu.dot_dimension_numbers<[1], [0], [0], [1], [0, 0, 1, 1], [], []>} : vector<8x8xbf16>, vector<8x128xbf16>, vector<8x128xf32> -> vector<8x128xf32>
    %c0_15 = arith.constant 0 : index
    %c0_16 = arith.constant 0 : index
    %26 = vector.load %arg10[%c0_15, %c0_16] : memref<8x256xf32, #tpu.memory_space<vmem>>, vector<8x256xf32>
    %27 = arith.truncf %25 : vector<8x128xf32> to vector<8x128xbf16>
    %c0_17 = arith.constant 0 : index
    %c0_18 = arith.constant 0 : index
    %28 = vector.load %arg6[%c0_17, %c0_18] : memref<256x256xbf16, #tpu.memory_space<vmem>>, vector<128x256xbf16>
    %cst_19 = arith.constant dense<0.000000e+00> : vector<8x256xf32>
    %29 = tpu.matmul %27, %28, %cst_19 {dimension_numbers = #tpu.dot_dimension_numbers<[1], [0], [0], [1], [0, 0, 1, 1], [], []>} : vector<8x128xbf16>, vector<128x256xbf16>, vector<8x256xf32> -> vector<8x256xf32>
    %30 = arith.addf %26, %29 : vector<8x256xf32>
    %c0_20 = arith.constant 0 : index
    %c0_21 = arith.constant 0 : index
    %31 = vector.load %arg10[%c0_20, %c0_21] : memref<8x256xf32, #tpu.memory_space<vmem>>, vector<8x256xf32>
    tpu.vector_store %arg10[%c0_20, %c0_21], %30 {strides = array<i32>} : memref<8x256xf32, #tpu.memory_space<vmem>>, vector<8x256xf32>,
    %c0_22 = arith.constant 0 : index
    %c0_23 = arith.constant 0 : index
    %c128 = arith.constant 128 : index
    %32 = vector.load %arg2[%c0_22, %c0_23, %c128] : memref<1x8x256xbf16, #tpu.memory_space<vmem>>, vector<1x8x128xbf16>
    %33 = vector.shape_cast %32 : vector<1x8x128xbf16> to vector<8x128xbf16>
    %c0_24 = arith.constant 0 : index
    %c0_25 = arith.constant 0 : index
    %c128_26 = arith.constant 128 : index
    %34 = vector.load %arg3[%c0_24, %c0_25, %c128_26] : memref<1x8x256xbf16, #tpu.memory_space<vmem>>, vector<1x8x128xbf16>
    %35 = vector.shape_cast %34 : vector<1x8x128xbf16> to vector<8x128xbf16>
    %c0_27 = arith.constant 0 : index
    %c0_28 = arith.constant 0 : index
    %c128_29 = arith.constant 128 : index
    %36 = vector.load %arg4[%c0_27, %c0_28, %c128_29] : memref<1x8x256xbf16, #tpu.memory_space<vmem>>, vector<1x8x128xbf16>
    %37 = vector.shape_cast %36 : vector<1x8x128xbf16> to vector<8x128xbf16>
    %cst_30 = arith.constant dense<0.000000e+00> : vector<8x8xf32>
    %38 = tpu.matmul %33, %35, %cst_30 {dimension_numbers = #tpu.dot_dimension_numbers<[1], [1], [0], [0], [0, 0, 1, 0], [], []>} : vector<8x128xbf16>, vector<8x128xbf16>, vector<8x8xf32> -> vector<8x8xf32>
    %39 = vector.broadcast %4 : vector<1x8xf32> to vector<8x8xf32>
    %40 = arith.addf %38, %39 : vector<8x8xf32>
    %cst_31 = arith.constant dense<0xFF800000> : vector<8xf32>
    %41 = vector.multi_reduction <maximumf>, %40, %cst_31 [1] : vector<8x8xf32> to vector<8xf32>
    %42 = vector.shape_cast %41 : vector<8xf32> to vector<8x1xf32>
    %43 = vector.broadcast %42 : vector<8x1xf32> to vector<8x8xf32>
    %44 = arith.subf %40, %43 : vector<8x8xf32>
    %45 = math.exp %44 : vector<8x8xf32>
    %cst_32 = arith.constant dense<0.000000e+00> : vector<8xf32>
    %46 = vector.multi_reduction <add>, %45, %cst_32 [1] : vector<8x8xf32> to vector<8xf32>
    %47 = vector.shape_cast %46 : vector<8xf32> to vector<8x1xf32>
    %48 = tpu.reciprocal %47 {approx = true} : vector<8x1xf32> -> vector<8x1xf32>
    %49 = vector.broadcast %48 : vector<8x1xf32> to vector<8x8xf32>
    %50 = arith.mulf %45, %49 : vector<8x8xf32>
    %51 = arith.truncf %50 : vector<8x8xf32> to vector<8x8xbf16>
    %cst_33 = arith.constant dense<0.000000e+00> : vector<8x128xf32>
    %52 = tpu.matmul %51, %37, %cst_33 {dimension_numbers = #tpu.dot_dimension_numbers<[1], [0], [0], [1], [0, 0, 1, 1], [], []>} : vector<8x8xbf16>, vector<8x128xbf16>, vector<8x128xf32> -> vector<8x128xf32>
    %c0_34 = arith.constant 0 : index
    %c0_35 = arith.constant 0 : index
    %53 = vector.load %arg10[%c0_34, %c0_35] : memref<8x256xf32, #tpu.memory_space<vmem>>, vector<8x256xf32>
    %54 = arith.truncf %52 : vector<8x128xf32> to vector<8x128xbf16>
    %c128_36 = arith.constant 128 : index
    %c0_37 = arith.constant 0 : index
    %55 = vector.load %arg6[%c128_36, %c0_37] : memref<256x256xbf16, #tpu.memory_space<vmem>>, vector<128x256xbf16>
    %cst_38 = arith.constant dense<0.000000e+00> : vector<8x256xf32>
    %56 = tpu.matmul %54, %55, %cst_38 {dimension_numbers = #tpu.dot_dimension_numbers<[1], [0], [0], [1], [0, 0, 1, 1], [], []>} : vector<8x128xbf16>, vector<128x256xbf16>, vector<8x256xf32> -> vector<8x256xf32>
    %57 = arith.addf %53, %56 : vector<8x256xf32>
    %c0_39 = arith.constant 0 : index
    %c0_40 = arith.constant 0 : index
    %58 = vector.load %arg10[%c0_39, %c0_40] : memref<8x256xf32, #tpu.memory_space<vmem>>, vector<8x256xf32>
    tpu.vector_store %arg10[%c0_39, %c0_40], %57 {strides = array<i32>} : memref<8x256xf32, #tpu.memory_space<vmem>>, vector<8x256xf32>,
    %c0_i32_41 = arith.constant 0 : i32
    %59 = arith.cmpi eq, %arg1, %c0_i32_41 : i32
    %60 = arith.extui %59 : i1 to i32
    %c0_i32_42 = arith.constant 0 : i32
    %61 = arith.cmpi ne, %60, %c0_i32_42 : i32
    scf.if %61 {
      %c0_43 = arith.constant 0 : index
      %c0_44 = arith.constant 0 : index
      %62 = vector.load %arg10[%c0_43, %c0_44] : memref<8x256xf32, #tpu.memory_space<vmem>>, vector<8x256xf32>
      %c0_45 = arith.constant 0 : index
      %c0_46 = arith.constant 0 : index
      %63 = vector.load %arg7[%c0_45, %c0_46] : memref<1x256xf32, #tpu.memory_space<vmem>>, vector<1x256xf32>
      %64 = vector.broadcast %63 : vector<1x256xf32> to vector<8x256xf32>
      %65 = arith.addf %62, %64 : vector<8x256xf32>
      %c0_47 = arith.constant 0 : index
      %c0_48 = arith.constant 0 : index
      %c0_49 = arith.constant 0 : index
      %66 = vector.load %arg8[%c0_47, %c0_48, %c0_49] : memref<1x8x256xf32, #tpu.memory_space<vmem>>, vector<1x8x256xf32>
      %67 = vector.shape_cast %66 : vector<1x8x256xf32> to vector<8x256xf32>
      %68 = arith.addf %65, %67 : vector<8x256xf32>
      %c0_50 = arith.constant 0 : index
      %c0_51 = arith.constant 0 : index
      %c0_52 = arith.constant 0 : index
      %69 = vector.load %arg9[%c0_50, %c0_51, %c0_52] : memref<1x8x256xf32, #tpu.memory_space<vmem>>, vector<1x8x256xf32>
      %70 = vector.shape_cast %69 : vector<1x8x256xf32> to vector<8x256xf32>
      %71 = vector.shape_cast %68 : vector<8x256xf32> to vector<1x8x256xf32>
      tpu.vector_store %arg9[%c0_50, %c0_51, %c0_52], %71 {strides = array<i32>} : memref<1x8x256xf32, #tpu.memory_space<vmem>>, vector<1x8x256xf32>,
    } else {
    }
    return
  }
  func.func @transform_0(%arg0: i32, %arg1: i32) -> (i32, i32, i32) {
    %c0_i32 = arith.constant 0 : i32
    %0 = arith.addi %c0_i32, %arg1 : i32
    %c0_i32_0 = arith.constant 0 : i32
    %c0_i32_1 = arith.constant 0 : i32
    return %arg0, %c0_i32_0, %0 : i32, i32, i32
  }
  func.func @transform_1(%arg0: i32, %arg1: i32) -> (i32, i32, i32) {
    %c1_i32 = arith.constant 1 : i32
    %0 = arith.addi %c1_i32, %arg1 : i32
    %c0_i32 = arith.constant 0 : i32
    %c0_i32_0 = arith.constant 0 : i32
    return %arg0, %c0_i32, %0 : i32, i32, i32
  }
  func.func @transform_2(%arg0: i32, %arg1: i32) -> (i32, i32, i32) {
    %c2_i32 = arith.constant 2 : i32
    %0 = arith.addi %c2_i32, %arg1 : i32
    %c0_i32 = arith.constant 0 : i32
    %c0_i32_0 = arith.constant 0 : i32
    return %arg0, %c0_i32, %0 : i32, i32, i32
  }
  func.func @transform_3(%arg0: i32, %arg1: i32) -> (i32, i32, i32) {
    %c0_i32 = arith.constant 0 : i32
    %c0_i32_0 = arith.constant 0 : i32
    %c0_i32_1 = arith.constant 0 : i32
    return %arg0, %c0_i32, %c0_i32_0 : i32, i32, i32
  }
  func.func @transform_4(%arg0: i32, %arg1: i32) -> (i32, i32) {
    %c0_i32 = arith.constant 0 : i32
    %c0_i32_0 = arith.constant 0 : i32
    return %arg1, %c0_i32 : i32, i32
  }
  func.func @transform_5(%arg0: i32, %arg1: i32) -> (i32, i32) {
    %c0_i32 = arith.constant 0 : i32
    %c0_i32_0 = arith.constant 0 : i32
    %c0_i32_1 = arith.constant 0 : i32
    return %c0_i32, %c0_i32_0 : i32, i32
  }
  func.func @transform_6(%arg0: i32, %arg1: i32) -> (i32, i32, i32) {
    %c0_i32 = arith.constant 0 : i32
    %c0_i32_0 = arith.constant 0 : i32
    %c0_i32_1 = arith.constant 0 : i32
    return %arg0, %c0_i32, %c0_i32_0 : i32, i32, i32
  }
  func.func @transform_7(%arg0: i32, %arg1: i32) -> (i32, i32, i32) {
    %c0_i32 = arith.constant 0 : i32
    %c0_i32_0 = arith.constant 0 : i32
    %c0_i32_1 = arith.constant 0 : i32
    return %arg0, %c0_i32, %c0_i32_0 : i32, i32, i32
  }
}

module attributes {stable_mosaic.version = 11 : i64} {
  func.func @_ln_ffn_kernel(%arg0: i32, %arg1: i32, %arg2: memref<16x256xf32, #tpu.memory_space<vmem>>, %arg3: memref<1x256xf32, #tpu.memory_space<vmem>>, %arg4: memref<1x256xf32, #tpu.memory_space<vmem>>, %arg5: memref<256x512xbf16, #tpu.memory_space<vmem>>, %arg6: memref<1x512xf32, #tpu.memory_space<vmem>>, %arg7: memref<512x256xbf16, #tpu.memory_space<vmem>>, %arg8: memref<1x256xf32, #tpu.memory_space<vmem>>, %arg9: memref<1x256xf32, #tpu.memory_space<vmem>>, %arg10: memref<1x256xf32, #tpu.memory_space<vmem>>, %arg11: memref<16x256xf32, #tpu.memory_space<vmem>>, %arg12: memref<16x256xf32, #tpu.memory_space<vmem>>, %arg13: memref<16x256xbf16, #tpu.memory_space<vmem>>) attributes {dimension_semantics = [#tpu.dimension_semantics<parallel>, #tpu.dimension_semantics<arbitrary>], iteration_bounds = array<i64: 1, 1>, scalar_prefetch = 0 : i64, scratch_operands = 2 : i64, tpu.core_type = #tpu.core_type<tc>, window_params = [{transform_indices = @transform_0, window_bounds = array<i64: 16, 256>}, {pipeline_mode = #tpu.pipeline_mode<synchronous>, transform_indices = @transform_1, window_bounds = array<i64: 1, 256>}, {pipeline_mode = #tpu.pipeline_mode<synchronous>, transform_indices = @transform_2, window_bounds = array<i64: 1, 256>}, {transform_indices = @transform_3, window_bounds = array<i64: 256, 512>}, {transform_indices = @transform_4, window_bounds = array<i64: 1, 512>}, {transform_indices = @transform_5, window_bounds = array<i64: 512, 256>}, {pipeline_mode = #tpu.pipeline_mode<synchronous>, transform_indices = @transform_6, window_bounds = array<i64: 1, 256>}, {pipeline_mode = #tpu.pipeline_mode<synchronous>, transform_indices = @transform_7, window_bounds = array<i64: 1, 256>}, {pipeline_mode = #tpu.pipeline_mode<synchronous>, transform_indices = @transform_8, window_bounds = array<i64: 1, 256>}, {transform_indices = @transform_9, window_bounds = array<i64: 16, 256>}]} {
    %c0_i32 = arith.constant 0 : i32
    %0 = arith.cmpi eq, %arg1, %c0_i32 : i32
    %1 = arith.extui %0 : i1 to i32
    %c0_i32_0 = arith.constant 0 : i32
    %2 = arith.cmpi ne, %1, %c0_i32_0 : i32
    scf.if %2 {
      %c0_16 = arith.constant 0 : index
      %c0_17 = arith.constant 0 : index
      %20 = vector.load %arg2[%c0_16, %c0_17] : memref<16x256xf32, #tpu.memory_space<vmem>>, vector<16x256xf32>
      %cst_18 = arith.constant dense<0.000000e+00> : vector<16xf32>
      %21 = vector.multi_reduction <add>, %20, %cst_18 [1] : vector<16x256xf32> to vector<16xf32>
      %22 = vector.shape_cast %21 : vector<16xf32> to vector<16x1xf32>
      %cst_19 = arith.constant 2.560000e+02 : f32
      %23 = vector.broadcast %cst_19 : f32 to vector<16x1xf32>
      %24 = arith.divf %22, %23 : vector<16x1xf32>
      %25 = vector.broadcast %24 : vector<16x1xf32> to vector<16x256xf32>
      %26 = arith.subf %20, %25 : vector<16x256xf32>
      %27 = arith.mulf %26, %26 : vector<16x256xf32>
      %cst_20 = arith.constant dense<0.000000e+00> : vector<16xf32>
      %28 = vector.multi_reduction <add>, %27, %cst_20 [1] : vector<16x256xf32> to vector<16xf32>
      %29 = vector.shape_cast %28 : vector<16xf32> to vector<16x1xf32>
      %cst_21 = arith.constant 2.560000e+02 : f32
      %30 = vector.broadcast %cst_21 : f32 to vector<16x1xf32>
      %31 = arith.divf %29, %30 : vector<16x1xf32>
      %32 = vector.broadcast %24 : vector<16x1xf32> to vector<16x256xf32>
      %33 = arith.subf %20, %32 : vector<16x256xf32>
      %cst_22 = arith.constant 9.99999997E-7 : f32
      %34 = vector.broadcast %cst_22 : f32 to vector<16x1xf32>
      %35 = arith.addf %31, %34 : vector<16x1xf32>
      %36 = math.rsqrt %35 : vector<16x1xf32>
      %37 = vector.broadcast %36 : vector<16x1xf32> to vector<16x256xf32>
      %38 = arith.mulf %33, %37 : vector<16x256xf32>
      %c0_23 = arith.constant 0 : index
      %c0_24 = arith.constant 0 : index
      %39 = vector.load %arg3[%c0_23, %c0_24] : memref<1x256xf32, #tpu.memory_space<vmem>>, vector<1x256xf32>
      %40 = vector.broadcast %39 : vector<1x256xf32> to vector<16x256xf32>
      %41 = arith.mulf %38, %40 : vector<16x256xf32>
      %c0_25 = arith.constant 0 : index
      %c0_26 = arith.constant 0 : index
      %42 = vector.load %arg4[%c0_25, %c0_26] : memref<1x256xf32, #tpu.memory_space<vmem>>, vector<1x256xf32>
      %43 = vector.broadcast %42 : vector<1x256xf32> to vector<16x256xf32>
      %44 = arith.addf %41, %43 : vector<16x256xf32>
      %45 = arith.truncf %44 : vector<16x256xf32> to vector<16x256xbf16>
      %c0_27 = arith.constant 0 : index
      %c0_28 = arith.constant 0 : index
      %46 = vector.load %arg13[%c0_27, %c0_28] : memref<16x256xbf16, #tpu.memory_space<vmem>>, vector<16x256xbf16>
      tpu.vector_store %arg13[%c0_27, %c0_28], %45 {strides = array<i32>} : memref<16x256xbf16, #tpu.memory_space<vmem>>, vector<16x256xbf16>,
      %cst_29 = arith.constant 0.000000e+00 : f32
      %47 = vector.broadcast %cst_29 : f32 to vector<16x256xf32>
      %c0_30 = arith.constant 0 : index
      %c0_31 = arith.constant 0 : index
      %48 = vector.load %arg12[%c0_30, %c0_31] : memref<16x256xf32, #tpu.memory_space<vmem>>, vector<16x256xf32>
      tpu.vector_store %arg12[%c0_30, %c0_31], %47 {strides = array<i32>} : memref<16x256xf32, #tpu.memory_space<vmem>>, vector<16x256xf32>,
    } else {
    }
    %c0 = arith.constant 0 : index
    %c0_1 = arith.constant 0 : index
    %3 = vector.load %arg13[%c0, %c0_1] : memref<16x256xbf16, #tpu.memory_space<vmem>>, vector<16x256xbf16>
    %c0_2 = arith.constant 0 : index
    %c0_3 = arith.constant 0 : index
    %4 = vector.load %arg5[%c0_2, %c0_3] : memref<256x512xbf16, #tpu.memory_space<vmem>>, vector<256x512xbf16>
    %cst = arith.constant dense<0.000000e+00> : vector<16x512xf32>
    %5 = tpu.matmul %3, %4, %cst {dimension_numbers = #tpu.dot_dimension_numbers<[1], [0], [0], [1], [0, 0, 1, 1], [], []>} : vector<16x256xbf16>, vector<256x512xbf16>, vector<16x512xf32> -> vector<16x512xf32>
    %c0_4 = arith.constant 0 : index
    %c0_5 = arith.constant 0 : index
    %6 = vector.load %arg6[%c0_4, %c0_5] : memref<1x512xf32, #tpu.memory_space<vmem>>, vector<1x512xf32>
    %7 = vector.broadcast %6 : vector<1x512xf32> to vector<16x512xf32>
    %8 = arith.addf %5, %7 : vector<16x512xf32>
    %cst_6 = arith.constant 0.000000e+00 : f32
    %9 = vector.broadcast %cst_6 : f32 to vector<16x512xf32>
    %10 = arith.maximumf %8, %9 : vector<16x512xf32>
    %11 = arith.truncf %10 : vector<16x512xf32> to vector<16x512xbf16>
    %c0_7 = arith.constant 0 : index
    %c0_8 = arith.constant 0 : index
    %12 = vector.load %arg12[%c0_7, %c0_8] : memref<16x256xf32, #tpu.memory_space<vmem>>, vector<16x256xf32>
    %c0_9 = arith.constant 0 : index
    %c0_10 = arith.constant 0 : index
    %13 = vector.load %arg7[%c0_9, %c0_10] : memref<512x256xbf16, #tpu.memory_space<vmem>>, vector<512x256xbf16>
    %cst_11 = arith.constant dense<0.000000e+00> : vector<16x256xf32>
    %14 = tpu.matmul %11, %13, %cst_11 {dimension_numbers = #tpu.dot_dimension_numbers<[1], [0], [0], [1], [0, 0, 1, 1], [], []>} : vector<16x512xbf16>, vector<512x256xbf16>, vector<16x256xf32> -> vector<16x256xf32>
    %15 = arith.addf %12, %14 : vector<16x256xf32>
    %c0_12 = arith.constant 0 : index
    %c0_13 = arith.constant 0 : index
    %16 = vector.load %arg12[%c0_12, %c0_13] : memref<16x256xf32, #tpu.memory_space<vmem>>, vector<16x256xf32>
    tpu.vector_store %arg12[%c0_12, %c0_13], %15 {strides = array<i32>} : memref<16x256xf32, #tpu.memory_space<vmem>>, vector<16x256xf32>,
    %c0_i32_14 = arith.constant 0 : i32
    %17 = arith.cmpi eq, %arg1, %c0_i32_14 : i32
    %18 = arith.extui %17 : i1 to i32
    %c0_i32_15 = arith.constant 0 : i32
    %19 = arith.cmpi ne, %18, %c0_i32_15 : i32
    scf.if %19 {
      %c0_16 = arith.constant 0 : index
      %c0_17 = arith.constant 0 : index
      %20 = vector.load %arg12[%c0_16, %c0_17] : memref<16x256xf32, #tpu.memory_space<vmem>>, vector<16x256xf32>
      %c0_18 = arith.constant 0 : index
      %c0_19 = arith.constant 0 : index
      %21 = vector.load %arg8[%c0_18, %c0_19] : memref<1x256xf32, #tpu.memory_space<vmem>>, vector<1x256xf32>
      %22 = vector.broadcast %21 : vector<1x256xf32> to vector<16x256xf32>
      %23 = arith.addf %20, %22 : vector<16x256xf32>
      %c0_20 = arith.constant 0 : index
      %c0_21 = arith.constant 0 : index
      %24 = vector.load %arg2[%c0_20, %c0_21] : memref<16x256xf32, #tpu.memory_space<vmem>>, vector<16x256xf32>
      %25 = arith.addf %23, %24 : vector<16x256xf32>
      %cst_22 = arith.constant dense<0.000000e+00> : vector<16xf32>
      %26 = vector.multi_reduction <add>, %25, %cst_22 [1] : vector<16x256xf32> to vector<16xf32>
      %27 = vector.shape_cast %26 : vector<16xf32> to vector<16x1xf32>
      %cst_23 = arith.constant 2.560000e+02 : f32
      %28 = vector.broadcast %cst_23 : f32 to vector<16x1xf32>
      %29 = arith.divf %27, %28 : vector<16x1xf32>
      %30 = vector.broadcast %29 : vector<16x1xf32> to vector<16x256xf32>
      %31 = arith.subf %25, %30 : vector<16x256xf32>
      %32 = arith.mulf %31, %31 : vector<16x256xf32>
      %cst_24 = arith.constant dense<0.000000e+00> : vector<16xf32>
      %33 = vector.multi_reduction <add>, %32, %cst_24 [1] : vector<16x256xf32> to vector<16xf32>
      %34 = vector.shape_cast %33 : vector<16xf32> to vector<16x1xf32>
      %cst_25 = arith.constant 2.560000e+02 : f32
      %35 = vector.broadcast %cst_25 : f32 to vector<16x1xf32>
      %36 = arith.divf %34, %35 : vector<16x1xf32>
      %37 = vector.broadcast %29 : vector<16x1xf32> to vector<16x256xf32>
      %38 = arith.subf %25, %37 : vector<16x256xf32>
      %cst_26 = arith.constant 9.99999997E-7 : f32
      %39 = vector.broadcast %cst_26 : f32 to vector<16x1xf32>
      %40 = arith.addf %36, %39 : vector<16x1xf32>
      %41 = math.rsqrt %40 : vector<16x1xf32>
      %42 = vector.broadcast %41 : vector<16x1xf32> to vector<16x256xf32>
      %43 = arith.mulf %38, %42 : vector<16x256xf32>
      %c0_27 = arith.constant 0 : index
      %c0_28 = arith.constant 0 : index
      %44 = vector.load %arg9[%c0_27, %c0_28] : memref<1x256xf32, #tpu.memory_space<vmem>>, vector<1x256xf32>
      %45 = vector.broadcast %44 : vector<1x256xf32> to vector<16x256xf32>
      %46 = arith.mulf %43, %45 : vector<16x256xf32>
      %c0_29 = arith.constant 0 : index
      %c0_30 = arith.constant 0 : index
      %47 = vector.load %arg10[%c0_29, %c0_30] : memref<1x256xf32, #tpu.memory_space<vmem>>, vector<1x256xf32>
      %48 = vector.broadcast %47 : vector<1x256xf32> to vector<16x256xf32>
      %49 = arith.addf %46, %48 : vector<16x256xf32>
      %c0_31 = arith.constant 0 : index
      %c0_32 = arith.constant 0 : index
      %50 = vector.load %arg11[%c0_31, %c0_32] : memref<16x256xf32, #tpu.memory_space<vmem>>, vector<16x256xf32>
      tpu.vector_store %arg11[%c0_31, %c0_32], %49 {strides = array<i32>} : memref<16x256xf32, #tpu.memory_space<vmem>>, vector<16x256xf32>,
    } else {
    }
    return
  }
  func.func @transform_0(%arg0: i32, %arg1: i32) -> (i32, i32) {
    %c0_i32 = arith.constant 0 : i32
    %c0_i32_0 = arith.constant 0 : i32
    return %arg0, %c0_i32 : i32, i32
  }
  func.func @transform_1(%arg0: i32, %arg1: i32) -> (i32, i32) {
    %c0_i32 = arith.constant 0 : i32
    %c0_i32_0 = arith.constant 0 : i32
    %c0_i32_1 = arith.constant 0 : i32
    return %c0_i32, %c0_i32_0 : i32, i32
  }
  func.func @transform_2(%arg0: i32, %arg1: i32) -> (i32, i32) {
    %c0_i32 = arith.constant 0 : i32
    %c0_i32_0 = arith.constant 0 : i32
    %c0_i32_1 = arith.constant 0 : i32
    return %c0_i32, %c0_i32_0 : i32, i32
  }
  func.func @transform_3(%arg0: i32, %arg1: i32) -> (i32, i32) {
    %c0_i32 = arith.constant 0 : i32
    %c0_i32_0 = arith.constant 0 : i32
    return %c0_i32, %arg1 : i32, i32
  }
  func.func @transform_4(%arg0: i32, %arg1: i32) -> (i32, i32) {
    %c0_i32 = arith.constant 0 : i32
    %c0_i32_0 = arith.constant 0 : i32
    return %c0_i32, %arg1 : i32, i32
  }
  func.func @transform_5(%arg0: i32, %arg1: i32) -> (i32, i32) {
    %c0_i32 = arith.constant 0 : i32
    %c0_i32_0 = arith.constant 0 : i32
    return %arg1, %c0_i32 : i32, i32
  }
  func.func @transform_6(%arg0: i32, %arg1: i32) -> (i32, i32) {
    %c0_i32 = arith.constant 0 : i32
    %c0_i32_0 = arith.constant 0 : i32
    %c0_i32_1 = arith.constant 0 : i32
    return %c0_i32, %c0_i32_0 : i32, i32
  }
  func.func @transform_7(%arg0: i32, %arg1: i32) -> (i32, i32) {
    %c0_i32 = arith.constant 0 : i32
    %c0_i32_0 = arith.constant 0 : i32
    %c0_i32_1 = arith.constant 0 : i32
    return %c0_i32, %c0_i32_0 : i32, i32
  }
  func.func @transform_8(%arg0: i32, %arg1: i32) -> (i32, i32) {
    %c0_i32 = arith.constant 0 : i32
    %c0_i32_0 = arith.constant 0 : i32
    %c0_i32_1 = arith.constant 0 : i32
    return %c0_i32, %c0_i32_0 : i32, i32
  }
  func.func @transform_9(%arg0: i32, %arg1: i32) -> (i32, i32) {
    %c0_i32 = arith.constant 0 : i32
    %c0_i32_0 = arith.constant 0 : i32
    return %arg0, %c0_i32 : i32, i32
  }
}

</mosaic_0001>

<bundles_post_ra>
// kernel: encoder_forward.6
= control target key start
LH: loop header
LB: loop body
LE: loop exit
PB: predicated region body
PF: predicated region fallthrough
CT: control target
= control target key end

     0   :  { %10 = vsyncpa [#allocation4], 0  ;;  %s1375_s0 = inlined_call_operand.vmem [shape: f32[16,256], index: 0, kind: input, shape index: {}]   ;;  %s1376_s1 = inlined_call_operand.vmem [shape: f32[1,256], index: 1, kind: input, shape index: {}]   ;;  %s1377_s2 = inlined_call_operand.vmem [shape: f32[1,256], index: 2, kind: input, shape index: {}]   ;;  %s1378_s3 = inlined_call_operand.hbm [shape: bf16[256,768], index: 3, kind: input, shape index: {}]   ;;  %s1379_s4 = inlined_call_operand.vmem [shape: f32[1,768], index: 4, kind: input, shape index: {}]   ;;  %s1380_s5 = inlined_call_operand.vmem [shape: bf16[16,768], index: 5, kind: output, shape index: {}]  }
   0x1   :  { %12 = vsyncpa [#allocation4 + $0x1], 0  ;;  %s1179_s18 = smov 0   ;;  %s1181_s19 = smov 0  }
   0x2   :  { %s1183_s20 = smov 0   ;;  %s1185_s21 = smov 0  }
   0x3   :  { %s1187_s22 = smov 0   ;;  %s1189_s23 = smov 0  }
   0x4 LB: > { %s808_s24 = sadd.s32 4294967295, %s1143_s23   ;;  %s27_s25 = sadd.s32 1, %s1139_s22  ;;  %s1143_s23 = sphi %s1189_s23, %s18_s23   ;;  %s1139_s22 = sphi %s1187_s22, %s1388_s22   ;;  %s1135_s21 = sphi %s1185_s21, %s1387_s21   ;;  %s1131_s20 = sphi %s1183_s20, %s1386_s20   ;;  %s1127_s19 = sphi %s1181_s19, %s1385_s19   ;;  %s1123_s18 = sphi %s1179_s18, %s1384_s18  }
   0x5   : > { %p28_p0 = scmp.ge.s32.totalorder %s27_s25, 3  ;;  %s105_s26 = sadd.s32 1, %s1131_s20 }
   0x6   : > { %p112_p1 = scmp.ne.s32.totalorder %s1131_s20, %s1127_s19  ;;  %p113_p2 = scmp.eq.s32.totalorder %s1143_s23, 0 }
   0x7   : > { %s1390_s25 = smov (%p28_p0, %s27_s25), 0  ;;  %p118_p4 = scmp.ne.s32.totalorder %s1127_s19, %s1123_s18 }
   0x8   : > { %p1215_p3 = por %p113_p2, %p112_p1  ;;  %s102_s28 = ssub.s32 %s1139_s22, %s1390_s25 }
   0x9   : > { %p119_p5 = scmp.eq.s32.totalorder %s808_s24, 0  ;;  %p103_p6 = scmp.eq.s32.totalorder %s102_s28, 0 }
   0xa   : > { %p170_p7 = scmp.eq.s32.totalorder %s808_s24, 2  ;;  %p1004_p10 = scmp.lt.s32.totalorder %s1143_s23, 3 }
   0xb   : > { %p1222_p8 = por %p119_p5, %p118_p4  ;;  %s212_s7 = sand.u32 1, %s1131_s20  }
   0xc   : > { %s1227_s30 = scalar_select %p103_p6, %s1131_s20, %s105_s26  }
   0xd   : > { %p1229_p9 = por %p170_p7, %p112_p1  ;;  %s962_s8 = sshll.u32 %s1139_s22, 3 }
   0xe   : > { %s813_s9 = sshll.u32 %s212_s7, 8  ;;  %s221_s12 = scalar_lea.hbm %s1378_s3, %s962_s8 }
   0xf   : > { %s222_s13 = sshll.u32 %s221_s12, 4  ;;  %s216_s14 = scalar_lea.vmem [#allocation3], %s813_s9  ;;  %s223_s13 = int_to_ptr.hbm [resolvable:$true] %s222_s13 }
  0x10   : > { %s224_s15 = sshll.u32 %s216_s14, 4  ;;  %p1001_p11 = pnand %p1004_p10, %p1215_p3  ;;  %s225_s15 = int_to_ptr.vmem [resolvable:$true] %s224_s15 }
  0x11   : > { %p816_p12 = scmp.ge.s32.totalorder %s1143_s23, 1  ;;  %s213_s16 = scalar_lea.sflag [#allocation4], %s212_s7 }
  0x12   : > { %s1145_s17 = smov 384   ;;  %s1146_s18 = smov 128  }
  0x13   : > { %s1147_s24 = smov 8   ;;  %p240_p13 = scmp.lt.s32.totalorder %s1143_s23, 4 }
  0x14   : > { %1003 = dma.hbm_to_vmem [thread:$0]  (!%p1001_p11), %s223_s13, 4096, %s225_s15, %s213_s16, %s1145_s17, %s1146_s18, %s1147_s24  }
  0x15   : > { %p241_p0 = pnand %p816_p12, %p240_p13 }
  0x16   : > { %s246_s26 = sand.u32 (!%p241_p0), 1, %s1127_s19  }
  0x17   : > { %244 = sbr.rel (%p241_p0) target bundleno = 510 (0x1fe), region = 40  ;;  %s817_s28 = sshll.u32 (!%p241_p0), %s246_s26, 8 }
  0x18   : > { %s247_s8 = scalar_lea.sflag (!%p241_p0), [#allocation4], %s246_s26  ;;  %s1244_s9 = scalar_lea.vmem (!%p241_p0), [#allocation3], %s817_s28 }
  0x1c   : > { %1118 = dma.done.wait (%p1222_p8), %s247_s8, 4096  }
  0x1d   : > { %1120 = vsyncadd (%p1222_p8), %s247_s8, 4294963200  ;;  %s818_s27 = sshll.u32 %s246_s26, 4  ;;  %s819_s7 = sshll.u32 %s1135_s21, 1 }
  0x1e   : > { %p296_p1 = scmp.lt.s32.totalorder %s819_s7, 5  ;;  %s1257_s13 = scalar_lea.vmem [#allocation5], %s818_s27 }
  0x1f   : > { %p820_p2 = scmp.ne.s32.totalorder %s1135_s21, 0 }
  0x20   : > { %s1392_s7 = smov (!%p296_p1, %s819_s7), 5 }
  0x21   : > { %s298_s12 = scalar_lea.vmem %s1379_s4, %s1392_s7  ;;  %305 = sbr.rel (%p820_p2) target bundleno = 320 (0x140), region = 48 }
  0x26   : > { %v306_v0 = vld [vmem:[%s1375_s0] sm:$0xff]  ;;  %v307_v1 = vld [vmem:[%s1375_s0 + $0x8] sm:$0xff]  ;;  %v308_v3 = vld [vmem:[%s1375_s0 + $0x10] sm:$0xff]  ;;  %v1148_v6 = vmov 256.0  }
  0x27   : > { %v310_v2 = vadd.f32 %v307_v1, %v306_v0  ;;  %v309_v4 = vld [vmem:[%s1375_s0 + $0x18] sm:$0xff]  ;;  %1057 = vrcp.f32 %v1148_v6  ;;  %v367_v37 = vld [vmem:[%s1376_s1] sm:$0x3] }
  0x28   : > { %v313_v5 = vadd.f32 %v309_v4, %v308_v3  ;;  %v377_v40 = vld [vmem:[%s1377_s2] sm:$0x3]  ;;  %v369_v43 = vperm.slane %v367_v37, 0  ;;  %v370_v44 = vperm.slane %v367_v37, 1 }
  0x29   : > { %311 = vadd.xlane.f32.xlu0 %v310_v2  ;;  %v379_v47 = vperm.slane %v377_v40, 0  ;;  %v380_v48 = vperm.slane %v377_v40, 1 }
  0x2d   : > { %v1058_v7 = vpop.eup %1057 }
  0x2e   : > { %v317_v8 = vmul.f32 256.0, %v1058_v7  ;;  %vm321_vm0 = vweird.f32 %v1058_v7 }
  0x30   : > { %v318_v9 = vsub.f32 1.0, %v317_v8 }
  0x31   : > { %314 = vadd.xlane.f32.xlu0 %v313_v5 }
  0x32   : > { %v319_v10 = vmul.f32 %v1058_v7, %v318_v9 }
  0x34   : > { %v320_v11 = vadd.f32 %v1058_v7, %v319_v10 }
  0x36   : > { %v322_v12 = vsel %vm321_vm0, %v1058_v7, %v320_v11 }
  0x9c   : > { %v312_v13 = vpop.xlane.xlu0 %311 }
  0x9d   : > { %v323_v14 = vmul.f32 %v322_v12, %v312_v13 }
  0x9f   : > { %v325_v15 = vsub.f32 %v306_v0, %v323_v14  ;;  %v326_v16 = vsub.f32 %v307_v1, %v323_v14 }
  0xa1   : > { %v329_v17 = vmul.f32 %v325_v15, %v325_v15  ;;  %v330_v18 = vmul.f32 %v326_v16, %v326_v16 }
  0xa3   : > { %v333_v19 = vadd.f32 %v330_v18, %v329_v17 }
  0xa4   : > { %v315_v20 = vpop.xlane.xlu0 %314 }
  0xa5   : > { %v324_v21 = vmul.f32 %v322_v12, %v315_v20  ;;  %334 = vadd.xlane.f32.xlu1 %v333_v19 }
  0xa7   : > { %v327_v22 = vsub.f32 %v308_v3, %v324_v21  ;;  %v328_v23 = vsub.f32 %v309_v4, %v324_v21 }
  0xa9   : > { %v331_v24 = vmul.f32 %v327_v22, %v327_v22  ;;  %v332_v25 = vmul.f32 %v328_v23, %v328_v23 }
  0xab   : > { %v336_v26 = vadd.f32 %v332_v25, %v331_v24 }
  0xad   : > { %337 = vadd.xlane.f32.xlu1 %v336_v26 }
 0x118   : > { %v335_v27 = vpop.xlane.xlu1 %334 }
 0x119   : > { %v339_v28 = vmul.f32 %v335_v27, %v322_v12 }
 0x11b   : > { %v341_v29 = vadd.f32 1e-06, %v339_v28 }
 0x11d   : > { %1059 = vrsqrt.f32 %v341_v29  ;;  %vm349_vm2 = vweird.f32 %v341_v29 }
 0x120   : > { %v338_v30 = vpop.xlane.xlu1 %337 }
 0x121   : > { %v340_v31 = vmul.f32 %v338_v30, %v322_v12 }
 0x123   : > { %v1060_v32 = vpop.eup %1059  ;;  %v342_v33 = vadd.f32 1e-06, %v340_v31 }
 0x124   : > { %v344_v34 = vmul.f32 %v1060_v32, %v341_v29  ;;  %vm350_vm1 = vweird.f32 %v1060_v32 }
 0x125   : > { %1061 = vrsqrt.f32 %v342_v33  ;;  %vm351_vm3 = vmor %vm349_vm2, %vm350_vm1  ;;  %vm359_vm5 = vweird.f32 %v342_v33 }
 0x126   : > { %v345_v35 = vmul.f32 %v1060_v32, %v344_v34 }
 0x128   : > { %v346_v36 = vmul.f32 0.5, %v345_v35 }
 0x12a   : > { %v347_v38 = vsub.f32 1.5, %v346_v36 }
 0x12b   : > { %v1062_v39 = vpop.eup %1061 }
 0x12c   : > { %v348_v41 = vmul.f32 %v1060_v32, %v347_v38  ;;  %v354_v42 = vmul.f32 %v1062_v39, %v342_v33  ;;  %vm360_vm4 = vweird.f32 %v1062_v39 }
 0x12d   : > { %vm361_vm6 = vmor %vm359_vm5, %vm360_vm4 }
 0x12e   : > { %v352_v45 = vsel %vm351_vm3, %v1060_v32, %v348_v41  ;;  %v355_v46 = vmul.f32 %v1062_v39, %v354_v42 }
 0x12f   : > { %v363_v49 = vmul.f32 %v352_v45, %v325_v15  ;;  %v364_v50 = vmul.f32 %v352_v45, %v326_v16 }
 0x130   : > { %v356_v51 = vmul.f32 0.5, %v355_v46 }
 0x131   : > { %v373_v52 = vmul.f32 %v369_v43, %v363_v49  ;;  %v374_v53 = vmul.f32 %v370_v44, %v364_v50 }
 0x132   : > { %v357_v54 = vsub.f32 1.5, %v356_v51 }
 0x133   : > { %v383_v55 = vadd.f32 %v379_v47, %v373_v52  ;;  %v384_v56 = vadd.f32 %v380_v48, %v374_v53 }
 0x134   : > { %v358_v57 = vmul.f32 %v1062_v39, %v357_v54 }
 0x135   : > { %v387_v58 = vpack.c.bf16 %v384_v56, %v383_v55 }
 0x136   : > { %v362_v59 = vsel %vm361_vm6, %v1062_v39, %v358_v57 }
 0x137   : > { %389 = vst [vmem:[#allocation2] sm:$0xff] %v387_v58  ;;  %v365_v60 = vmul.f32 %v362_v59, %v327_v22  ;;  %v366_v61 = vmul.f32 %v362_v59, %v328_v23 }
 0x139   : > { %v375_v62 = vmul.f32 %v369_v43, %v365_v60  ;;  %v376_v63 = vmul.f32 %v370_v44, %v366_v61 }
 0x13b   : > { %v385_v0 = vadd.f32 %v379_v47, %v375_v62  ;;  %v386_v1 = vadd.f32 %v380_v48, %v376_v63 }
 0x13d   : > { %v388_v2 = vpack.c.bf16 %v386_v1, %v385_v0 }
 0x13f   : > { %390 = vst [vmem:[#allocation2 + $0x8] sm:$0xff] %v388_v2 }
 0x140 PF: > { %v887_v3 = vld [vmem:[%s1244_s9 + $0x70] sm:$0xf]  ;;  %v980_v4 = vld [vmem:[%s1244_s9 + $0x74] sm:$0xf0]  ;;  %v979_v8 = vld [vmem:[%s1244_s9 + $0x74] sm:$0xf] }
 0x141   : > { %v951_v5 = vld [vmem:[%s1244_s9 + $0xf0] sm:$0xf]  ;;  %v888_v6 = vor.u32 %v980_v4, %v887_v3  ;;  %v996_v7 = vld [vmem:[%s1244_s9 + $0xf4] sm:$0xf0]  ;;  %v889_v9 = vld [vmem:[%s1244_s9 + $0x78] sm:$0xf0] }
 0x142   : > { %v952_v10 = vor.u32 %v996_v7, %v951_v5  ;;  %v892_v11 = vor.u32 %v979_v8, %v889_v9  ;;  %v995_v12 = vld [vmem:[%s1244_s9 + $0xf4] sm:$0xf]  ;;  %v953_v13 = vld [vmem:[%s1244_s9 + $0xf8] sm:$0xf0]  ;;  %v879_v14 = vld [vmem:[%s1244_s9 + $0x60] sm:$0xf] }
 0x143   : > { %601 = vmatpush.bf16.msra.mxu0 %v888_v6  ;;  %v956_v15 = vor.u32 %v995_v12, %v953_v13  ;;  %v978_v16 = vld [vmem:[%s1244_s9 + $0x64] sm:$0xf0]  ;;  %v943_v17 = vld [vmem:[%s1244_s9 + $0xe0] sm:$0xf]  ;;  %v977_v21 = vld [vmem:[%s1244_s9 + $0x64] sm:$0xf] }
 0x144   : > { %v994_v18 = vld [vmem:[%s1244_s9 + $0xe4] sm:$0xf0]  ;;  %615 = vmatpush.bf16.msra.mxu1 %v952_v10  ;;  %629 = vmatpush.bf16.msra.mxu2 %v892_v11  ;;  %v880_v19 = vor.u32 %v978_v16, %v879_v14  ;;  %v881_v22 = vld [vmem:[%s1244_s9 + $0x68] sm:$0xf0]  ;;  %v993_v23 = vld [vmem:[%s1244_s9 + $0xe4] sm:$0xf] }
 0x145   : > { %v944_v20 = vor.u32 %v994_v18, %v943_v17  ;;  %643 = vmatpush.bf16.msra.mxu3 %v956_v15  ;;  %v884_v24 = vor.u32 %v977_v21, %v881_v22  ;;  %v945_v25 = vld [vmem:[%s1244_s9 + $0xe8] sm:$0xf0]  ;;  %v871_v26 = vld [vmem:[%s1244_s9 + $0x50] sm:$0xf]  ;;  %v976_v27 = vld [vmem:[%s1244_s9 + $0x54] sm:$0xf0] }
 0x146   : > { %v948_v28 = vor.u32 %v993_v23, %v945_v25  ;;  %v935_v29 = vld [vmem:[%s1244_s9 + $0xd0] sm:$0xf]  ;;  %v992_v30 = vld [vmem:[%s1244_s9 + $0xd4] sm:$0xf0]  ;;  %v975_v31 = vld [vmem:[%s1244_s9 + $0x54] sm:$0xf]  ;;  %v872_v32 = vor.u32 %v976_v27, %v871_v26 }
 0x147   : > { %602 = vmatpush.bf16.msra.mxu0 %v880_v19  ;;  %v873_v33 = vld [vmem:[%s1244_s9 + $0x58] sm:$0xf0]  ;;  %v991_v34 = vld [vmem:[%s1244_s9 + $0xd4] sm:$0xf]  ;;  %v936_v36 = vor.u32 %v992_v30, %v935_v29  ;;  %v863_v38 = vld [vmem:[%s1244_s9 + $0x40] sm:$0xf] }
 0x148   : > { %v937_v35 = vld [vmem:[%s1244_s9 + $0xd8] sm:$0xf0]  ;;  %616 = vmatpush.bf16.msra.mxu1 %v944_v20  ;;  %630 = vmatpush.bf16.msra.mxu2 %v884_v24  ;;  %v876_v37 = vor.u32 %v975_v31, %v873_v33  ;;  %v974_v39 = vld [vmem:[%s1244_s9 + $0x44] sm:$0xf0]  ;;  %v927_v40 = vld [vmem:[%s1244_s9 + $0xc0] sm:$0xf] }
 0x149   : > { %644 = vmatpush.bf16.msra.mxu3 %v948_v28  ;;  %v940_v41 = vor.u32 %v991_v34, %v937_v35  ;;  %v990_v42 = vld [vmem:[%s1244_s9 + $0xc4] sm:$0xf0]  ;;  %v973_v43 = vld [vmem:[%s1244_s9 + $0x44] sm:$0xf]  ;;  %v865_v44 = vld [vmem:[%s1244_s9 + $0x48] sm:$0xf0]  ;;  %v864_v47 = vor.u32 %v974_v39, %v863_v38 }
 0x14a   : > { %v989_v45 = vld [vmem:[%s1244_s9 + $0xc4] sm:$0xf]  ;;  %v929_v46 = vld [vmem:[%s1244_s9 + $0xc8] sm:$0xf0]  ;;  %v928_v48 = vor.u32 %v990_v42, %v927_v40  ;;  %v868_v49 = vor.u32 %v973_v43, %v865_v44  ;;  %v855_v50 = vld [vmem:[%s1244_s9 + $0x30] sm:$0xf] }
 0x14b   : > { %603 = vmatpush.bf16.msra.mxu0 %v872_v32  ;;  %v972_v51 = vld [vmem:[%s1244_s9 + $0x34] sm:$0xf0]  ;;  %v919_v52 = vld [vmem:[%s1244_s9 + $0xb0] sm:$0xf]  ;;  %v932_v53 = vor.u32 %v989_v45, %v929_v46  ;;  %v971_v55 = vld [vmem:[%s1244_s9 + $0x34] sm:$0xf] }
 0x14c   : > { %617 = vmatpush.bf16.msra.mxu1 %v936_v36  ;;  %631 = vmatpush.bf16.msra.mxu2 %v876_v37  ;;  %v988_v54 = vld [vmem:[%s1244_s9 + $0xb4] sm:$0xf0]  ;;  %v857_v56 = vld [vmem:[%s1244_s9 + $0x38] sm:$0xf0]  ;;  %v987_v57 = vld [vmem:[%s1244_s9 + $0xb4] sm:$0xf]  ;;  %v856_v59 = vor.u32 %v972_v51, %v855_v50 }
 0x14d   : > { %645 = vmatpush.bf16.msra.mxu3 %v940_v41  ;;  %v921_v58 = vld [vmem:[%s1244_s9 + $0xb8] sm:$0xf0]  ;;  %v920_v60 = vor.u32 %v988_v54, %v919_v52  ;;  %v860_v61 = vor.u32 %v971_v55, %v857_v56  ;;  %v847_v62 = vld [vmem:[%s1244_s9 + $0x20] sm:$0xf]  ;;  %v970_v63 = vld [vmem:[%s1244_s9 + $0x24] sm:$0xf0] }
 0x14e   : > { %v911_v0 = vld [vmem:[%s1244_s9 + $0xa0] sm:$0xf]  ;;  %v924_v1 = vor.u32 %v987_v57, %v921_v58  ;;  %v986_v2 = vld [vmem:[%s1244_s9 + $0xa4] sm:$0xf0]  ;;  %v969_v3 = vld [vmem:[%s1244_s9 + $0x24] sm:$0xf]  ;;  %v848_v7 = vor.u32 %v970_v63, %v847_v62 }
 0x14f   : > { %604 = vmatpush.bf16.msra.mxu0 %v864_v47  ;;  %v849_v4 = vld [vmem:[%s1244_s9 + $0x28] sm:$0xf0]  ;;  %v985_v5 = vld [vmem:[%s1244_s9 + $0xa4] sm:$0xf]  ;;  %v912_v8 = vor.u32 %v986_v2, %v911_v0  ;;  %v839_v10 = vld [vmem:[%s1244_s9 + $0x10] sm:$0xf] }
 0x150   : > { %618 = vmatpush.bf16.msra.mxu1 %v928_v48  ;;  %632 = vmatpush.bf16.msra.mxu2 %v868_v49  ;;  %v913_v6 = vld [vmem:[%s1244_s9 + $0xa8] sm:$0xf0]  ;;  %v852_v9 = vor.u32 %v969_v3, %v849_v4  ;;  %v968_v11 = vld [vmem:[%s1244_s9 + $0x14] sm:$0xf0]  ;;  %v903_v12 = vld [vmem:[%s1244_s9 + $0x90] sm:$0xf] }
 0x151   : > { %646 = vmatpush.bf16.msra.mxu3 %v932_v53  ;;  %v916_v13 = vor.u32 %v985_v5, %v913_v6  ;;  %v984_v14 = vld [vmem:[%s1244_s9 + $0x94] sm:$0xf0]  ;;  %v967_v15 = vld [vmem:[%s1244_s9 + $0x14] sm:$0xf]  ;;  %v841_v16 = vld [vmem:[%s1244_s9 + $0x18] sm:$0xf0]  ;;  %v840_v19 = vor.u32 %v968_v11, %v839_v10 }
 0x152   : > { %v983_v17 = vld [vmem:[%s1244_s9 + $0x94] sm:$0xf]  ;;  %v905_v18 = vld [vmem:[%s1244_s9 + $0x98] sm:$0xf0]  ;;  %v904_v20 = vor.u32 %v984_v14, %v903_v12  ;;  %v844_v21 = vor.u32 %v967_v15, %v841_v16  ;;  %v831_v22 = vld [vmem:[%s1244_s9] sm:$0xf] }
 0x153   : > { %605 = vmatpush.bf16.msra.mxu0 %v856_v59  ;;  %v966_v23 = vld [vmem:[%s1244_s9 + $0x4] sm:$0xf0]  ;;  %v895_v24 = vld [vmem:[%s1244_s9 + $0x80] sm:$0xf]  ;;  %v908_v25 = vor.u32 %v983_v17, %v905_v18  ;;  %v965_v27 = vld [vmem:[%s1244_s9 + $0x4] sm:$0xf] }
 0x154   : > { %619 = vmatpush.bf16.msra.mxu1 %v920_v60  ;;  %633 = vmatpush.bf16.msra.mxu2 %v860_v61  ;;  %v982_v26 = vld [vmem:[%s1244_s9 + $0x84] sm:$0xf0]  ;;  %v833_v28 = vld [vmem:[%s1244_s9 + $0x8] sm:$0xf0]  ;;  %v981_v29 = vld [vmem:[%s1244_s9 + $0x84] sm:$0xf]  ;;  %v832_v31 = vor.u32 %v966_v23, %v831_v22 }
 0x155   : > { %647 = vmatpush.bf16.msra.mxu3 %v924_v1  ;;  %v897_v30 = vld [vmem:[%s1244_s9 + $0x88] sm:$0xf0]  ;;  %v823_v32 = vld [vmem:[#allocation2] sm:$0xf]  ;;  %v964_v33 = vld [vmem:[#allocation2 + $0x4] sm:$0xf0]  ;;  %v896_v34 = vor.u32 %v982_v26, %v895_v24  ;;  %v836_v35 = vor.u32 %v965_v27, %v833_v28 }
 0x156   : > { %v963_v36 = vld [vmem:[#allocation2 + $0x4] sm:$0xf]  ;;  %v825_v37 = vld [vmem:[#allocation2 + $0x8] sm:$0xf0]  ;;  %v900_v38 = vor.u32 %v981_v29, %v897_v30  ;;  %v824_v39 = vor.u32 %v964_v33, %v823_v32  ;;  %v425_v41 = vld [vmem:[%s298_s12] sm:$0x3] }
 0x157   : > { %606 = vmatpush.bf16.msra.mxu0 %v848_v7  ;;  %v828_v40 = vor.u32 %v963_v36, %v825_v37  ;;  %v427_v42 = vperm.slane %v425_v41, 0  ;;  %v428_v45 = vperm.slane %v425_v41, 1  ;;  %s997_s7 = sshll.u32 (%p1229_p9), %s1135_s21, 3 }
 0x158   : > { %620 = vmatpush.bf16.msra.mxu1 %v912_v8  ;;  %634 = vmatpush.bf16.msra.mxu2 %v852_v9  ;;  %s673_s15 = scalar_lea.vmem (%p1229_p9), %s1380_s5, %s997_s7 }
 0x159   : > { %648 = vmatpush.bf16.msra.mxu3 %v916_v13 }
 0x15b   : > { %607 = vmatpush.bf16.msra.mxu0 %v840_v19 }
 0x15c   : > { %621 = vmatpush.bf16.msra.mxu1 %v904_v20  ;;  %635 = vmatpush.bf16.msra.mxu2 %v844_v21 }
 0x15d   : > { %649 = vmatpush.bf16.msra.mxu3 %v908_v25 }
 0x15f   : > { %608 = vmatpush.bf16.msra.mxu0 %v832_v31 }
 0x160   : > { %622 = vmatpush.bf16.msra.mxu1 %v896_v34  ;;  %636 = vmatpush.bf16.msra.mxu2 %v836_v35 }
 0x161   : > { %650 = vmatpush.bf16.msra.mxu3 %v900_v38 }
 0x162   : > { %609 = vmatmul.bf16.vlgmr.msra.gmra.mxu0 %v824_v39 }
 0x163   : > { %623 = vmatmul.bf16.vlgmr.msra.gmra.mxu1 %v828_v40  ;;  %637 = vmatmul.bf16.vlgmr.msra.gmra.mxu2 %v824_v39 }
 0x164   : > { %651 = vmatmul.bf16.vlgmr.msra.gmra.mxu3 %v828_v40 }
 0x1df   : > { %v610_v43 = vpop.f32.mrf.mxu0 }
 0x1e0   : > { %v611_v44 = vadd.f32 %v610_v43, %v427_v42  ;;  %v624_v46 = vpop.f32.mrf.mxu1 }
 0x1e2   : > { %v625_v48 = vadd.f32 %v624_v46, %v611_v44 }
 0x1e6   : > { %v638_v47 = vpop.f32.mrf.mxu2 }
 0x1e7   : > { %v639_v49 = vadd.f32 %v638_v47, %v428_v45  ;;  %v652_v50 = vpop.f32.mrf.mxu3  ;;  %v612_v52 = vpop.f32.mrf.mxu0 }
 0x1e8   : > { %v613_v54 = vadd.f32 %v612_v52, %v427_v42  ;;  %v626_v57 = vpop.f32.mrf.mxu1 }
 0x1e9   : > { %v653_v51 = vadd.f32 %v652_v50, %v639_v49 }
 0x1ea   : > { %v627_v59 = vadd.f32 %v626_v57, %v613_v54 }
 0x1eb   : > { %v657_v53 = vpack.c.bf16 %v653_v51, %v625_v48 }
 0x1ed   : > { %659 = vst [vmem:[%s1257_s13] sm:$0xff] %v657_v53 }
 0x1ee   : > { %v640_v55 = vpop.f32.mrf.mxu2 }
 0x1ef   : > { %v641_v56 = vadd.f32 %v640_v55, %v428_v45  ;;  %v654_v58 = vpop.f32.mrf.mxu3 }
 0x1f1   : > { %v655_v60 = vadd.f32 %v654_v58, %v641_v56  ;;  %667 = sbr.rel (!%p1229_p9) target bundleno = 510 (0x1fe), region = 52 }
 0x1f3   : > { %v658_v61 = vpack.c.bf16 %v655_v60, %v627_v59 }
 0x1f4   : > { %v704_v62 = vld [vmem:[%s1257_s13] sm:$0xff] (%p1229_p9) }
 0x1f5   : > { %660 = vst [vmem:[%s1257_s13 + $0x8] sm:$0xff] %v658_v61 }
 0x1f6   : > { %705 = vst [vmem:[%s673_s15] sm:$0xff] %v704_v62 }
 0x1fc   : > { %v706_v63 = vld [vmem:[%s1257_s13 + $0x8] sm:$0xff] }
 0x1fd   : > { %707 = vst [vmem:[%s673_s15 + $0x18] sm:$0xff] %v706_v63 }
 0x1fe PF: > { %s18_s23 = sadd.s32 1, %s1143_s23   ;;  %s1384_s18 = smov %s1127_s19 }
 0x1ff   : > { %p15_p3 = scmp.ge.s32.totalorder %s18_s23, 5   ;;  %s1385_s19 = smov %s1131_s20 }
 0x200   : > { %s1386_s20 = smov %s1227_s30  ;;  %s1387_s21 = smov %s1139_s22 }
 0x201   : > { %s1388_s22 = smov %s1390_s25  ;;  %17 = sbr.rel (!%p15_p3) target bundleno = 4 (0x4), region = 128 }
 0x206   :  { %723 = vsyncpa [#allocation4], 1 }
 0x207   :  { %725 = vsyncpa [#allocation4 + $0x1], 1 }

// kernel: encoder_forward.7
= control target key start
LH: loop header
LB: loop body
LE: loop exit
PB: predicated region body
PF: predicated region fallthrough
CT: control target
= control target key end

     0   :  { %12 = vsyncpa [#allocation4], 0  ;;  %s1313_s24 = smov 0   ;;  %s1315_s25 = smov 0   ;;  %s1389_s0 = inlined_call_operand.vmem [shape: bf16[2,8,768], index: 0, kind: input, shape index: {}, may-alias: {0,1,2}]   ;;  %s1390_s1 = inlined_call_operand.vmem [shape: bf16[2,8,768], index: 1, kind: input, shape index: {}, may-alias: {0,1,2}]   ;;  %s1391_s2 = inlined_call_operand.vmem [shape: bf16[2,8,768], index: 2, kind: input, shape index: {}, may-alias: {0,1,2}]   ;;  %s1392_s3 = inlined_call_operand.vmem [shape: f32[2,1,8], index: 3, kind: input, shape index: {}]   ;;  %s1393_s4 = inlined_call_operand.hbm [shape: bf16[256,256], index: 4, kind: input, shape index: {}]   ;;  %s1394_s5 = inlined_call_operand.vmem [shape: f32[1,256], index: 5, kind: input, shape index: {}]   ;;  %s1395_s6 = inlined_call_operand.vmem [shape: f32[2,8,256], index: 6, kind: input, shape index: {}, may-alias: {6,7}]   ;;  %s1396_s7 = inlined_call_operand.vmem [shape: f32[2,8,256], index: 7, kind: output, shape index: {}, may-alias: {6,7}]  }
   0x1   :  { %s1317_s26 = smov 0  }
   0x2 LB: > { %s979_s27 = sadd.s32 4294967295, %s1268_s26   ;;  %s30_s28 = sadd.s32 1, %s1264_s25  ;;  %s1268_s26 = sphi %s1317_s26, %s18_s26   ;;  %s1264_s25 = sphi %s1315_s25, %s1398_s25   ;;  %s1260_s24 = sphi %s1313_s24, %s1397_s24  }
   0x3   : > { %p32_p0 = scmp.ge.s32.totalorder %s30_s28, 2  ;;  %p981_p1 = scmp.ge.s32.totalorder %s1268_s26, 1 }
   0x4   : > { %p248_p2 = scmp.lt.s32.totalorder %s1268_s26, 3  ;;  %p1173_p4 = scmp.eq.s32.totalorder %s979_s27, 0 }
   0x5   : > { %s1400_s28 = smov (%p32_p0, %s30_s28), 0  ;;  %s263_s8 = sshll.u32 %s1393_s4, 4  ;;  %s264_s8 = int_to_ptr.hbm [resolvable:$true] %s263_s8 }
   0x6   : > { %p249_p3 = pnand %p981_p1, %p248_p2  ;;  %s1270_s9 = smov [#allocation3]  }
   0x7   : > { %s265_s10 = sshll.u32 %s1270_s9, 4  ;;  %s1271_s11 = smov 128   ;;  %s266_s10 = int_to_ptr.vmem [resolvable:$true] %s265_s10 }
   0x8   : > { %p1169_p5 = pneg %p249_p3  ;;  %s1272_s12 = smov 8  }
   0x9   : > { %341 = sbr.rel (%p249_p3) target bundleno = 694 (0x2b6), region = 48 }
   0xa   : > { %p1170_p6 = pnand %p1173_p4, %p1169_p5 }
   0xc   : > { %1172 = dma.hbm_to_vmem [thread:$0]  (!%p1170_p6), %s264_s8, 4096, %s266_s10, [#allocation4], %s1271_s11, %s1271_s11, %s1272_s12  }
   0xe   : > { %1255 = dma.done.wait (%p1173_p4), [#allocation4], 4096  }
   0xf   : > { %1257 = vsyncadd (%p1173_p4), [#allocation4], 4294963200  ;;  %p407_p7 = scmp.lt.s32.totalorder %s1260_s24, 1  ;;  %vm481_vm0 = vcmask 64512   ;;  %vm497_vm1 = vcmask 1043456  }
  0x10   : > { %v1052_v27 = vld [vmem:[#allocation3 + $0x70] sm:$0xf]  ;;  %v1146_v28 = vld [vmem:[#allocation3 + $0x74] sm:$0xf0]  ;;  %v1145_v29 = vld [vmem:[#allocation3 + $0x74] sm:$0xf] }
  0x11   : > { %s1402_s24 = smov (!%p407_p7, %s1260_s24), 1  ;;  %v1053_v30 = vor.u32 %v1146_v28, %v1052_v27  ;;  %v1054_v31 = vld [vmem:[#allocation3 + $0x78] sm:$0xf0]  ;;  %v1117_v32 = vld [vmem:[#allocation3 + $0xf0] sm:$0xf] }
  0x12   : > { %s1338_s13 = smul.u32 24, %s1402_s24  ;;  %s442_s17 = scalar_lea.vmem %s1392_s3, %s1402_s24  ;;  %v1162_v33 = vld [vmem:[#allocation3 + $0xf4] sm:$0xf0]  ;;  %v1057_v34 = vor.u32 %v1145_v29, %v1054_v31  ;;  %v1161_v36 = vld [vmem:[#allocation3 + $0xf4] sm:$0xf] }
  0x13   : > { %v1203_v5 = vld [vmem:[%s442_s17] ss:$0 sm:$0xff]  ;;  %v1118_v35 = vor.u32 %v1162_v33, %v1117_v32  ;;  %v1119_v37 = vld [vmem:[#allocation3 + $0xf8] sm:$0xf0]  ;;  %v1144_v40 = vld [vmem:[#allocation3 + $0x64] sm:$0xf0] }
  0x14   : > { %s1126_s14 = sadd.s32 8, %s1338_s13  ;;  %s414_s23 = scalar_lea.vmem %s1389_s0, %s1338_s13  ;;  %v1044_v38 = vld [vmem:[#allocation3 + $0x60] sm:$0xf]  ;;  %v1122_v39 = vor.u32 %v1161_v36, %v1119_v37  ;;  %v1143_v41 = vld [vmem:[#allocation3 + $0x64] sm:$0xf] }
  0x15   : > { %s425_s20 = scalar_lea.vmem %s1390_s1, %s1126_s14  ;;  %v462_v2 = vld [vmem:[%s414_s23] sm:$0xf]  ;;  %v643_v3 = vld [vmem:[%s414_s23 + $0x4] sm:$0xf]  ;;  %s1128_s27 = sadd.s32 16, %s1338_s13  ;;  %v1045_v43 = vor.u32 %v1144_v40, %v1044_v38 }
  0x16   : > { %v463_v0 = vld [vmem:[%s425_s20] sm:$0xf]  ;;  %v644_v1 = vld [vmem:[%s425_s20 + $0x4] sm:$0xf]  ;;  %s437_s8 = scalar_lea.vmem %s1391_s2, %s1128_s27  ;;  %v1046_v42 = vld [vmem:[#allocation3 + $0x68] sm:$0xf0] }
  0x17   : > { %475 = vmatpush.bf16.xpose.msra.mxu2 %v463_v0  ;;  %653 = vmatpush.bf16.xpose.msra.mxu1 %v644_v1  ;;  %v464_v23 = vld [vmem:[%s437_s8] sm:$0xf]  ;;  %v645_v25 = vld [vmem:[%s437_s8 + $0x4] sm:$0xf]  ;;  %v1049_v44 = vor.u32 %v1143_v41, %v1046_v42  ;;  %v1160_v46 = vld [vmem:[#allocation3 + $0xe4] sm:$0xf0] }
  0x18   : > { %v499_v24 = vsel %vm497_vm1, %v464_v23, 0  ;;  %v675_v26 = vsel %vm497_vm1, %v645_v25, 0  ;;  %v1109_v45 = vld [vmem:[#allocation3 + $0xe0] sm:$0xf]  ;;  %v1159_v47 = vld [vmem:[#allocation3 + $0xe4] sm:$0xf] }
  0x19   : > { %508 = vmatpush.bf16.msra.mxu3 %v499_v24  ;;  %684 = vmatpush.bf16.msra.mxu0 %v675_v26  ;;  %v1110_v48 = vor.u32 %v1160_v46, %v1109_v45  ;;  %v1111_v49 = vld [vmem:[#allocation3 + $0xe8] sm:$0xf0]  ;;  %v1036_v50 = vld [vmem:[#allocation3 + $0x50] sm:$0xf]  ;;  %v1142_v51 = vld [vmem:[#allocation3 + $0x54] sm:$0xf0] }
  0x1a   : > { %v1114_v52 = vor.u32 %v1159_v47, %v1111_v49  ;;  %v1141_v53 = vld [vmem:[#allocation3 + $0x54] sm:$0xf]  ;;  %v1038_v54 = vld [vmem:[#allocation3 + $0x58] sm:$0xf0]  ;;  %v1101_v55 = vld [vmem:[#allocation3 + $0xd0] sm:$0xf]  ;;  %v1037_v56 = vor.u32 %v1142_v51, %v1036_v50 }
  0x1b   : > { %v1158_v57 = vld [vmem:[#allocation3 + $0xd4] sm:$0xf0]  ;;  %v1157_v58 = vld [vmem:[#allocation3 + $0xd4] sm:$0xf]  ;;  %v1103_v59 = vld [vmem:[#allocation3 + $0xd8] sm:$0xf0]  ;;  %v1041_v60 = vor.u32 %v1141_v53, %v1038_v54 }
  0x1c   : > { %v1102_v61 = vor.u32 %v1158_v57, %v1101_v55  ;;  %v1028_v62 = vld [vmem:[#allocation3 + $0x40] sm:$0xf]  ;;  %v1140_v63 = vld [vmem:[#allocation3 + $0x44] sm:$0xf0]  ;;  %v1139_v0 = vld [vmem:[#allocation3 + $0x44] sm:$0xf]  ;;  %v1106_v1 = vor.u32 %v1157_v58, %v1103_v59 }
  0x1d   : > { %626 = vmatpush.bf16.msrb.mxu3 %v1057_v34  ;;  %802 = vmatpush.bf16.msrb.mxu0 %v1122_v39  ;;  %v1012_v25 = vld [vmem:[#allocation3 + $0x20] sm:$0xf]  ;;  %v1136_v26 = vld [vmem:[#allocation3 + $0x24] sm:$0xf0]  ;;  %v1135_v28 = vld [vmem:[#allocation3 + $0x24] sm:$0xf] }
  0x1e   : > { %476 = vmatmul.bf16.vlgmr.msra.gmra.mxu2 %v462_v2  ;;  %654 = vmatmul.bf16.vlgmr.msra.gmra.mxu1 %v643_v3  ;;  %v1030_v2 = vld [vmem:[#allocation3 + $0x48] sm:$0xf0]  ;;  %v1093_v3 = vld [vmem:[#allocation3 + $0xc0] sm:$0xf]  ;;  %v1151_v32 = vld [vmem:[#allocation3 + $0xa4] sm:$0xf] }
  0x1f   : > { %613 = vmatpush.bf16.msrb.mxu2 %v1053_v30  ;;  %789 = vmatpush.bf16.msrb.mxu1 %v1118_v35  ;;  %v1077_v29 = vld [vmem:[#allocation3 + $0xa0] sm:$0xf]  ;;  %v1152_v30 = vld [vmem:[#allocation3 + $0xa4] sm:$0xf0]  ;;  %v1014_v31 = vld [vmem:[#allocation3 + $0x28] sm:$0xf0]  ;;  %v1013_v35 = vor.u32 %v1136_v26, %v1012_v25 }
  0x20   : > { %v1079_v33 = vld [vmem:[#allocation3 + $0xa8] sm:$0xf0]  ;;  %v1078_v38 = vor.u32 %v1152_v30, %v1077_v29  ;;  %v1004_v39 = vld [vmem:[#allocation3 + $0x10] sm:$0xf]  ;;  %v1134_v40 = vld [vmem:[#allocation3 + $0x14] sm:$0xf0]  ;;  %v1017_v41 = vor.u32 %v1135_v28, %v1014_v31 }
  0x21   : > { %627 = vmatpush.bf16.msrb.mxu3 %v1049_v44  ;;  %803 = vmatpush.bf16.msrb.mxu0 %v1114_v52  ;;  %v1082_v42 = vor.u32 %v1151_v32, %v1079_v33  ;;  %v1069_v44 = vld [vmem:[#allocation3 + $0x90] sm:$0xf]  ;;  %v1150_v45 = vld [vmem:[#allocation3 + $0x94] sm:$0xf0]  ;;  %v1006_v47 = vld [vmem:[#allocation3 + $0x18] sm:$0xf0]  ;;  %v1005_v50 = vor.u32 %v1134_v40, %v1004_v39 }
  0x22   : > { %v1071_v49 = vld [vmem:[#allocation3 + $0x98] sm:$0xf0]  ;;  %v1132_v57 = vld [vmem:[#allocation3 + $0x4] sm:$0xf0]  ;;  %v1131_v58 = vld [vmem:[#allocation3 + $0x4] sm:$0xf] }
  0x23   : > { %614 = vmatpush.bf16.msrb.mxu2 %v1045_v43  ;;  %790 = vmatpush.bf16.msrb.mxu1 %v1110_v48  ;;  %v1133_v43 = vld [vmem:[#allocation3 + $0x14] sm:$0xf]  ;;  %s1129_s9 = sshll.u32 %s1402_s24, 4 }
  0x24   : > { %v1149_v48 = vld [vmem:[#allocation3 + $0x94] sm:$0xf]  ;;  %v1009_v51 = vor.u32 %v1133_v43, %v1006_v47  ;;  %s448_s14 = scalar_lea.vmem %s1395_s6, %s1129_s9  ;;  %s453_s16 = scalar_lea.vmem %s1396_s7, %s1129_s9 }
  0x25   : > { %628 = vmatpush.bf16.msrb.mxu3 %v1041_v60  ;;  %804 = vmatpush.bf16.msrb.mxu0 %v1106_v1  ;;  %v1074_v52 = vor.u32 %v1149_v48, %v1071_v49  ;;  %v998_v60 = vld [vmem:[#allocation3 + $0x8] sm:$0xf0] }
  0x27   : > { %615 = vmatpush.bf16.msrb.mxu2 %v1037_v56  ;;  %791 = vmatpush.bf16.msrb.mxu1 %v1102_v61  ;;  %v996_v56 = vld [vmem:[#allocation3] sm:$0xf]  ;;  %v1001_v61 = vor.u32 %v1131_v58, %v998_v60 }
  0x28   : > { %v997_v59 = vor.u32 %v1132_v57, %v996_v56 }
  0x9b   : > { %v655_v4 = vpop.f32.mrf.mxu1 }
  0x9c   : > { %v656_v10 = vadd.f32 %v1203_v5, %v655_v4  ;;  %v1156_v4 = vld [vmem:[#allocation3 + $0xc4] sm:$0xf0] }
  0x9e   : > { %v659_v12 = vsel %vm481_vm0, %v656_v10, -inf }
  0xa1   : > { %v477_v6 = vpop.f32.mrf.mxu2 }
  0xa2   : > { %v478_v7 = vadd.f32 %v1203_v5, %v477_v6  ;;  %v1155_v5 = vld [vmem:[#allocation3 + $0xc4] sm:$0xf]  ;;  %v1095_v6 = vld [vmem:[#allocation3 + $0xc8] sm:$0xf0] }
  0xa3   : > { %v657_v8 = vpop.f32.mrf.mxu1 }
  0xa4   : > { %v482_v9 = vsel %vm481_vm0, %v478_v7, -inf }
  0xa5   : > { %483 = vmax.xlane.f32.xlu0 %v482_v9  ;;  %v1033_v9 = vor.u32 %v1139_v0, %v1030_v2  ;;  %v1147_v0 = vld [vmem:[#allocation3 + $0x84] sm:$0xf]  ;;  %v1063_v2 = vld [vmem:[#allocation3 + $0x88] sm:$0xf0] }
  0xa7   : > { %629 = vmatpush.bf16.msrb.mxu3 %v1033_v9 }
  0xa9   : > { %v479_v11 = vpop.f32.mrf.mxu2 }
  0xaa   : > { %v1020_v11 = vld [vmem:[#allocation3 + $0x30] sm:$0xf] }
  0xad   : > { %660 = vmax.xlane.f32.xlu0 %v659_v12  ;;  %v1138_v12 = vld [vmem:[#allocation3 + $0x34] sm:$0xf0] }
 0x118   : > { %v484_v13 = vpop.xlane.xlu0 %483 }
 0x119   : > { %v485_v14 = vsub.f32 %v478_v7, %v484_v13  ;;  %v1029_v7 = vor.u32 %v1140_v63, %v1028_v62  ;;  %v1137_v13 = vld [vmem:[#allocation3 + $0x34] sm:$0xf]  ;;  %v1061_v62 = vld [vmem:[#allocation3 + $0x80] sm:$0xf]  ;;  %v1148_v63 = vld [vmem:[#allocation3 + $0x84] sm:$0xf0] }
 0x11a   : > { %v1062_v1 = vor.u32 %v1148_v63, %v1061_v62 }
 0x11b   : > { %v486_v15 = vmul.f32 1.442695, %v485_v14  ;;  %v1098_v14 = vor.u32 %v1155_v5, %v1095_v6  ;;  %616 = vmatpush.bf16.msrb.mxu2 %v1029_v7 }
 0x11d   : > { %1204 = vpow2.f32 %v486_v15  ;;  %v1022_v15 = vld [vmem:[#allocation3 + $0x38] sm:$0xf0]  ;;  %805 = vmatpush.bf16.msrb.mxu0 %v1098_v14 }
 0x11e   : > { %v1025_v23 = vor.u32 %v1137_v13, %v1022_v15 }
 0x120   : > { %v661_v16 = vpop.xlane.xlu0 %660  ;;  %630 = vmatpush.bf16.msrb.mxu3 %v1025_v23 }
 0x121   : > { %v662_v17 = vsub.f32 %v656_v10, %v661_v16  ;;  %v1094_v10 = vor.u32 %v1156_v4, %v1093_v3  ;;  %v1085_v16 = vld [vmem:[#allocation3 + $0xb0] sm:$0xf] }
 0x123   : > { %v1354_v18 = vpop.eup %1204  ;;  %v663_v19 = vmul.f32 1.442695, %v662_v17  ;;  %v1154_v17 = vld [vmem:[#allocation3 + $0xb4] sm:$0xf0]  ;;  %792 = vmatpush.bf16.msrb.mxu1 %v1094_v10 }
 0x124   : > { %v488_v20 = vsel %vm481_vm0, %v1354_v18, 0.0  ;;  %v1086_v24 = vor.u32 %v1154_v17, %v1085_v16  ;;  %631 = vmatpush.bf16.msrb.mxu3 %v1017_v41 }
 0x125   : > { %1206 = vpow2.f32 %v663_v19  ;;  %489 = vadd.xlane.f32.xlu1 %v488_v20  ;;  %v1153_v19 = vld [vmem:[#allocation3 + $0xb4] sm:$0xf]  ;;  %v1087_v20 = vld [vmem:[#allocation3 + $0xb8] sm:$0xf0] }
 0x126   : > { %v1090_v27 = vor.u32 %v1153_v19, %v1087_v20  ;;  %v832_v19 = vld [vmem:[%s448_s14] sm:$0xff]  ;;  %v833_v20 = vld [vmem:[%s448_s14 + $0x8] sm:$0xff] }
 0x127   : > { %793 = vmatpush.bf16.msrb.mxu1 %v1086_v24 }
 0x128   : > { %806 = vmatpush.bf16.msrb.mxu0 %v1090_v27  ;;  %632 = vmatpush.bf16.msrb.mxu3 %v1009_v51 }
 0x12b   : > { %v1358_v21 = vpop.eup %1206  ;;  %794 = vmatpush.bf16.msrb.mxu1 %v1078_v38 }
 0x12c   : > { %v665_v22 = vsel %vm481_vm0, %v1358_v21, 0.0  ;;  %807 = vmatpush.bf16.msrb.mxu0 %v1082_v42  ;;  %633 = vmatpush.bf16.msrb.mxu3 %v1001_v61 }
 0x12d   : > { %666 = vadd.xlane.f32.xlu1 %v665_v22  ;;  %v1021_v22 = vor.u32 %v1138_v12, %v1020_v11  ;;  %v824_v11 = vld [vmem:[%s1394_s5] sm:$0x3] }
 0x12e   : > { %v826_v12 = vperm.slane %v824_v11, 0  ;;  %v827_v13 = vperm.slane %v824_v11, 1 }
 0x12f   : > { %617 = vmatpush.bf16.msrb.mxu2 %v1021_v22 }
 0x130   : > { %808 = vmatpush.bf16.msrb.mxu0 %v1074_v52 }
 0x133   : > { %618 = vmatpush.bf16.msrb.mxu2 %v1013_v35 }
 0x137   : > { %619 = vmatpush.bf16.msrb.mxu2 %v1005_v50 }
 0x13b   : > { %620 = vmatpush.bf16.msrb.mxu2 %v997_v59 }
 0x198   : > { %v490_v8 = vpop.xlane.xlu1 %489 }
 0x199   : > { %1208 = vrcp.f32 %v490_v8 }
 0x19f   : > { %v1209_v34 = vpop.eup %1208 }
 0x1a0   : > { %v667_v36 = vpop.xlane.xlu1 %666  ;;  %v492_v37 = vmul.f32 %v1209_v34, %v1354_v18  ;;  %v1070_v18 = vor.u32 %v1150_v45, %v1069_v44 }
 0x1a1   : > { %1210 = vrcp.f32 %v667_v36 }
 0x1a2   : > { %v493_v46 = vpack.c.bf16 %v492_v37, %v492_v37  ;;  %795 = vmatpush.bf16.msrb.mxu1 %v1070_v18 }
 0x1a4   : > { %993 = vmatmul.msk.bf16.vlgmr.msra.gmra.mxu3 %vm481_vm0, %v493_v46 }
 0x1a6   : > { %796 = vmatpush.bf16.msrb.mxu1 %v1062_v1 }
 0x1a7   : > { %v1211_v53 = vpop.eup %1210 }
 0x1a8   : > { %v669_v54 = vmul.f32 %v1211_v53, %v1358_v21  ;;  %v1066_v21 = vor.u32 %v1147_v0, %v1063_v2 }
 0x1aa   : > { %v670_v55 = vpack.c.bf16 %v669_v54, %v669_v54  ;;  %809 = vmatpush.bf16.msrb.mxu0 %v1066_v21 }
 0x1ac   : > { %1058 = vmatmul.msk.bf16.vlgmr.msra.gmra.mxu0 %vm481_vm0, %v670_v55 }
 0x227   : > { %v510_v3 = vpop.f32.mrf.mxu3 }
 0x228   : > { %v516_v4 = vpack.c.bf16 %v510_v3, %v510_v3 }
 0x229   : > { %v686_v5 = vpop.f32.mrf.mxu0 }
 0x22a   : > { %v692_v6 = vpack.c.bf16 %v686_v5, %v686_v5  ;;  %621 = vmatmul.bf16.vlgmr.msrb.gmra.mxu2 %v516_v4  ;;  %634 = vmatmul.bf16.vlgmr.msrb.gmra.mxu3 %v516_v4 }
 0x22c   : > { %797 = vmatmul.bf16.vlgmr.msrb.gmra.mxu1 %v692_v6  ;;  %810 = vmatmul.bf16.vlgmr.msrb.gmra.mxu0 %v692_v6 }
 0x22f   : > { %v512_v7 = vpop.f32.mrf.mxu3 }
 0x231   : > { %v688_v8 = vpop.f32.mrf.mxu0 }
 0x2a9   : > { %v798_v9 = vpop.f32.mrf.mxu1  ;;  %v811_v10 = vpop.f32.mrf.mxu0 }
 0x2ad   : > { %v622_v14 = vpop.f32.mrf.mxu2  ;;  %v635_v15 = vpop.f32.mrf.mxu3 }
 0x2ae   : > { %v815_v16 = vadd.f32 %v798_v9, %v622_v14  ;;  %v816_v17 = vadd.f32 %v811_v10, %v635_v15 }
 0x2b0   : > { %v830_v22 = vadd.f32 %v826_v12, %v815_v16  ;;  %v831_v23 = vadd.f32 %v827_v13, %v816_v17 }
 0x2b1   : > { %v800_v24 = vpop.f32.mrf.mxu1  ;;  %v813_v25 = vpop.f32.mrf.mxu0 }
 0x2b2   : > { %v834_v26 = vadd.f32 %v832_v19, %v830_v22  ;;  %v835_v27 = vadd.f32 %v833_v20, %v831_v23 }
 0x2b4   : > { %836 = vst [vmem:[%s453_s16] sm:$0xff] %v834_v26 }
 0x2b5   : > { %837 = vst [vmem:[%s453_s16 + $0x8] sm:$0xff] %v835_v27  ;;  %v624_v28 = vpop.f32.mrf.mxu2  ;;  %v637_v29 = vpop.f32.mrf.mxu3 }
 0x2b6 PF: > { %s18_s26 = sadd.s32 1, %s1268_s26   ;;  %s1397_s24 = smov %s1264_s25 }
 0x2b7   : > { %p15_p8 = scmp.ge.s32.totalorder %s18_s26, 4   ;;  %s1398_s25 = smov %s1400_s28 }
 0x2b9   :  { %17 = sbr.rel (!%p15_p8) target bundleno = 2 (0x2), region = 104 }
 0x2be   :  { %859 = vsyncpa [#allocation4], 1 }
 0x2bf   :  { %861 = vsyncpa [#allocation4 + $0x1], 1 }

// kernel: encoder_forward.8
= control target key start
LH: loop header
LB: loop body
LE: loop exit
PB: predicated region body
PF: predicated region fallthrough
CT: control target
= control target key end

     0   :  { %12 = vsyncpa [#allocation5], 0  ;;  %s2116_s0 = inlined_call_operand.vmem [shape: f32[16,256], index: 0, kind: input, shape index: {}, may-alias: {0,7}]   ;;  %s2117_s1 = inlined_call_operand.vmem [shape: f32[1,256], index: 1, kind: input, shape index: {}]   ;;  %s2118_s2 = inlined_call_operand.vmem [shape: f32[1,256], index: 2, kind: input, shape index: {}]   ;;  %s2119_s3 = inlined_call_operand.hbm [shape: bf16[256,512], index: 3, kind: input, shape index: {}]   ;;  %s2120_s4 = inlined_call_operand.vmem [shape: f32[1,512], index: 4, kind: input, shape index: {}]   ;;  %s2121_s5 = inlined_call_operand.hbm [shape: bf16[512,256], index: 5, kind: input, shape index: {}]   ;;  %s2122_s6 = inlined_call_operand.vmem [shape: f32[1,256], index: 6, kind: input, shape index: {}]   ;;  %s2123_s7 = inlined_call_operand.vmem [shape: f32[16,256], index: 7, kind: output, shape index: {}, may-alias: {0,7}]  }
   0x1   :  { %s24_s26 = sshll.u32 %s2119_s3, 4  ;;  %s25_s26 = int_to_ptr.hbm [resolvable:$true] %s24_s26 }
   0x2   :  { %13 = vsyncpa [#allocation7], 0  ;;  %s1939_s27 = smov [#allocation4]   ;;  %s39_s8 = sshll.u32 %s2121_s5, 4  ;;  %s40_s8 = int_to_ptr.hbm [resolvable:$true] %s39_s8 }
   0x3   :  { %s26_s28 = sshll.u32 %s1939_s27, 4  ;;  %s1940_s9 = smov 256   ;;  %s27_s28 = int_to_ptr.vmem [resolvable:$true] %s26_s28 }
   0x4   :  { %s1941_s10 = smov 16   ;;  %s1942_s11 = smov [#allocation6]  }
   0x5   :  { %32 = dma.hbm_to_vmem [thread:$0]  %s25_s26, 8192, %s27_s28, [#allocation5], %s1940_s9, %s1940_s9, %s1941_s10  }
   0x6   :  { %s41_s12 = sshll.u32 %s1942_s11, 4  ;;  %s1943_s13 = smov 128   ;;  %s42_s12 = int_to_ptr.vmem [resolvable:$true] %s41_s12 }
   0x7   :  { %s1944_s14 = smov 8  }
   0x8   :  { %47 = dma.hbm_to_vmem [thread:$0]  %s40_s8, 8192, %s42_s12, [#allocation7], %s1943_s13, %s1943_s13, %s1944_s14  }
   0x9   :  { %1935 = dma.done.wait [#allocation5], 8192  }
   0xa   :  { %1936 = vsyncadd [#allocation5], 4294959104 }
   0xb   :  { %1937 = dma.done.wait [#allocation7], 8192  }
   0xc   :  { %1938 = vsyncadd [#allocation7], 4294959104  ;;  %v62_v0 = vld [vmem:[%s2116_s0] sm:$0xff]  ;;  %v63_v1 = vld [vmem:[%s2116_s0 + $0x8] sm:$0xff]  ;;  %v1945_v6 = vmov 256.0  }
   0xd   :  { %v66_v2 = vadd.f32 %v63_v1, %v62_v0  ;;  %v64_v3 = vld [vmem:[%s2116_s0 + $0x10] sm:$0xff]  ;;  %v65_v4 = vld [vmem:[%s2116_s0 + $0x18] sm:$0xff]  ;;  %1881 = vrcp.f32 %v1945_v6  ;;  %v1776_v28 = vld [vmem:[#allocation4 + $0xec] sm:$0xf0] }
   0xe   :  { %v69_v5 = vadd.f32 %v65_v4, %v64_v3  ;;  %v1346_v27 = vld [vmem:[#allocation4 + $0xe0] sm:$0xf]  ;;  %v1808_v31 = vld [vmem:[#allocation4 + $0x1ec] sm:$0xf0]  ;;  %v1774_v32 = vld [vmem:[#allocation4 + $0xe4] sm:$0xf] }
   0xf   :  { %67 = vadd.xlane.f32.xlu0 %v66_v2  ;;  %v1474_v29 = vld [vmem:[#allocation4 + $0x1e0] sm:$0xf]  ;;  %v1347_v30 = vor.u32 %v1776_v28, %v1346_v27  ;;  %v1348_v33 = vld [vmem:[#allocation4 + $0xf0] sm:$0xf0]  ;;  %v1806_v36 = vld [vmem:[#allocation4 + $0x1e4] sm:$0xf] }
  0x10   :  { %v1475_v34 = vor.u32 %v1808_v31, %v1474_v29  ;;  %v1351_v35 = vor.u32 %v1774_v32, %v1348_v33  ;;  %v1476_v37 = vld [vmem:[#allocation4 + $0x1f0] sm:$0xf0]  ;;  %v1330_v39 = vld [vmem:[#allocation4 + $0xc0] sm:$0xf]  ;;  %v1772_v40 = vld [vmem:[#allocation4 + $0xcc] sm:$0xf0] }
  0x11   :  { %557 = vmatpush.bf16.msra.mxu0 %v1347_v30  ;;  %v1479_v38 = vor.u32 %v1806_v36, %v1476_v37  ;;  %v1458_v41 = vld [vmem:[#allocation4 + $0x1c0] sm:$0xf]  ;;  %v1331_v42 = vor.u32 %v1772_v40, %v1330_v39  ;;  %v1804_v43 = vld [vmem:[#allocation4 + $0x1cc] sm:$0xf0]  ;;  %v1770_v44 = vld [vmem:[#allocation4 + $0xc4] sm:$0xf] }
  0x12   :  { %571 = vmatpush.bf16.msra.mxu1 %v1475_v34  ;;  %585 = vmatpush.bf16.msra.mxu2 %v1351_v35  ;;  %v1332_v45 = vld [vmem:[#allocation4 + $0xd0] sm:$0xf0]  ;;  %v1459_v46 = vor.u32 %v1804_v43, %v1458_v41  ;;  %v1802_v48 = vld [vmem:[#allocation4 + $0x1c4] sm:$0xf]  ;;  %v1314_v51 = vld [vmem:[#allocation4 + $0xa0] sm:$0xf] }
  0x13   :  { %v1882_v7 = vpop.eup %1881  ;;  %599 = vmatpush.bf16.msra.mxu3 %v1479_v38  ;;  %v1335_v47 = vor.u32 %v1770_v44, %v1332_v45  ;;  %v1460_v49 = vld [vmem:[#allocation4 + $0x1d0] sm:$0xf0]  ;;  %v1768_v52 = vld [vmem:[#allocation4 + $0xac] sm:$0xf0]  ;;  %v1442_v53 = vld [vmem:[#allocation4 + $0x1a0] sm:$0xf] }
  0x14   :  { %v73_v8 = vmul.f32 256.0, %v1882_v7  ;;  %vm77_vm0 = vweird.f32 %v1882_v7  ;;  %v1463_v50 = vor.u32 %v1802_v48, %v1460_v49  ;;  %v1315_v54 = vor.u32 %v1768_v52, %v1314_v51  ;;  %v1800_v55 = vld [vmem:[#allocation4 + $0x1ac] sm:$0xf0]  ;;  %v1766_v56 = vld [vmem:[#allocation4 + $0xa4] sm:$0xf] }
  0x15   :  { %558 = vmatpush.bf16.msra.mxu0 %v1331_v42  ;;  %v1316_v57 = vld [vmem:[#allocation4 + $0xb0] sm:$0xf0]  ;;  %v1443_v58 = vor.u32 %v1800_v55, %v1442_v53  ;;  %v1798_v60 = vld [vmem:[#allocation4 + $0x1a4] sm:$0xf]  ;;  %v1298_v63 = vld [vmem:[#allocation4 + $0x80] sm:$0xf] }
  0x16   :  { %v74_v9 = vsub.f32 1.0, %v73_v8  ;;  %572 = vmatpush.bf16.msra.mxu1 %v1459_v46  ;;  %586 = vmatpush.bf16.msra.mxu2 %v1335_v47  ;;  %v1319_v59 = vor.u32 %v1766_v56, %v1316_v57  ;;  %v1444_v61 = vld [vmem:[#allocation4 + $0x1b0] sm:$0xf0]  ;;  %v1794_v8 = vld [vmem:[#allocation4 + $0x184] sm:$0xf] }
  0x17   :  { %70 = vadd.xlane.f32.xlu0 %v69_v5  ;;  %600 = vmatpush.bf16.msra.mxu3 %v1463_v50  ;;  %v1447_v62 = vor.u32 %v1798_v60, %v1444_v61  ;;  %v1300_v5 = vld [vmem:[#allocation4 + $0x90] sm:$0xf0]  ;;  %v1266_v28 = vld [vmem:[#allocation4 + $0x40] sm:$0xf]  ;;  %v1756_v29 = vld [vmem:[#allocation4 + $0x4c] sm:$0xf0] }
  0x18   :  { %v75_v10 = vmul.f32 %v1882_v7, %v74_v9  ;;  %v1428_v9 = vld [vmem:[#allocation4 + $0x190] sm:$0xf0]  ;;  %v1394_v30 = vld [vmem:[#allocation4 + $0x140] sm:$0xf]  ;;  %v1267_v31 = vor.u32 %v1756_v29, %v1266_v28  ;;  %v1788_v32 = vld [vmem:[#allocation4 + $0x14c] sm:$0xf0] }
  0x19   :  { %559 = vmatpush.bf16.msra.mxu0 %v1315_v54  ;;  %v1754_v33 = vld [vmem:[#allocation4 + $0x44] sm:$0xf]  ;;  %v1268_v34 = vld [vmem:[#allocation4 + $0x50] sm:$0xf0]  ;;  %v1395_v35 = vor.u32 %v1788_v32, %v1394_v30  ;;  %v1250_v40 = vld [vmem:[#allocation4 + $0x20] sm:$0xf] }
  0x1a   :  { %v76_v11 = vadd.f32 %v1882_v7, %v75_v10  ;;  %573 = vmatpush.bf16.msra.mxu1 %v1443_v58  ;;  %587 = vmatpush.bf16.msra.mxu2 %v1319_v59  ;;  %v1431_v10 = vor.u32 %v1794_v8, %v1428_v9  ;;  %v1271_v36 = vor.u32 %v1754_v33, %v1268_v34  ;;  %v1786_v37 = vld [vmem:[#allocation4 + $0x144] sm:$0xf]  ;;  %v1396_v38 = vld [vmem:[#allocation4 + $0x150] sm:$0xf0]  ;;  %v1752_v41 = vld [vmem:[#allocation4 + $0x2c] sm:$0xf0] }
  0x1b   :  { %601 = vmatpush.bf16.msra.mxu3 %v1447_v62  ;;  %v1399_v39 = vor.u32 %v1786_v37, %v1396_v38  ;;  %v1378_v42 = vld [vmem:[#allocation4 + $0x120] sm:$0xf]  ;;  %v1251_v43 = vor.u32 %v1752_v41, %v1250_v40  ;;  %v1784_v44 = vld [vmem:[#allocation4 + $0x12c] sm:$0xf0]  ;;  %v1750_v45 = vld [vmem:[#allocation4 + $0x24] sm:$0xf] }
  0x1c   :  { %v2004_v12 = vsel %vm77_vm0, %v1882_v7, %v76_v11  ;;  %v1282_v11 = vld [vmem:[#allocation4 + $0x60] sm:$0xf]  ;;  %v1252_v46 = vld [vmem:[#allocation4 + $0x30] sm:$0xf0]  ;;  %v1379_v47 = vor.u32 %v1784_v44, %v1378_v42  ;;  %v1782_v49 = vld [vmem:[#allocation4 + $0x124] sm:$0xf] }
  0x1d   :  { %v1255_v48 = vor.u32 %v1750_v45, %v1252_v46  ;;  %v1380_v50 = vld [vmem:[#allocation4 + $0x130] sm:$0xf0]  ;;  %v1234_v52 = vld [vmem:[#allocation4] sm:$0xf]  ;;  %v1748_v53 = vld [vmem:[#allocation4 + $0xc] sm:$0xf0] }
  0x1e   :  { %v1383_v51 = vor.u32 %v1782_v49, %v1380_v50  ;;  %v1362_v54 = vld [vmem:[#allocation4 + $0x100] sm:$0xf]  ;;  %v1235_v55 = vor.u32 %v1748_v53, %v1234_v52  ;;  %v1780_v56 = vld [vmem:[#allocation4 + $0x10c] sm:$0xf0]  ;;  %v1746_v57 = vld [vmem:[#allocation4 + $0x4] sm:$0xf] }
  0x1f   :  { %602 = vmatpush.bf16.msra.mxu3 %v1431_v10  ;;  %v1236_v58 = vld [vmem:[#allocation4 + $0x10] sm:$0xf0]  ;;  %v1363_v60 = vor.u32 %v1780_v56, %v1362_v54  ;;  %v1778_v62 = vld [vmem:[#allocation4 + $0x104] sm:$0xf]  ;;  %v1775_v8 = vld [vmem:[#allocation4 + $0xec] sm:$0xf] }
  0x20   :  { %v1239_v61 = vor.u32 %v1746_v57, %v1236_v58  ;;  %v1356_v9 = vld [vmem:[#allocation4 + $0xf8] sm:$0xf0]  ;;  %v1807_v10 = vld [vmem:[#allocation4 + $0x1ec] sm:$0xf]  ;;  %v1322_v32 = vld [vmem:[#allocation4 + $0xa8] sm:$0xf] }
  0x21   :  { %v1803_v28 = vld [vmem:[#allocation4 + $0x1cc] sm:$0xf]  ;;  %v1468_v30 = vld [vmem:[#allocation4 + $0x1d8] sm:$0xf0]  ;;  %v1769_v33 = vld [vmem:[#allocation4 + $0xb4] sm:$0xf0] }
  0x22   :  { %v1450_v34 = vld [vmem:[#allocation4 + $0x1a8] sm:$0xf]  ;;  %v1801_v37 = vld [vmem:[#allocation4 + $0x1b4] sm:$0xf0]  ;;  %v1767_v38 = vld [vmem:[#allocation4 + $0xac] sm:$0xf] }
  0x23   :  { %v1451_v41 = vor.u32 %v1801_v37, %v1450_v34  ;;  %v1452_v44 = vld [vmem:[#allocation4 + $0x1b8] sm:$0xf0]  ;;  %v1306_v45 = vld [vmem:[#allocation4 + $0x88] sm:$0xf]  ;;  %v1797_v49 = vld [vmem:[#allocation4 + $0x194] sm:$0xf0] }
  0x24   :  { %v1763_v52 = vld [vmem:[#allocation4 + $0x8c] sm:$0xf]  ;;  %v1308_v53 = vld [vmem:[#allocation4 + $0x98] sm:$0xf0]  ;;  %v2035_v58 = vld [vmem:[%s2117_s1] sm:$0x3] }
  0x25   :  { %v1795_v56 = vld [vmem:[#allocation4 + $0x18c] sm:$0xf]  ;;  %v1436_v57 = vld [vmem:[#allocation4 + $0x198] sm:$0xf0] }
  0x26   :  { %v1404_v37 = vld [vmem:[#allocation4 + $0x158] sm:$0xf0] }
  0x82   :  { %v68_v13 = vpop.xlane.xlu0 %67 }
  0x83   :  { %v79_v14 = vmul.f32 %v2004_v12, %v68_v13  ;;  %v1760_v13 = vld [vmem:[#allocation4 + $0x6c] sm:$0xf0] }
  0x85   :  { %v2007_v15 = vsub.f32 %v62_v0, %v79_v14  ;;  %v2009_v16 = vsub.f32 %v63_v1, %v79_v14  ;;  %v1764_v0 = vld [vmem:[#allocation4 + $0x8c] sm:$0xf0]  ;;  %v1426_v1 = vld [vmem:[#allocation4 + $0x180] sm:$0xf] }
  0x86   :  { %v1299_v2 = vor.u32 %v1764_v0, %v1298_v63  ;;  %v1410_v14 = vld [vmem:[#allocation4 + $0x160] sm:$0xf]  ;;  %v1364_v63 = vld [vmem:[#allocation4 + $0x110] sm:$0xf0]  ;;  %v1354_v0 = vld [vmem:[#allocation4 + $0xe8] sm:$0xf] }
  0x87   :  { %v85_v17 = vmul.f32 %v2007_v15, %v2007_v15  ;;  %v86_v18 = vmul.f32 %v2009_v16, %v2009_v16 }
  0x88   :  { %560 = vmatpush.bf16.msra.mxu0 %v1299_v2  ;;  %v1367_v2 = vor.u32 %v1778_v62, %v1364_v63  ;;  %v125_v62 = vperm.slane %v2035_v58, 0  ;;  %v2042_v63 = vld [vmem:[%s2118_s2] sm:$0x3] }
  0x89   :  { %v89_v19 = vadd.f32 %v86_v18, %v85_v17  ;;  %v1283_v17 = vor.u32 %v1760_v13, %v1282_v11  ;;  %v1792_v18 = vld [vmem:[#allocation4 + $0x16c] sm:$0xf0]  ;;  %v1359_v13 = vor.u32 %v1775_v8, %v1356_v9 }
  0x8a   :  { %v71_v20 = vpop.xlane.xlu0 %70 }
  0x8b   :  { %v80_v21 = vmul.f32 %v2004_v12, %v71_v20  ;;  %90 = vadd.xlane.f32.xlu1 %v89_v19  ;;  %v1758_v19 = vld [vmem:[#allocation4 + $0x64] sm:$0xf]  ;;  %v1284_v20 = vld [vmem:[#allocation4 + $0x70] sm:$0xf0] }
  0x8c   :  { %561 = vmatpush.bf16.msra.mxu0 %v1283_v17  ;;  %v1338_v17 = vld [vmem:[#allocation4 + $0xc8] sm:$0xf] }
  0x8d   :  { %v2016_v22 = vsub.f32 %v64_v3, %v80_v21  ;;  %v2018_v23 = vsub.f32 %v65_v4, %v80_v21  ;;  %v1796_v3 = vld [vmem:[#allocation4 + $0x18c] sm:$0xf0]  ;;  %v1762_v4 = vld [vmem:[#allocation4 + $0x84] sm:$0xf]  ;;  %v1411_v21 = vor.u32 %v1792_v18, %v1410_v14  ;;  %v1484_v14 = vld [vmem:[#allocation4 + $0x1f8] sm:$0xf0] }
  0x8e   :  { %v1427_v6 = vor.u32 %v1796_v3, %v1426_v1  ;;  %v1303_v7 = vor.u32 %v1762_v4, %v1300_v5  ;;  %v1777_v3 = vld [vmem:[#allocation4 + $0xf4] sm:$0xf0]  ;;  %v1482_v4 = vld [vmem:[#allocation4 + $0x1e8] sm:$0xf]  ;;  %v1487_v18 = vor.u32 %v1807_v10, %v1484_v14  ;;  %v1292_v10 = vld [vmem:[#allocation4 + $0x78] sm:$0xf0] }
  0x8f   :  { %v87_v24 = vmul.f32 %v2016_v22, %v2016_v22  ;;  %v88_v25 = vmul.f32 %v2018_v23, %v2018_v23  ;;  %v1809_v5 = vld [vmem:[#allocation4 + $0x1f4] sm:$0xf0] }
  0x90   :  { %574 = vmatpush.bf16.msra.mxu1 %v1427_v6  ;;  %588 = vmatpush.bf16.msra.mxu2 %v1303_v7  ;;  %v1355_v6 = vor.u32 %v1777_v3, %v1354_v0  ;;  %v1483_v7 = vor.u32 %v1809_v5, %v1482_v4  ;;  %v1418_v4 = vld [vmem:[#allocation4 + $0x168] sm:$0xf]  ;;  %v1793_v5 = vld [vmem:[#allocation4 + $0x174] sm:$0xf0] }
  0x91   :  { %v92_v26 = vadd.f32 %v88_v25, %v87_v24  ;;  %v1287_v24 = vor.u32 %v1758_v19, %v1284_v20  ;;  %v1790_v25 = vld [vmem:[#allocation4 + $0x164] sm:$0xf]  ;;  %562 = vmatpush.bf16.msra.mxu0 %v1267_v31  ;;  %v1773_v19 = vld [vmem:[#allocation4 + $0xd4] sm:$0xf0]  ;;  %v1466_v20 = vld [vmem:[#allocation4 + $0x1c8] sm:$0xf]  ;;  %v1471_v31 = vor.u32 %v1803_v28, %v1468_v30  ;;  %v1419_v9 = vor.u32 %v1793_v5, %v1418_v4 }
  0x92   :  { %v1755_v28 = vld [vmem:[#allocation4 + $0x4c] sm:$0xf]  ;;  %v136_v30 = vperm.slane %v2042_v63, 1 }
  0x93   :  { %93 = vadd.xlane.f32.xlu1 %v92_v26  ;;  %v1412_v26 = vld [vmem:[#allocation4 + $0x170] sm:$0xf0] }
  0x94   :  { %v1415_v27 = vor.u32 %v1790_v25, %v1412_v26  ;;  %575 = vmatpush.bf16.msra.mxu1 %v1411_v21  ;;  %589 = vmatpush.bf16.msra.mxu2 %v1287_v24  ;;  %v1805_v21 = vld [vmem:[#allocation4 + $0x1d4] sm:$0xf0]  ;;  %v1339_v24 = vor.u32 %v1773_v19, %v1338_v17  ;;  %v1771_v26 = vld [vmem:[#allocation4 + $0xcc] sm:$0xf]  ;;  %v1274_v19 = vld [vmem:[#allocation4 + $0x48] sm:$0xf] }
  0x95   :  { %563 = vmatpush.bf16.msra.mxu0 %v1251_v43  ;;  %v1467_v25 = vor.u32 %v1805_v21, %v1466_v20  ;;  %v1799_v43 = vld [vmem:[#allocation4 + $0x1ac] sm:$0xf]  ;;  %v1757_v20 = vld [vmem:[#allocation4 + $0x54] sm:$0xf0] }
  0x96   :  { %603 = vmatpush.bf16.msra.mxu3 %v1415_v27  ;;  %v1340_v27 = vld [vmem:[#allocation4 + $0xd8] sm:$0xf0]  ;;  %v1455_v46 = vor.u32 %v1799_v43, %v1452_v44  ;;  %v1386_v43 = vld [vmem:[#allocation4 + $0x128] sm:$0xf]  ;;  %v1785_v44 = vld [vmem:[#allocation4 + $0x134] sm:$0xf0] }
  0x97   :  { %v1343_v29 = vor.u32 %v1771_v26, %v1340_v27  ;;  %v1402_v26 = vld [vmem:[#allocation4 + $0x148] sm:$0xf]  ;;  %v1789_v27 = vld [vmem:[#allocation4 + $0x154] sm:$0xf0] }
  0x98   :  { %576 = vmatpush.bf16.msra.mxu1 %v1395_v35  ;;  %590 = vmatpush.bf16.msra.mxu2 %v1271_v36  ;;  %v1323_v36 = vor.u32 %v1769_v33, %v1322_v32  ;;  %v1403_v32 = vor.u32 %v1789_v27, %v1402_v26  ;;  %v1276_v33 = vld [vmem:[#allocation4 + $0x58] sm:$0xf0]  ;;  %v1841_v26 = vld [vmem:[#allocation6 + $0xf4] sm:$0xf0]  ;;  %v1674_v27 = vld [vmem:[#allocation6 + $0x170] sm:$0xf] }
  0x99   :  { %564 = vmatpush.bf16.msra.mxu0 %v1235_v55 }
  0x9a   :  { %604 = vmatpush.bf16.msra.mxu3 %v1399_v39  ;;  %v1324_v39 = vld [vmem:[#allocation4 + $0xb8] sm:$0xf0] }
  0x9b   :  { %v1327_v42 = vor.u32 %v1767_v38, %v1324_v39  ;;  %v1258_v38 = vld [vmem:[#allocation4 + $0x28] sm:$0xf]  ;;  %v1753_v39 = vld [vmem:[#allocation4 + $0x34] sm:$0xf0] }
  0x9c   :  { %577 = vmatpush.bf16.msra.mxu1 %v1379_v47  ;;  %591 = vmatpush.bf16.msra.mxu2 %v1255_v48  ;;  %v1765_v47 = vld [vmem:[#allocation4 + $0x94] sm:$0xf0]  ;;  %v1434_v48 = vld [vmem:[#allocation4 + $0x188] sm:$0xf] }
  0x9d   :  { %613 = vmatpush.bf16.msrb.mxu0 %v1355_v6  ;;  %v1435_v55 = vor.u32 %v1797_v49, %v1434_v48  ;;  %v1759_v6 = vld [vmem:[#allocation4 + $0x6c] sm:$0xf]  ;;  %v1387_v48 = vor.u32 %v1785_v44, %v1386_v43  ;;  %v1260_v49 = vld [vmem:[#allocation4 + $0x38] sm:$0xf0]  ;;  %v1530_v44 = vld [vmem:[#allocation6 + $0x50] sm:$0xf] }
  0x9e   :  { %605 = vmatpush.bf16.msra.mxu3 %v1383_v51  ;;  %v1295_v17 = vor.u32 %v1759_v6, %v1292_v10  ;;  %v1372_v6 = vld [vmem:[#allocation4 + $0x118] sm:$0xf0] }
  0xa0   :  { %578 = vmatpush.bf16.msra.mxu1 %v1363_v60  ;;  %592 = vmatpush.bf16.msra.mxu2 %v1239_v61  ;;  %v1439_v61 = vor.u32 %v1795_v56, %v1436_v57  ;;  %v1370_v57 = vld [vmem:[#allocation4 + $0x108] sm:$0xf] }
  0xa1   :  { %614 = vmatpush.bf16.msrb.mxu0 %v1339_v24 }
  0xa2   :  { %606 = vmatpush.bf16.msra.mxu3 %v1367_v2  ;;  %v1761_v2 = vld [vmem:[#allocation4 + $0x74] sm:$0xf0] }
  0xa4   :  { %627 = vmatpush.bf16.msrb.mxu1 %v1483_v7  ;;  %641 = vmatpush.bf16.msrb.mxu2 %v1359_v13  ;;  %v126_v7 = vperm.slane %v2035_v58, 1  ;;  %v1791_v13 = vld [vmem:[#allocation4 + $0x16c] sm:$0xf]  ;;  %v1873_v58 = vld [vmem:[#allocation6 + $0x1f4] sm:$0xf0] }
  0xa5   :  { %615 = vmatpush.bf16.msrb.mxu0 %v1323_v36  ;;  %v1279_v36 = vor.u32 %v1755_v28, %v1276_v33  ;;  %v1738_v28 = vld [vmem:[#allocation6 + $0x1f0] sm:$0xf] }
  0xa6   :  { %655 = vmatpush.bf16.msrb.mxu3 %v1487_v18  ;;  %v1420_v18 = vld [vmem:[#allocation4 + $0x178] sm:$0xf0] }
  0xa8   :  { %628 = vmatpush.bf16.msrb.mxu1 %v1467_v25  ;;  %642 = vmatpush.bf16.msrb.mxu2 %v1343_v29  ;;  %v1423_v25 = vor.u32 %v1791_v13, %v1420_v18  ;;  %v135_v29 = vperm.slane %v2042_v63, 0  ;;  %v1823_v63 = vld [vmem:[#allocation6 + $0x64] sm:$0xf0] }
  0xaa   :  { %656 = vmatpush.bf16.msrb.mxu3 %v1471_v31  ;;  %v1275_v31 = vor.u32 %v1757_v20, %v1274_v19 }
  0xac   :  { %629 = vmatpush.bf16.msrb.mxu1 %v1451_v41  ;;  %643 = vmatpush.bf16.msrb.mxu2 %v1327_v42 }
  0xae   :  { %657 = vmatpush.bf16.msrb.mxu3 %v1455_v46 }
  0xb0   :  { %630 = vmatpush.bf16.msrb.mxu1 %v1435_v55 }
  0xb2   :  { %658 = vmatpush.bf16.msrb.mxu3 %v1439_v61 }
  0xb4   :  { %631 = vmatpush.bf16.msrb.mxu1 %v1419_v9 }
  0xb6   :  { %659 = vmatpush.bf16.msrb.mxu3 %v1423_v25 }
  0xb8   :  { %632 = vmatpush.bf16.msrb.mxu1 %v1403_v32 }
  0xbc   :  { %633 = vmatpush.bf16.msrb.mxu1 %v1387_v48  ;;  %v1837_v48 = vld [vmem:[#allocation6 + $0xd4] sm:$0xf0] }
  0xfe   :  { %v91_v59 = vpop.xlane.xlu1 %90 }
  0xff   :  { %v95_v1 = vmul.f32 %v91_v59, %v2004_v12  ;;  %v1311_v59 = vor.u32 %v1763_v52, %v1308_v53 }
 0x101   :  { %v2025_v11 = vadd.f32 1e-06, %v95_v1  ;;  %v1290_v1 = vld [vmem:[#allocation4 + $0x68] sm:$0xf]  ;;  %644 = vmatpush.bf16.msrb.mxu2 %v1311_v59  ;;  %v1781_v59 = vld [vmem:[#allocation4 + $0x114] sm:$0xf0] }
 0x102   :  { %v1291_v3 = vor.u32 %v1761_v2, %v1290_v1  ;;  %v1244_v1 = vld [vmem:[#allocation4 + $0x18] sm:$0xf0]  ;;  %v1779_v2 = vld [vmem:[#allocation4 + $0x10c] sm:$0xf]  ;;  %v1371_v5 = vor.u32 %v1781_v59, %v1370_v57 }
 0x103   :  { %1883 = vrsqrt.f32 %v2025_v11  ;;  %vm105_vm2 = vweird.f32 %v2025_v11  ;;  %v1375_v13 = vor.u32 %v1779_v2, %v1372_v6  ;;  %v1833_v2 = vld [vmem:[#allocation6 + $0xb4] sm:$0xf0]  ;;  %v1815_v6 = vld [vmem:[#allocation6 + $0x24] sm:$0xf0] }
 0x104   :  { %634 = vmatpush.bf16.msrb.mxu1 %v1371_v5 }
 0x105   :  { %645 = vmatpush.bf16.msrb.mxu2 %v1295_v17 }
 0x106   :  { %v94_v35 = vpop.xlane.xlu1 %93 }
 0x107   :  { %v96_v40 = vmul.f32 %v94_v35, %v2004_v12  ;;  %v1307_v12 = vor.u32 %v1765_v47, %v1306_v45  ;;  %v1751_v45 = vld [vmem:[#allocation4 + $0x2c] sm:$0xf]  ;;  %v1259_v47 = vor.u32 %v1753_v39, %v1258_v38  ;;  %v1666_v38 = vld [vmem:[#allocation6 + $0x160] sm:$0xf]  ;;  %v1739_v39 = vor.u32 %v1873_v58, %v1738_v28  ;;  %v1722_v28 = vld [vmem:[#allocation6 + $0x1d0] sm:$0xf] }
 0x109   :  { %v1884_v50 = vpop.eup %1883  ;;  %v2029_v51 = vadd.f32 1e-06, %v96_v40  ;;  %616 = vmatpush.bf16.msrb.mxu0 %v1307_v12  ;;  %646 = vmatpush.bf16.msrb.mxu2 %v1279_v36  ;;  %v1749_v12 = vld [vmem:[#allocation4 + $0x14] sm:$0xf0]  ;;  %v1839_v36 = vld [vmem:[#allocation6 + $0xe4] sm:$0xf0] }
 0x10a   :  { %v100_v54 = vmul.f32 %v1884_v50, %v2025_v11  ;;  %vm106_vm1 = vweird.f32 %v1884_v50  ;;  %v1787_v11 = vld [vmem:[#allocation4 + $0x14c] sm:$0xf] }
 0x10b   :  { %1885 = vrsqrt.f32 %v2029_v51  ;;  %vm107_vm3 = vmor %vm105_vm2, %vm106_vm1  ;;  %v1407_v42 = vor.u32 %v1787_v11, %v1404_v37  ;;  %vm115_vm5 = vweird.f32 %v2029_v51 }
 0x10c   :  { %v101_v60 = vmul.f32 %v1884_v50, %v100_v54  ;;  %v1242_v54 = vld [vmem:[#allocation4 + $0x8] sm:$0xf] }
 0x10d   :  { %617 = vmatpush.bf16.msrb.mxu0 %v1291_v3  ;;  %660 = vmatpush.bf16.msrb.mxu3 %v1407_v42  ;;  %v1243_v4 = vor.u32 %v1749_v12, %v1242_v54  ;;  %v1871_v42 = vld [vmem:[#allocation6 + $0x1e4] sm:$0xf0] }
 0x10e   :  { %v102_v0 = vmul.f32 0.5, %v101_v60  ;;  %v1819_v12 = vld [vmem:[#allocation6 + $0x44] sm:$0xf0] }
 0x110   :  { %v103_v8 = vsub.f32 1.5, %v102_v0  ;;  %v1747_v0 = vld [vmem:[#allocation4 + $0xc] sm:$0xf] }
 0x111   :  { %v2045_v14 = vpop.eup %1885  ;;  %618 = vmatpush.bf16.msrb.mxu0 %v1275_v31  ;;  %v1247_v9 = vor.u32 %v1747_v0, %v1244_v1  ;;  %v1817_v0 = vld [vmem:[#allocation6 + $0x34] sm:$0xf0]  ;;  %v1578_v1 = vld [vmem:[#allocation6 + $0xb0] sm:$0xf] }
 0x112   :  { %v104_v21 = vmul.f32 %v1884_v50, %v103_v8  ;;  %v110_v24 = vmul.f32 %v2045_v14, %v2029_v51  ;;  %vm116_vm4 = vweird.f32 %v2045_v14  ;;  %v1579_v5 = vor.u32 %v1833_v2, %v1578_v1  ;;  %v1836_v1 = vld [vmem:[#allocation6 + $0xd4] sm:$0xf]  ;;  %v1596_v2 = vld [vmem:[#allocation6 + $0xd8] sm:$0xf0] }
 0x113   :  { %vm117_vm6 = vmor %vm115_vm5, %vm116_vm4 }
 0x114   :  { %v108_v34 = vsel %vm107_vm3, %v1884_v50, %v104_v21  ;;  %v111_v35 = vmul.f32 %v2045_v14, %v110_v24  ;;  %v1783_v50 = vld [vmem:[#allocation4 + $0x12c] sm:$0xf]  ;;  %v1610_v24 = vld [vmem:[#allocation6 + $0xf0] sm:$0xf] }
 0x115   :  { %v119_v40 = vmul.f32 %v108_v34, %v2007_v15  ;;  %v120_v41 = vmul.f32 %v108_v34, %v2009_v16  ;;  %v1263_v15 = vor.u32 %v1751_v45, %v1260_v49  ;;  %v1388_v16 = vld [vmem:[#allocation4 + $0x138] sm:$0xf0]  ;;  %619 = vmatpush.bf16.msrb.mxu0 %v1259_v47  ;;  %v1538_v34 = vld [vmem:[#allocation6 + $0x60] sm:$0xf]  ;;  %v1594_v47 = vld [vmem:[#allocation6 + $0xd0] sm:$0xf] }
 0x116   :  { %v112_v46 = vmul.f32 0.5, %v111_v35  ;;  %v1391_v56 = vor.u32 %v1783_v50, %v1388_v16  ;;  %v1602_v35 = vld [vmem:[#allocation6 + $0xe0] sm:$0xf]  ;;  %v1539_v43 = vor.u32 %v1823_v63, %v1538_v34  ;;  %v1595_v54 = vor.u32 %v1837_v48, %v1594_v47  ;;  %v1540_v34 = vld [vmem:[#allocation6 + $0x68] sm:$0xf0] }
 0x117   :  { %v129_v52 = vmul.f32 %v125_v62, %v119_v40  ;;  %v130_v53 = vmul.f32 %v126_v7, %v120_v41  ;;  %647 = vmatpush.bf16.msrb.mxu2 %v1263_v15  ;;  %v1855_v40 = vld [vmem:[#allocation6 + $0x164] sm:$0xf0]  ;;  %v1730_v41 = vld [vmem:[#allocation6 + $0x1e0] sm:$0xf]  ;;  %v1603_v45 = vor.u32 %v1839_v36, %v1602_v35  ;;  %v1532_v47 = vld [vmem:[#allocation6 + $0x58] sm:$0xf0] }
 0x118   :  { %v113_v55 = vsub.f32 1.5, %v112_v46  ;;  %661 = vmatpush.bf16.msrb.mxu3 %v1391_v56  ;;  %v1821_v46 = vld [vmem:[#allocation6 + $0x54] sm:$0xf0]  ;;  %v1667_v49 = vor.u32 %v1855_v40, %v1666_v38  ;;  %v1731_v50 = vor.u32 %v1871_v42, %v1730_v41  ;;  %v1522_v16 = vld [vmem:[#allocation6 + $0x40] sm:$0xf] }
 0x119   :  { %v139_v60 = vadd.f32 %v135_v29, %v129_v52  ;;  %v140_v61 = vadd.f32 %v136_v30, %v130_v53  ;;  %620 = vmatpush.bf16.msrb.mxu0 %v1243_v4  ;;  %v1658_v52 = vld [vmem:[#allocation6 + $0x150] sm:$0xf]  ;;  %v1853_v53 = vld [vmem:[#allocation6 + $0x154] sm:$0xf0]  ;;  %v1531_v15 = vor.u32 %v1821_v46, %v1530_v44  ;;  %v1835_v56 = vld [vmem:[#allocation6 + $0xc4] sm:$0xf0]  ;;  %v1523_v59 = vor.u32 %v1819_v12, %v1522_v16 }
 0x11a   :  { %v114_v3 = vmul.f32 %v2045_v14, %v113_v55  ;;  %v1586_v55 = vld [vmem:[#allocation6 + $0xc0] sm:$0xf]  ;;  %v1659_v57 = vor.u32 %v1853_v53, %v1658_v52  ;;  %v1827_v35 = vld [vmem:[#allocation6 + $0x84] sm:$0xf0]  ;;  %v1612_v41 = vld [vmem:[#allocation6 + $0xf8] sm:$0xf0] }
 0x11b   :  { %v143_v8 = vpack.c.bf16 %v140_v61, %v139_v60  ;;  %648 = vmatpush.bf16.msrb.mxu2 %v1247_v9  ;;  %v1514_v60 = vld [vmem:[#allocation6 + $0x30] sm:$0xf]  ;;  %v1587_v61 = vor.u32 %v1835_v56, %v1586_v55  ;;  %v1506_v4 = vld [vmem:[#allocation6 + $0x20] sm:$0xf]  ;;  %v1831_v9 = vld [vmem:[#allocation6 + $0xa4] sm:$0xf0] }
 0x11c   :  { %v118_v10 = vsel %vm117_vm6, %v2045_v14, %v114_v3  ;;  %662 = vmatpush.bf16.msrb.mxu3 %v1375_v13  ;;  %v1515_v3 = vor.u32 %v1817_v0, %v1514_v60  ;;  %v1867_v38 = vld [vmem:[#allocation6 + $0x1c4] sm:$0xf0]  ;;  %v1634_v42 = vld [vmem:[#allocation6 + $0x120] sm:$0xf]  ;;  %v1820_v46 = vld [vmem:[#allocation6 + $0x54] sm:$0xf] }
 0x11d   :  { %145 = vst [vmem:[#allocation3] sm:$0xff] %v143_v8  ;;  %v121_v17 = vmul.f32 %v118_v10, %v2016_v22  ;;  %v122_v51 = vmul.f32 %v118_v10, %v2018_v23  ;;  %v1546_v22 = vld [vmem:[#allocation6 + $0x70] sm:$0xf]  ;;  %v1825_v23 = vld [vmem:[#allocation6 + $0x74] sm:$0xf0]  ;;  %v1507_v10 = vor.u32 %v1815_v6, %v1506_v4  ;;  %v1535_v48 = vor.u32 %v1820_v46, %v1532_v47 }
 0x11e   :  { %v1570_v8 = vld [vmem:[#allocation6 + $0xa0] sm:$0xf]  ;;  %v1838_v53 = vld [vmem:[#allocation6 + $0xe4] sm:$0xf]  ;;  %v1845_v12 = vld [vmem:[#allocation6 + $0x114] sm:$0xf0] }
 0x11f   :  { %v131_v18 = vmul.f32 %v125_v62, %v121_v17  ;;  %v132_v19 = vmul.f32 %v126_v7, %v122_v51  ;;  %v1857_v62 = vld [vmem:[#allocation6 + $0x174] sm:$0xf0]  ;;  %v1571_v13 = vor.u32 %v1831_v9, %v1570_v8  ;;  %v1498_v17 = vld [vmem:[#allocation6 + $0x10] sm:$0xf]  ;;  %v1818_v56 = vld [vmem:[#allocation6 + $0x44] sm:$0xf] }
 0x120   :  { %v1675_v37 = vor.u32 %v1857_v62, %v1674_v27  ;;  %v1813_v51 = vld [vmem:[#allocation6 + $0x14] sm:$0xf0]  ;;  %v1562_v27 = vld [vmem:[#allocation6 + $0x90] sm:$0xf]  ;;  %v1698_v60 = vld [vmem:[#allocation6 + $0x1a0] sm:$0xf] }
 0x121   :  { %v141_v14 = vadd.f32 %v135_v29, %v131_v18  ;;  %v142_v20 = vadd.f32 %v136_v30, %v132_v19  ;;  %v1547_v29 = vor.u32 %v1825_v23, %v1546_v22  ;;  %v1611_v30 = vor.u32 %v1841_v26, %v1610_v24  ;;  %v1490_v19 = vld [vmem:[#allocation6] sm:$0xf]  ;;  %v1851_v22 = vld [vmem:[#allocation6 + $0x144] sm:$0xf0]  ;;  %v1824_v23 = vld [vmem:[#allocation6 + $0x74] sm:$0xf] }
 0x122   :  { %v1499_v18 = vor.u32 %v1813_v51, %v1498_v17  ;;  %v1548_v24 = vld [vmem:[#allocation6 + $0x78] sm:$0xf0]  ;;  %v1829_v62 = vld [vmem:[#allocation6 + $0x94] sm:$0xf0]  ;;  %v1618_v4 = vld [vmem:[#allocation6 + $0x100] sm:$0xf] }
 0x123   :  { %v144_v21 = vpack.c.bf16 %v142_v20, %v141_v14  ;;  %v1811_v14 = vld [vmem:[#allocation6 + $0x4] sm:$0xf0]  ;;  %v1650_v20 = vld [vmem:[#allocation6 + $0x140] sm:$0xf]  ;;  %v1551_v26 = vor.u32 %v1824_v23, %v1548_v24  ;;  %v1563_v58 = vor.u32 %v1829_v62, %v1562_v27  ;;  %v1816_v8 = vld [vmem:[#allocation6 + $0x34] sm:$0xf] }
 0x124   :  { %v1226_v25 = vld [vmem:[#allocation3] sm:$0xf]  ;;  %v1744_v31 = vld [vmem:[#allocation3 + $0x4] sm:$0xf]  ;;  %v1516_v9 = vld [vmem:[#allocation6 + $0x38] sm:$0xf0] }
 0x125   :  { %146 = vst [vmem:[#allocation3 + $0x8] sm:$0xff] %v144_v21  ;;  %v1491_v21 = vor.u32 %v1811_v14, %v1490_v19  ;;  %v1676_v17 = vld [vmem:[#allocation6 + $0x178] sm:$0xf0]  ;;  %v1690_v51 = vld [vmem:[#allocation6 + $0x190] sm:$0xf] }
 0x126   :  { %v1861_v19 = vld [vmem:[#allocation6 + $0x194] sm:$0xf0]  ;;  %v1834_v14 = vld [vmem:[#allocation6 + $0xc4] sm:$0xf]  ;;  %v1508_v24 = vld [vmem:[#allocation6 + $0x28] sm:$0xf0] }
 0x127   :  { %v1814_v23 = vld [vmem:[#allocation6 + $0x24] sm:$0xf]  ;;  %v1668_v27 = vld [vmem:[#allocation6 + $0x168] sm:$0xf0]  ;;  %v1682_v62 = vld [vmem:[#allocation6 + $0x180] sm:$0xf] }
 0x128   :  { %v1492_v46 = vld [vmem:[#allocation6 + $0x8] sm:$0xf0]  ;;  %v1850_v47 = vld [vmem:[#allocation6 + $0x144] sm:$0xf] }
 0x12c   :  { %v1745_v7 = vld [vmem:[#allocation3 + $0x4] sm:$0xf0]  ;;  %v1228_v32 = vld [vmem:[#allocation3 + $0x8] sm:$0xf0] }
 0x12d   :  { %v1227_v33 = vor.u32 %v1745_v7, %v1226_v25  ;;  %v1231_v11 = vor.u32 %v1744_v31, %v1228_v32  ;;  %v1651_v25 = vor.u32 %v1851_v22, %v1650_v20  ;;  %v1869_v7 = vld [vmem:[#allocation6 + $0x1d4] sm:$0xf0]  ;;  %v1642_v32 = vld [vmem:[#allocation6 + $0x130] sm:$0xf]  ;;  %v1588_v20 = vld [vmem:[#allocation6 + $0xc8] sm:$0xf0] }
 0x12e   :  { %v1723_v31 = vor.u32 %v1869_v7, %v1722_v28  ;;  %v1591_v22 = vor.u32 %v1834_v14, %v1588_v20  ;;  %v1859_v28 = vld [vmem:[#allocation6 + $0x184] sm:$0xf0] }
 0x12f   :  { %565 = vmatmul.bf16.vlgmr.msra.gmra.mxu0 %v1227_v33  ;;  %579 = vmatmul.bf16.vlgmr.msra.gmra.mxu1 %v1231_v11  ;;  %v1683_v7 = vor.u32 %v1859_v28, %v1682_v62  ;;  %v1700_v28 = vld [vmem:[#allocation6 + $0x1a8] sm:$0xf0] }
 0x130   :  { %593 = vmatmul.bf16.vlgmr.msra.gmra.mxu2 %v1227_v33  ;;  %607 = vmatmul.bf16.vlgmr.msra.gmra.mxu3 %v1231_v11 }
 0x131   :  { %1069 = vmatpush.bf16.msra.mxu0 %v1547_v29  ;;  %1083 = vmatpush.bf16.msra.mxu1 %v1611_v30  ;;  %v1822_v29 = vld [vmem:[#allocation6 + $0x64] sm:$0xf]  ;;  %v1554_v30 = vld [vmem:[#allocation6 + $0x80] sm:$0xf] }
 0x132   :  { %1097 = vmatpush.bf16.msra.mxu2 %v1675_v37  ;;  %1111 = vmatpush.bf16.msra.mxu3 %v1739_v39  ;;  %v1543_v63 = vor.u32 %v1822_v29, %v1540_v34  ;;  %v1555_v36 = vor.u32 %v1827_v35, %v1554_v30  ;;  %v1714_v37 = vld [vmem:[#allocation6 + $0x1c0] sm:$0xf]  ;;  %v1840_v39 = vld [vmem:[#allocation6 + $0xf4] sm:$0xf]  ;;  %v1740_v29 = vld [vmem:[#allocation6 + $0x1f8] sm:$0xf0] }
 0x133   :  { %v1715_v40 = vor.u32 %v1867_v38, %v1714_v37  ;;  %v1615_v44 = vor.u32 %v1840_v39, %v1612_v41  ;;  %v1500_v30 = vld [vmem:[#allocation6 + $0x18] sm:$0xf0]  ;;  %v1852_v35 = vld [vmem:[#allocation6 + $0x154] sm:$0xf]  ;;  %v1830_v39 = vld [vmem:[#allocation6 + $0xa4] sm:$0xf] }
 0x134   :  { %v1660_v37 = vld [vmem:[#allocation6 + $0x158] sm:$0xf0]  ;;  %v1870_v41 = vld [vmem:[#allocation6 + $0x1e4] sm:$0xf] }
 0x135   :  { %1070 = vmatpush.bf16.msra.mxu0 %v1539_v43  ;;  %1084 = vmatpush.bf16.msra.mxu1 %v1603_v45  ;;  %v1847_v43 = vld [vmem:[#allocation6 + $0x124] sm:$0xf0]  ;;  %v1663_v38 = vor.u32 %v1852_v35, %v1660_v37 }
 0x136   :  { %1098 = vmatpush.bf16.msra.mxu2 %v1667_v49  ;;  %1112 = vmatpush.bf16.msra.mxu3 %v1731_v50  ;;  %v1635_v45 = vor.u32 %v1847_v43, %v1634_v42  ;;  %v1706_v49 = vld [vmem:[#allocation6 + $0x1b0] sm:$0xf]  ;;  %v1865_v50 = vld [vmem:[#allocation6 + $0x1b4] sm:$0xf0]  ;;  %v1732_v43 = vld [vmem:[#allocation6 + $0x1e8] sm:$0xf0] }
 0x137   :  { %v1707_v52 = vor.u32 %v1865_v50, %v1706_v49  ;;  %v1652_v50 = vld [vmem:[#allocation6 + $0x148] sm:$0xf0] }
 0x139   :  { %1071 = vmatpush.bf16.msra.mxu0 %v1531_v15  ;;  %1085 = vmatpush.bf16.msra.mxu1 %v1595_v54  ;;  %v1604_v15 = vld [vmem:[#allocation6 + $0xe8] sm:$0xf0]  ;;  %v1626_v54 = vld [vmem:[#allocation6 + $0x110] sm:$0xf] }
 0x13a   :  { %1099 = vmatpush.bf16.msra.mxu2 %v1659_v57  ;;  %1113 = vmatpush.bf16.msra.mxu3 %v1723_v31  ;;  %v1607_v16 = vor.u32 %v1838_v53, %v1604_v15  ;;  %v1627_v55 = vor.u32 %v1845_v12, %v1626_v54  ;;  %v1524_v57 = vld [vmem:[#allocation6 + $0x48] sm:$0xf0]  ;;  %v1832_v31 = vld [vmem:[#allocation6 + $0xb4] sm:$0xf]  ;;  %v1564_v15 = vld [vmem:[#allocation6 + $0x98] sm:$0xf0] }
 0x13b   :  { %v1828_v53 = vld [vmem:[#allocation6 + $0x94] sm:$0xf]  ;;  %v1724_v12 = vld [vmem:[#allocation6 + $0x1d8] sm:$0xf0] }
 0x13c   :  { %v1567_v54 = vor.u32 %v1828_v53, %v1564_v15 }
 0x13d   :  { %1072 = vmatpush.bf16.msra.mxu0 %v1523_v59  ;;  %1086 = vmatpush.bf16.msra.mxu1 %v1587_v61  ;;  %v1527_v59 = vor.u32 %v1818_v56, %v1524_v57  ;;  %v1863_v61 = vld [vmem:[#allocation6 + $0x1a4] sm:$0xf0] }
 0x13e   :  { %1100 = vmatpush.bf16.msra.mxu2 %v1651_v25  ;;  %1114 = vmatpush.bf16.msra.mxu3 %v1715_v40  ;;  %v1699_v0 = vor.u32 %v1863_v61, %v1698_v60  ;;  %v1854_v25 = vld [vmem:[#allocation6 + $0x164] sm:$0xf]  ;;  %v1572_v40 = vld [vmem:[#allocation6 + $0xa8] sm:$0xf0]  ;;  %v1644_v60 = vld [vmem:[#allocation6 + $0x138] sm:$0xf0] }
 0x13f   :  { %621 = vmatmul.bf16.vlgmr.msrb.gmra.mxu0 %v1227_v33  ;;  %635 = vmatmul.bf16.vlgmr.msrb.gmra.mxu1 %v1231_v11  ;;  %v1575_v42 = vor.u32 %v1830_v39, %v1572_v40 }
 0x140   :  { %649 = vmatmul.bf16.vlgmr.msrb.gmra.mxu2 %v1227_v33  ;;  %663 = vmatmul.bf16.vlgmr.msrb.gmra.mxu3 %v1231_v11  ;;  %v1849_v33 = vld [vmem:[#allocation6 + $0x134] sm:$0xf0] }
 0x141   :  { %1073 = vmatpush.bf16.msra.mxu0 %v1515_v3  ;;  %1087 = vmatpush.bf16.msra.mxu1 %v1579_v5  ;;  %v1643_v11 = vor.u32 %v1849_v33, %v1642_v32  ;;  %v1599_v3 = vor.u32 %v1836_v1, %v1596_v2  ;;  %v1843_v5 = vld [vmem:[#allocation6 + $0x104] sm:$0xf0]  ;;  %v1580_v32 = vld [vmem:[#allocation6 + $0xb8] sm:$0xf0]  ;;  %v1826_v1 = vld [vmem:[#allocation6 + $0x84] sm:$0xf] }
 0x142   :  { %1115 = vmatpush.bf16.msra.mxu3 %v1707_v52  ;;  %v1619_v6 = vor.u32 %v1843_v5, %v1618_v4  ;;  %v1583_v33 = vor.u32 %v1832_v31, %v1580_v32  ;;  %v1655_v52 = vor.u32 %v1850_v47, %v1652_v50  ;;  %v1556_v2 = vld [vmem:[#allocation6 + $0x88] sm:$0xf0] }
 0x143   :  { %1101 = vmatpush.bf16.msra.mxu2 %v1643_v11  ;;  %v1872_v11 = vld [vmem:[#allocation6 + $0x1f4] sm:$0xf]  ;;  %v1559_v4 = vor.u32 %v1826_v1, %v1556_v2  ;;  %v1716_v5 = vld [vmem:[#allocation6 + $0x1c8] sm:$0xf0] }
 0x144   :  { %v1743_v34 = vor.u32 %v1872_v11, %v1740_v29  ;;  %v1692_v11 = vld [vmem:[#allocation6 + $0x198] sm:$0xf0] }
 0x145   :  { %1074 = vmatpush.bf16.msra.mxu0 %v1507_v10  ;;  %1088 = vmatpush.bf16.msra.mxu1 %v1571_v13  ;;  %v1519_v10 = vor.u32 %v1816_v8, %v1516_v9  ;;  %v1856_v13 = vld [vmem:[#allocation6 + $0x174] sm:$0xf]  ;;  %v1846_v8 = vld [vmem:[#allocation6 + $0x124] sm:$0xf]  ;;  %v1636_v9 = vld [vmem:[#allocation6 + $0x128] sm:$0xf0] }
 0x146   :  { %1116 = vmatpush.bf16.msra.mxu3 %v1699_v0 }
 0x147   :  { %1102 = vmatpush.bf16.msra.mxu2 %v1635_v45  ;;  %v1810_v45 = vld [vmem:[#allocation6 + $0x4] sm:$0xf] }
 0x148   :  { %v1495_v49 = vor.u32 %v1810_v45, %v1492_v46  ;;  %v1684_v45 = vld [vmem:[#allocation6 + $0x188] sm:$0xf0] }
 0x149   :  { %1075 = vmatpush.bf16.msra.mxu0 %v1499_v18  ;;  %1089 = vmatpush.bf16.msra.mxu1 %v1563_v58  ;;  %v1679_v18 = vor.u32 %v1856_v13, %v1676_v17  ;;  %v1671_v58 = vor.u32 %v1854_v25, %v1668_v27  ;;  %v1639_v13 = vor.u32 %v1846_v8, %v1636_v9  ;;  %v1864_v17 = vld [vmem:[#allocation6 + $0x1b4] sm:$0xf]  ;;  %v1862_v25 = vld [vmem:[#allocation6 + $0x1a4] sm:$0xf] }
 0x14a   :  { %v1703_v31 = vor.u32 %v1862_v25, %v1700_v28  ;;  %v1206_v25 = vld [vmem:[%s2116_s0] sm:$0xff] }
 0x14b   :  { %1103 = vmatpush.bf16.msra.mxu2 %v1627_v55 }
 0x14d   :  { %1076 = vmatpush.bf16.msra.mxu0 %v1491_v21  ;;  %1090 = vmatpush.bf16.msra.mxu1 %v1555_v36  ;;  %v1691_v21 = vor.u32 %v1861_v19, %v1690_v51  ;;  %v1708_v51 = vld [vmem:[#allocation6 + $0x1b8] sm:$0xf0] }
 0x14e   :  { %v1711_v20 = vor.u32 %v1864_v17, %v1708_v51  ;;  %v1196_v51 = vld [vmem:[%s2122_s6] sm:$0x3] }
 0x14f   :  { %1104 = vmatpush.bf16.msra.mxu2 %v1619_v6  ;;  %1117 = vmatpush.bf16.msra.mxu3 %v1691_v21 }
 0x151   :  { %1125 = vmatpush.bf16.msrb.mxu0 %v1551_v26  ;;  %1139 = vmatpush.bf16.msrb.mxu1 %v1615_v44  ;;  %v1511_v26 = vor.u32 %v1814_v23, %v1508_v24  ;;  %v1735_v44 = vor.u32 %v1870_v41, %v1732_v43  ;;  %v1844_v23 = vld [vmem:[#allocation6 + $0x114] sm:$0xf]  ;;  %v1628_v24 = vld [vmem:[#allocation6 + $0x118] sm:$0xf0] }
 0x152   :  { %v1631_v62 = vor.u32 %v1844_v23, %v1628_v24 }
 0x153   :  { %1153 = vmatpush.bf16.msrb.mxu2 %v1679_v18  ;;  %1118 = vmatpush.bf16.msra.mxu3 %v1683_v7  ;;  %v1620_v7 = vld [vmem:[#allocation6 + $0x108] sm:$0xf0] }
 0x155   :  { %1126 = vmatpush.bf16.msrb.mxu0 %v1543_v63  ;;  %1140 = vmatpush.bf16.msrb.mxu1 %v1607_v16  ;;  %v1812_v63 = vld [vmem:[#allocation6 + $0x14] sm:$0xf] }
 0x156   :  { %v1503_v36 = vor.u32 %v1812_v63, %v1500_v30  ;;  %v1868_v16 = vld [vmem:[#allocation6 + $0x1d4] sm:$0xf] }
 0x157   :  { %1154 = vmatpush.bf16.msrb.mxu2 %v1671_v58  ;;  %1167 = vmatpush.bf16.msrb.mxu3 %v1743_v34  ;;  %v1727_v57 = vor.u32 %v1868_v16, %v1724_v12  ;;  %v1842_v58 = vld [vmem:[#allocation6 + $0x104] sm:$0xf] }
 0x158   :  { %v1623_v34 = vor.u32 %v1842_v58, %v1620_v7 }
 0x159   :  { %1127 = vmatpush.bf16.msrb.mxu0 %v1535_v48  ;;  %1141 = vmatpush.bf16.msrb.mxu1 %v1599_v3  ;;  %v2083_v48 = vld [vmem:[%s2120_s4] sm:$0xf]  ;;  %v1866_v3 = vld [vmem:[#allocation6 + $0x1c4] sm:$0xf] }
 0x15a   :  { %v219_v61 = vperm.slane %v2083_v48, 0  ;;  %v1719_v6 = vor.u32 %v1866_v3, %v1716_v5  ;;  %v220_v18 = vperm.slane %v2083_v48, 1  ;;  %v221_v43 = vperm.slane %v2083_v48, 2 }
 0x15b   :  { %1155 = vmatpush.bf16.msrb.mxu2 %v1663_v38  ;;  %1168 = vmatpush.bf16.msrb.mxu3 %v1735_v44  ;;  %v1858_v44 = vld [vmem:[#allocation6 + $0x184] sm:$0xf] }
 0x15c   :  { %v1687_v47 = vor.u32 %v1858_v44, %v1684_v45 }
 0x15d   :  { %1128 = vmatpush.bf16.msrb.mxu0 %v1527_v59  ;;  %1142 = vmatpush.bf16.msrb.mxu1 %v1591_v22  ;;  %v1848_v59 = vld [vmem:[#allocation6 + $0x134] sm:$0xf] }
 0x15e   :  { %v1647_v0 = vor.u32 %v1848_v59, %v1644_v60 }
 0x15f   :  { %1156 = vmatpush.bf16.msrb.mxu2 %v1655_v52  ;;  %1169 = vmatpush.bf16.msrb.mxu3 %v1727_v57 }
 0x161   :  { %1129 = vmatpush.bf16.msrb.mxu0 %v1519_v10  ;;  %1143 = vmatpush.bf16.msrb.mxu1 %v1583_v33  ;;  %v1860_v33 = vld [vmem:[#allocation6 + $0x194] sm:$0xf] }
 0x162   :  { %v1695_v35 = vor.u32 %v1860_v33, %v1692_v11 }
 0x163   :  { %1157 = vmatpush.bf16.msrb.mxu2 %v1647_v0  ;;  %1170 = vmatpush.bf16.msrb.mxu3 %v1719_v6 }
 0x165   :  { %1130 = vmatpush.bf16.msrb.mxu0 %v1511_v26  ;;  %1144 = vmatpush.bf16.msrb.mxu1 %v1575_v42 }
 0x167   :  { %1158 = vmatpush.bf16.msrb.mxu2 %v1639_v13  ;;  %1171 = vmatpush.bf16.msrb.mxu3 %v1711_v20  ;;  %v1198_v20 = vperm.slane %v1196_v51, 0 }
 0x169   :  { %1131 = vmatpush.bf16.msrb.mxu0 %v1503_v36  ;;  %1145 = vmatpush.bf16.msrb.mxu1 %v1567_v54  ;;  %v222_v54 = vperm.slane %v2083_v48, 3 }
 0x16b   :  { %1159 = vmatpush.bf16.msrb.mxu2 %v1631_v62  ;;  %1172 = vmatpush.bf16.msrb.mxu3 %v1703_v31 }
 0x16d   :  { %1132 = vmatpush.bf16.msrb.mxu0 %v1495_v49  ;;  %1146 = vmatpush.bf16.msrb.mxu1 %v1559_v4 }
 0x16f   :  { %1160 = vmatpush.bf16.msrb.mxu2 %v1623_v34  ;;  %1173 = vmatpush.bf16.msrb.mxu3 %v1695_v35  ;;  %v1199_v35 = vperm.slane %v1196_v51, 1 }
 0x173   :  { %1174 = vmatpush.bf16.msrb.mxu3 %v1687_v47 }
 0x1ac   :  { %v566_v55 = vpop.f32.mrf.mxu0  ;;  %v580_v56 = vpop.f32.mrf.mxu1 }
 0x1ad   :  { %v567_v10 = vadd.f32 %v566_v55, %v219_v61 }
 0x1af   :  { %v581_v26 = vadd.f32 %v580_v56, %v567_v10 }
 0x1b1   :  { %v669_v63 = vmax.f32 %v581_v26, 0.0 }
 0x1b3   :  { %v594_v19 = vpop.f32.mrf.mxu2  ;;  %v608_v14 = vpop.f32.mrf.mxu3 }
 0x1b4   :  { %v568_v21 = vpop.f32.mrf.mxu0  ;;  %v582_v22 = vpop.f32.mrf.mxu1  ;;  %v595_v29 = vadd.f32 %v594_v19, %v220_v18 }
 0x1b5   :  { %v569_v27 = vadd.f32 %v568_v21, %v219_v61 }
 0x1b6   :  { %v609_v39 = vadd.f32 %v608_v14, %v595_v29 }
 0x1b7   :  { %v583_v32 = vadd.f32 %v582_v22, %v569_v27 }
 0x1b8   :  { %v670_v49 = vmax.f32 %v609_v39, 0.0 }
 0x1b9   :  { %v673_v30 = vmax.f32 %v583_v32, 0.0 }
 0x1bb   :  { %v677_v36 = vpack.c.bf16 %v673_v30, %v669_v63  ;;  %v596_v37 = vpop.f32.mrf.mxu2  ;;  %v610_v38 = vpop.f32.mrf.mxu3 }
 0x1bc   :  { %v597_v40 = vadd.f32 %v596_v37, %v220_v18  ;;  %v622_v41 = vpop.f32.mrf.mxu0  ;;  %v636_v42 = vpop.f32.mrf.mxu1 }
 0x1bd   :  { %1077 = vmatmul.bf16.vlgmr.msra.gmra.mxu0 %v677_v36  ;;  %v623_v52 = vadd.f32 %v622_v41, %v221_v43 }
 0x1be   :  { %v611_v46 = vadd.f32 %v610_v38, %v597_v40 }
 0x1bf   :  { %v637_v55 = vadd.f32 %v636_v42, %v623_v52 }
 0x1c0   :  { %v674_v50 = vmax.f32 %v611_v46, 0.0 }
 0x1c1   :  { %v671_v61 = vmax.f32 %v637_v55, 0.0 }
 0x1c2   :  { %v678_v53 = vpack.c.bf16 %v674_v50, %v670_v49 }
 0x1c3   :  { %v650_v15 = vpop.f32.mrf.mxu2  ;;  %v664_v16 = vpop.f32.mrf.mxu3 }
 0x1c4   :  { %1091 = vmatmul.bf16.vlgmr.msra.gmra.mxu1 %v678_v53  ;;  %v624_v12 = vpop.f32.mrf.mxu0  ;;  %v638_v57 = vpop.f32.mrf.mxu1  ;;  %v651_v60 = vadd.f32 %v650_v15, %v222_v54 }
 0x1c5   :  { %v625_v56 = vadd.f32 %v624_v12, %v221_v43 }
 0x1c6   :  { %v665_v3 = vadd.f32 %v664_v16, %v651_v60 }
 0x1c7   :  { %v639_v59 = vadd.f32 %v638_v57, %v625_v56 }
 0x1c8   :  { %v672_v8 = vmax.f32 %v665_v3, 0.0 }
 0x1c9   :  { %v675_v0 = vmax.f32 %v639_v59, 0.0 }
 0x1cb   :  { %v679_v1 = vpack.c.bf16 %v675_v0, %v671_v61  ;;  %v652_v2 = vpop.f32.mrf.mxu2  ;;  %v666_v5 = vpop.f32.mrf.mxu3 }
 0x1cc   :  { %v653_v4 = vadd.f32 %v652_v2, %v222_v54 }
 0x1cd   :  { %1105 = vmatmul.bf16.vlgmr.msra.gmra.mxu2 %v679_v1  ;;  %1133 = vmatmul.bf16.vlgmr.msrb.gmra.mxu0 %v677_v36 }
 0x1ce   :  { %v667_v6 = vadd.f32 %v666_v5, %v653_v4 }
 0x1d0   :  { %v676_v9 = vmax.f32 %v667_v6, 0.0 }
 0x1d2   :  { %v680_v48 = vpack.c.bf16 %v676_v9, %v672_v8 }
 0x1d4   :  { %1119 = vmatmul.bf16.vlgmr.msra.gmra.mxu3 %v680_v48  ;;  %1147 = vmatmul.bf16.vlgmr.msrb.gmra.mxu1 %v678_v53 }
 0x1dd   :  { %1161 = vmatmul.bf16.vlgmr.msrb.gmra.mxu2 %v679_v1 }
 0x1e4   :  { %1175 = vmatmul.bf16.vlgmr.msrb.gmra.mxu3 %v680_v48 }
 0x23a   :  { %v1078_v13 = vpop.f32.mrf.mxu0 }
 0x241   :  { %v1092_v10 = vpop.f32.mrf.mxu1 }
 0x242   :  { %v1093_v18 = vadd.f32 %v1092_v10, %v1078_v13  ;;  %v1080_v21 = vpop.f32.mrf.mxu0 }
 0x249   :  { %v1094_v19 = vpop.f32.mrf.mxu1 }
 0x24a   :  { %v1095_v27 = vadd.f32 %v1094_v19, %v1080_v21  ;;  %v1134_v32 = vpop.f32.mrf.mxu0 }
 0x250   :  { %v1106_v17 = vpop.f32.mrf.mxu2 }
 0x251   :  { %v1107_v14 = vadd.f32 %v1106_v17, %v1093_v18  ;;  %v1148_v58 = vpop.f32.mrf.mxu1 }
 0x252   :  { %v1149_v34 = vadd.f32 %v1148_v58, %v1134_v32  ;;  %v1136_v41 = vpop.f32.mrf.mxu0 }
 0x257   :  { %v1120_v22 = vpop.f32.mrf.mxu3 }
 0x258   :  { %v1121_v23 = vadd.f32 %v1120_v22, %v1107_v14  ;;  %v1108_v24 = vpop.f32.mrf.mxu2 }
 0x259   :  { %v1109_v28 = vadd.f32 %v1108_v24, %v1095_v27  ;;  %v1150_v38 = vpop.f32.mrf.mxu1 }
 0x25a   :  { %v1202_v26 = vadd.f32 %v1198_v20, %v1121_v23  ;;  %v1151_v43 = vadd.f32 %v1150_v38, %v1136_v41 }
 0x25c   :  { %v1210_v62 = vadd.f32 %v1206_v25, %v1202_v26 }
 0x25e   :  { %1214 = vst [vmem:[%s2123_s7] sm:$0xff] %v1210_v62 }
 0x25f   :  { %v1122_v7 = vpop.f32.mrf.mxu3 }
 0x260   :  { %v1123_v31 = vadd.f32 %v1122_v7, %v1109_v28  ;;  %v1162_v11 = vpop.f32.mrf.mxu2 }
 0x261   :  { %v1163_v30 = vadd.f32 %v1162_v11, %v1149_v34 }
 0x262   :  { %v1204_v29 = vadd.f32 %v1198_v20, %v1123_v31 }
 0x265   :  { %v1208_v33 = vld [vmem:[%s2116_s0 + $0x10] sm:$0xff] }
 0x266   :  { %v1212_v63 = vadd.f32 %v1208_v33, %v1204_v29 }
 0x267   :  { %v1176_v36 = vpop.f32.mrf.mxu3 }
 0x268   :  { %1216 = vst [vmem:[%s2123_s7 + $0x10] sm:$0xff] %v1212_v63  ;;  %v1177_v37 = vadd.f32 %v1176_v36, %v1163_v30  ;;  %v1164_v42 = vpop.f32.mrf.mxu2 }
 0x269   :  { %v1165_v45 = vadd.f32 %v1164_v42, %v1151_v43 }
 0x26a   :  { %v1203_v40 = vadd.f32 %v1199_v35, %v1177_v37 }
 0x26f   :  { %v1207_v39 = vld [vmem:[%s2116_s0 + $0x8] sm:$0xff]  ;;  %v1178_v46 = vpop.f32.mrf.mxu3 }
 0x270   :  { %v1211_v44 = vadd.f32 %v1207_v39, %v1203_v40  ;;  %v1179_v47 = vadd.f32 %v1178_v46, %v1165_v45 }
 0x272   :  { %1215 = vst [vmem:[%s2123_s7 + $0x8] sm:$0xff] %v1211_v44  ;;  %v1205_v50 = vadd.f32 %v1199_v35, %v1179_v47 }
 0x279   :  { %v1209_v49 = vld [vmem:[%s2116_s0 + $0x18] sm:$0xff] }
 0x27a   :  { %v1213_v52 = vadd.f32 %v1209_v49, %v1205_v50 }
 0x27c   :  { %1217 = vst [vmem:[%s2123_s7 + $0x18] sm:$0xff] %v1213_v52 }
 0x27d   :  { %1222 = vsyncpa [#allocation5], 1 }
 0x27e   :  { %1223 = vsyncpa [#allocation7], 1 }

// kernel: encoder_forward.11
= control target key start
LH: loop header
LB: loop body
LE: loop exit
PB: predicated region body
PF: predicated region fallthrough
CT: control target
= control target key end

     0   :  { %14 = vsyncpa [#allocation5], 0  ;;  %s2223_s0 = inlined_call_operand.vmem [shape: f32[16,256], index: 0, kind: input, shape index: {}, may-alias: {0,9}]   ;;  %s2224_s1 = inlined_call_operand.vmem [shape: f32[1,256], index: 1, kind: input, shape index: {}]   ;;  %s2225_s2 = inlined_call_operand.vmem [shape: f32[1,256], index: 2, kind: input, shape index: {}]   ;;  %s2226_s3 = inlined_call_operand.hbm [shape: bf16[256,512], index: 3, kind: input, shape index: {}]   ;;  %s2227_s4 = inlined_call_operand.vmem [shape: f32[1,512], index: 4, kind: input, shape index: {}]   ;;  %s2228_s5 = inlined_call_operand.hbm [shape: bf16[512,256], index: 5, kind: input, shape index: {}]   ;;  %s2229_s6 = inlined_call_operand.vmem [shape: f32[1,256], index: 6, kind: input, shape index: {}]   ;;  %s2230_s7 = inlined_call_operand.vmem [shape: f32[1,256], index: 7, kind: input, shape index: {}]   ;;  %s2231_s8 = inlined_call_operand.vmem [shape: f32[1,256], index: 8, kind: input, shape index: {}]   ;;  %s2232_s9 = inlined_call_operand.vmem [shape: f32[16,256], index: 9, kind: output, shape index: {}, may-alias: {0,9}]  }
   0x1   :  { %s26_s11 = sshll.u32 %s2226_s3, 4  ;;  %s27_s11 = int_to_ptr.hbm [resolvable:$true] %s26_s11 }
   0x2   :  { %15 = vsyncpa [#allocation7], 0  ;;  %s2026_s12 = smov [#allocation4]   ;;  %s41_s16 = sshll.u32 %s2228_s5, 4  ;;  %s42_s16 = int_to_ptr.hbm [resolvable:$true] %s41_s16 }
   0x3   :  { %s28_s13 = sshll.u32 %s2026_s12, 4  ;;  %s2027_s17 = smov 256   ;;  %s29_s13 = int_to_ptr.vmem [resolvable:$true] %s28_s13 }
   0x4   :  { %s2028_s18 = smov 16   ;;  %s2029_s19 = smov [#allocation6]  }
   0x5   :  { %34 = dma.hbm_to_vmem [thread:$0]  %s27_s11, 8192, %s29_s13, [#allocation5], %s2027_s17, %s2027_s17, %s2028_s18  }
   0x6   :  { %s43_s20 = sshll.u32 %s2029_s19, 4  ;;  %s2030_s21 = smov 128   ;;  %s44_s20 = int_to_ptr.vmem [resolvable:$true] %s43_s20 }
   0x7   :  { %s2031_s22 = smov 8  }
   0x8   :  { %49 = dma.hbm_to_vmem [thread:$0]  %s42_s16, 8192, %s44_s20, [#allocation7], %s2030_s21, %s2030_s21, %s2031_s22  }
   0x9   :  { %2022 = dma.done.wait [#allocation5], 8192  }
   0xa   :  { %2023 = vsyncadd [#allocation5], 4294959104 }
   0xb   :  { %2024 = dma.done.wait [#allocation7], 8192  }
   0xc   :  { %2025 = vsyncadd [#allocation7], 4294959104  ;;  %v68_v0 = vld [vmem:[%s2223_s0] sm:$0xff]  ;;  %v69_v1 = vld [vmem:[%s2223_s0 + $0x8] sm:$0xff]  ;;  %v2032_v6 = vmov 256.0  }
   0xd   :  { %v72_v2 = vadd.f32 %v69_v1, %v68_v0  ;;  %v70_v3 = vld [vmem:[%s2223_s0 + $0x10] sm:$0xff]  ;;  %v71_v4 = vld [vmem:[%s2223_s0 + $0x18] sm:$0xff]  ;;  %1964 = vrcp.f32 %v2032_v6  ;;  %v1859_v28 = vld [vmem:[#allocation4 + $0xec] sm:$0xf0] }
   0xe   :  { %v75_v5 = vadd.f32 %v71_v4, %v70_v3  ;;  %v1429_v27 = vld [vmem:[#allocation4 + $0xe0] sm:$0xf]  ;;  %v1891_v31 = vld [vmem:[#allocation4 + $0x1ec] sm:$0xf0]  ;;  %v1857_v32 = vld [vmem:[#allocation4 + $0xe4] sm:$0xf] }
   0xf   :  { %73 = vadd.xlane.f32.xlu0 %v72_v2  ;;  %v1557_v29 = vld [vmem:[#allocation4 + $0x1e0] sm:$0xf]  ;;  %v1430_v30 = vor.u32 %v1859_v28, %v1429_v27  ;;  %v1431_v33 = vld [vmem:[#allocation4 + $0xf0] sm:$0xf0]  ;;  %v1889_v36 = vld [vmem:[#allocation4 + $0x1e4] sm:$0xf] }
  0x10   :  { %v1558_v34 = vor.u32 %v1891_v31, %v1557_v29  ;;  %v1434_v35 = vor.u32 %v1857_v32, %v1431_v33  ;;  %v1559_v37 = vld [vmem:[#allocation4 + $0x1f0] sm:$0xf0]  ;;  %v1413_v39 = vld [vmem:[#allocation4 + $0xc0] sm:$0xf]  ;;  %v1855_v40 = vld [vmem:[#allocation4 + $0xcc] sm:$0xf0] }
  0x11   :  { %563 = vmatpush.bf16.msra.mxu0 %v1430_v30  ;;  %v1562_v38 = vor.u32 %v1889_v36, %v1559_v37  ;;  %v1541_v41 = vld [vmem:[#allocation4 + $0x1c0] sm:$0xf]  ;;  %v1414_v42 = vor.u32 %v1855_v40, %v1413_v39  ;;  %v1887_v43 = vld [vmem:[#allocation4 + $0x1cc] sm:$0xf0]  ;;  %v1853_v44 = vld [vmem:[#allocation4 + $0xc4] sm:$0xf] }
  0x12   :  { %577 = vmatpush.bf16.msra.mxu1 %v1558_v34  ;;  %591 = vmatpush.bf16.msra.mxu2 %v1434_v35  ;;  %v1415_v45 = vld [vmem:[#allocation4 + $0xd0] sm:$0xf0]  ;;  %v1542_v46 = vor.u32 %v1887_v43, %v1541_v41  ;;  %v1885_v48 = vld [vmem:[#allocation4 + $0x1c4] sm:$0xf]  ;;  %v1397_v51 = vld [vmem:[#allocation4 + $0xa0] sm:$0xf] }
  0x13   :  { %v1965_v7 = vpop.eup %1964  ;;  %605 = vmatpush.bf16.msra.mxu3 %v1562_v38  ;;  %v1418_v47 = vor.u32 %v1853_v44, %v1415_v45  ;;  %v1543_v49 = vld [vmem:[#allocation4 + $0x1d0] sm:$0xf0]  ;;  %v1851_v52 = vld [vmem:[#allocation4 + $0xac] sm:$0xf0]  ;;  %v1525_v53 = vld [vmem:[#allocation4 + $0x1a0] sm:$0xf] }
  0x14   :  { %v79_v8 = vmul.f32 256.0, %v1965_v7  ;;  %vm83_vm0 = vweird.f32 %v1965_v7  ;;  %v1546_v50 = vor.u32 %v1885_v48, %v1543_v49  ;;  %v1398_v54 = vor.u32 %v1851_v52, %v1397_v51  ;;  %v1883_v55 = vld [vmem:[#allocation4 + $0x1ac] sm:$0xf0]  ;;  %v1849_v56 = vld [vmem:[#allocation4 + $0xa4] sm:$0xf] }
  0x15   :  { %564 = vmatpush.bf16.msra.mxu0 %v1414_v42  ;;  %v1399_v57 = vld [vmem:[#allocation4 + $0xb0] sm:$0xf0]  ;;  %v1526_v58 = vor.u32 %v1883_v55, %v1525_v53  ;;  %v1881_v60 = vld [vmem:[#allocation4 + $0x1a4] sm:$0xf]  ;;  %v1381_v63 = vld [vmem:[#allocation4 + $0x80] sm:$0xf] }
  0x16   :  { %v80_v9 = vsub.f32 1.0, %v79_v8  ;;  %578 = vmatpush.bf16.msra.mxu1 %v1542_v46  ;;  %592 = vmatpush.bf16.msra.mxu2 %v1418_v47  ;;  %v1402_v59 = vor.u32 %v1849_v56, %v1399_v57  ;;  %v1527_v61 = vld [vmem:[#allocation4 + $0x1b0] sm:$0xf0]  ;;  %v1877_v8 = vld [vmem:[#allocation4 + $0x184] sm:$0xf] }
  0x17   :  { %76 = vadd.xlane.f32.xlu0 %v75_v5  ;;  %606 = vmatpush.bf16.msra.mxu3 %v1546_v50  ;;  %v1530_v62 = vor.u32 %v1881_v60, %v1527_v61  ;;  %v1383_v5 = vld [vmem:[#allocation4 + $0x90] sm:$0xf0]  ;;  %v1349_v28 = vld [vmem:[#allocation4 + $0x40] sm:$0xf]  ;;  %v1839_v29 = vld [vmem:[#allocation4 + $0x4c] sm:$0xf0] }
  0x18   :  { %v81_v10 = vmul.f32 %v1965_v7, %v80_v9  ;;  %v1511_v9 = vld [vmem:[#allocation4 + $0x190] sm:$0xf0]  ;;  %v1477_v30 = vld [vmem:[#allocation4 + $0x140] sm:$0xf]  ;;  %v1350_v31 = vor.u32 %v1839_v29, %v1349_v28  ;;  %v1871_v32 = vld [vmem:[#allocation4 + $0x14c] sm:$0xf0] }
  0x19   :  { %565 = vmatpush.bf16.msra.mxu0 %v1398_v54  ;;  %v1837_v33 = vld [vmem:[#allocation4 + $0x44] sm:$0xf]  ;;  %v1351_v34 = vld [vmem:[#allocation4 + $0x50] sm:$0xf0]  ;;  %v1478_v35 = vor.u32 %v1871_v32, %v1477_v30  ;;  %v1333_v40 = vld [vmem:[#allocation4 + $0x20] sm:$0xf] }
  0x1a   :  { %v82_v11 = vadd.f32 %v1965_v7, %v81_v10  ;;  %579 = vmatpush.bf16.msra.mxu1 %v1526_v58  ;;  %593 = vmatpush.bf16.msra.mxu2 %v1402_v59  ;;  %v1514_v10 = vor.u32 %v1877_v8, %v1511_v9  ;;  %v1354_v36 = vor.u32 %v1837_v33, %v1351_v34  ;;  %v1869_v37 = vld [vmem:[#allocation4 + $0x144] sm:$0xf]  ;;  %v1479_v38 = vld [vmem:[#allocation4 + $0x150] sm:$0xf0]  ;;  %v1835_v41 = vld [vmem:[#allocation4 + $0x2c] sm:$0xf0] }
  0x1b   :  { %607 = vmatpush.bf16.msra.mxu3 %v1530_v62  ;;  %v1482_v39 = vor.u32 %v1869_v37, %v1479_v38  ;;  %v1461_v42 = vld [vmem:[#allocation4 + $0x120] sm:$0xf]  ;;  %v1334_v43 = vor.u32 %v1835_v41, %v1333_v40  ;;  %v1867_v44 = vld [vmem:[#allocation4 + $0x12c] sm:$0xf0]  ;;  %v1833_v45 = vld [vmem:[#allocation4 + $0x24] sm:$0xf] }
  0x1c   :  { %v2101_v12 = vsel %vm83_vm0, %v1965_v7, %v82_v11  ;;  %v1365_v11 = vld [vmem:[#allocation4 + $0x60] sm:$0xf]  ;;  %v1335_v46 = vld [vmem:[#allocation4 + $0x30] sm:$0xf0]  ;;  %v1462_v47 = vor.u32 %v1867_v44, %v1461_v42  ;;  %v1865_v49 = vld [vmem:[#allocation4 + $0x124] sm:$0xf] }
  0x1d   :  { %v1338_v48 = vor.u32 %v1833_v45, %v1335_v46  ;;  %v1463_v50 = vld [vmem:[#allocation4 + $0x130] sm:$0xf0]  ;;  %v1317_v52 = vld [vmem:[#allocation4] sm:$0xf]  ;;  %v1831_v53 = vld [vmem:[#allocation4 + $0xc] sm:$0xf0] }
  0x1e   :  { %v1466_v51 = vor.u32 %v1865_v49, %v1463_v50  ;;  %v1445_v54 = vld [vmem:[#allocation4 + $0x100] sm:$0xf]  ;;  %v1318_v55 = vor.u32 %v1831_v53, %v1317_v52  ;;  %v1863_v56 = vld [vmem:[#allocation4 + $0x10c] sm:$0xf0]  ;;  %v1829_v57 = vld [vmem:[#allocation4 + $0x4] sm:$0xf] }
  0x1f   :  { %608 = vmatpush.bf16.msra.mxu3 %v1514_v10  ;;  %v1319_v58 = vld [vmem:[#allocation4 + $0x10] sm:$0xf0]  ;;  %v1446_v60 = vor.u32 %v1863_v56, %v1445_v54  ;;  %v1861_v62 = vld [vmem:[#allocation4 + $0x104] sm:$0xf]  ;;  %v1858_v8 = vld [vmem:[#allocation4 + $0xec] sm:$0xf] }
  0x20   :  { %v1322_v61 = vor.u32 %v1829_v57, %v1319_v58  ;;  %v1439_v9 = vld [vmem:[#allocation4 + $0xf8] sm:$0xf0]  ;;  %v1890_v10 = vld [vmem:[#allocation4 + $0x1ec] sm:$0xf]  ;;  %v1405_v32 = vld [vmem:[#allocation4 + $0xa8] sm:$0xf] }
  0x21   :  { %v1886_v28 = vld [vmem:[#allocation4 + $0x1cc] sm:$0xf]  ;;  %v1551_v30 = vld [vmem:[#allocation4 + $0x1d8] sm:$0xf0]  ;;  %v1852_v33 = vld [vmem:[#allocation4 + $0xb4] sm:$0xf0] }
  0x22   :  { %v1533_v34 = vld [vmem:[#allocation4 + $0x1a8] sm:$0xf]  ;;  %v1884_v37 = vld [vmem:[#allocation4 + $0x1b4] sm:$0xf0]  ;;  %v1850_v38 = vld [vmem:[#allocation4 + $0xac] sm:$0xf] }
  0x23   :  { %v1534_v41 = vor.u32 %v1884_v37, %v1533_v34  ;;  %v1535_v44 = vld [vmem:[#allocation4 + $0x1b8] sm:$0xf0]  ;;  %v1389_v45 = vld [vmem:[#allocation4 + $0x88] sm:$0xf]  ;;  %v1880_v49 = vld [vmem:[#allocation4 + $0x194] sm:$0xf0] }
  0x24   :  { %v1846_v52 = vld [vmem:[#allocation4 + $0x8c] sm:$0xf]  ;;  %v1391_v53 = vld [vmem:[#allocation4 + $0x98] sm:$0xf0] }
  0x25   :  { %v1878_v57 = vld [vmem:[#allocation4 + $0x18c] sm:$0xf]  ;;  %v1519_v58 = vld [vmem:[#allocation4 + $0x198] sm:$0xf0] }
  0x26   :  { %v1359_v34 = vld [vmem:[#allocation4 + $0x58] sm:$0xf0] }
  0x82   :  { %v74_v13 = vpop.xlane.xlu0 %73 }
  0x83   :  { %v85_v14 = vmul.f32 %v2101_v12, %v74_v13  ;;  %v1843_v13 = vld [vmem:[#allocation4 + $0x6c] sm:$0xf0] }
  0x85   :  { %v2104_v15 = vsub.f32 %v68_v0, %v85_v14  ;;  %v2106_v16 = vsub.f32 %v69_v1, %v85_v14  ;;  %v1847_v0 = vld [vmem:[#allocation4 + $0x8c] sm:$0xf0]  ;;  %v1509_v1 = vld [vmem:[#allocation4 + $0x180] sm:$0xf] }
  0x86   :  { %v1382_v2 = vor.u32 %v1847_v0, %v1381_v63  ;;  %v1493_v14 = vld [vmem:[#allocation4 + $0x160] sm:$0xf]  ;;  %v1447_v63 = vld [vmem:[#allocation4 + $0x110] sm:$0xf0]  ;;  %v1437_v0 = vld [vmem:[#allocation4 + $0xe8] sm:$0xf] }
  0x87   :  { %v91_v17 = vmul.f32 %v2104_v15, %v2104_v15  ;;  %v92_v18 = vmul.f32 %v2106_v16, %v2106_v16 }
  0x88   :  { %566 = vmatpush.bf16.msra.mxu0 %v1382_v2  ;;  %v1450_v2 = vor.u32 %v1861_v62, %v1447_v63  ;;  %v1522_v62 = vor.u32 %v1878_v57, %v1519_v58 }
  0x89   :  { %v95_v19 = vadd.f32 %v92_v18, %v91_v17  ;;  %v1366_v17 = vor.u32 %v1843_v13, %v1365_v11  ;;  %v1875_v18 = vld [vmem:[#allocation4 + $0x16c] sm:$0xf0]  ;;  %v1442_v13 = vor.u32 %v1858_v8, %v1439_v9 }
  0x8a   :  { %v77_v20 = vpop.xlane.xlu0 %76 }
  0x8b   :  { %v86_v21 = vmul.f32 %v2101_v12, %v77_v20  ;;  %96 = vadd.xlane.f32.xlu1 %v95_v19  ;;  %v1841_v19 = vld [vmem:[#allocation4 + $0x64] sm:$0xf]  ;;  %v1367_v20 = vld [vmem:[#allocation4 + $0x70] sm:$0xf0] }
  0x8c   :  { %567 = vmatpush.bf16.msra.mxu0 %v1366_v17  ;;  %v1421_v17 = vld [vmem:[#allocation4 + $0xc8] sm:$0xf] }
  0x8d   :  { %v2113_v22 = vsub.f32 %v70_v3, %v86_v21  ;;  %v2115_v23 = vsub.f32 %v71_v4, %v86_v21  ;;  %v1879_v3 = vld [vmem:[#allocation4 + $0x18c] sm:$0xf0]  ;;  %v1845_v4 = vld [vmem:[#allocation4 + $0x84] sm:$0xf]  ;;  %v1494_v21 = vor.u32 %v1875_v18, %v1493_v14  ;;  %v1567_v14 = vld [vmem:[#allocation4 + $0x1f8] sm:$0xf0] }
  0x8e   :  { %v1510_v6 = vor.u32 %v1879_v3, %v1509_v1  ;;  %v1386_v7 = vor.u32 %v1845_v4, %v1383_v5  ;;  %v1860_v3 = vld [vmem:[#allocation4 + $0xf4] sm:$0xf0]  ;;  %v1565_v4 = vld [vmem:[#allocation4 + $0x1e8] sm:$0xf]  ;;  %v1570_v18 = vor.u32 %v1890_v10, %v1567_v14  ;;  %v1874_v14 = vld [vmem:[#allocation4 + $0x16c] sm:$0xf] }
  0x8f   :  { %v93_v24 = vmul.f32 %v2113_v22, %v2113_v22  ;;  %v94_v25 = vmul.f32 %v2115_v23, %v2115_v23  ;;  %v1892_v5 = vld [vmem:[#allocation4 + $0x1f4] sm:$0xf0] }
  0x90   :  { %580 = vmatpush.bf16.msra.mxu1 %v1510_v6  ;;  %594 = vmatpush.bf16.msra.mxu2 %v1386_v7  ;;  %v1438_v6 = vor.u32 %v1860_v3, %v1437_v0  ;;  %v1566_v7 = vor.u32 %v1892_v5, %v1565_v4  ;;  %v2139_v0 = vld [vmem:[%s2225_s2] sm:$0x3]  ;;  %v1844_v3 = vld [vmem:[#allocation4 + $0x74] sm:$0xf0]  ;;  %v1501_v5 = vld [vmem:[#allocation4 + $0x168] sm:$0xf] }
  0x91   :  { %v98_v26 = vadd.f32 %v94_v25, %v93_v24  ;;  %v1370_v24 = vor.u32 %v1841_v19, %v1367_v20  ;;  %v1873_v25 = vld [vmem:[#allocation4 + $0x164] sm:$0xf]  ;;  %568 = vmatpush.bf16.msra.mxu0 %v1350_v31  ;;  %v1856_v19 = vld [vmem:[#allocation4 + $0xd4] sm:$0xf0]  ;;  %v1549_v20 = vld [vmem:[#allocation4 + $0x1c8] sm:$0xf]  ;;  %v1554_v31 = vor.u32 %v1886_v28, %v1551_v30 }
  0x92   :  { %v1872_v28 = vld [vmem:[#allocation4 + $0x154] sm:$0xf0]  ;;  %v141_v30 = vperm.slane %v2139_v0, 0 }
  0x93   :  { %99 = vadd.xlane.f32.xlu1 %v98_v26  ;;  %v1495_v26 = vld [vmem:[#allocation4 + $0x170] sm:$0xf0] }
  0x94   :  { %v1498_v27 = vor.u32 %v1873_v25, %v1495_v26  ;;  %581 = vmatpush.bf16.msra.mxu1 %v1494_v21  ;;  %595 = vmatpush.bf16.msra.mxu2 %v1370_v24  ;;  %v1888_v21 = vld [vmem:[#allocation4 + $0x1d4] sm:$0xf0]  ;;  %v1422_v24 = vor.u32 %v1856_v19, %v1421_v17  ;;  %v1854_v26 = vld [vmem:[#allocation4 + $0xcc] sm:$0xf]  ;;  %v1503_v19 = vld [vmem:[#allocation4 + $0x178] sm:$0xf0] }
  0x95   :  { %569 = vmatpush.bf16.msra.mxu0 %v1334_v43  ;;  %v1550_v25 = vor.u32 %v1888_v21, %v1549_v20  ;;  %v1882_v43 = vld [vmem:[#allocation4 + $0x1ac] sm:$0xf]  ;;  %v1357_v20 = vld [vmem:[#allocation4 + $0x48] sm:$0xf]  ;;  %v1840_v21 = vld [vmem:[#allocation4 + $0x54] sm:$0xf0] }
  0x96   :  { %609 = vmatpush.bf16.msra.mxu3 %v1498_v27  ;;  %v1423_v27 = vld [vmem:[#allocation4 + $0xd8] sm:$0xf0]  ;;  %v1538_v46 = vor.u32 %v1882_v43, %v1535_v44  ;;  %v1469_v44 = vld [vmem:[#allocation4 + $0x128] sm:$0xf] }
  0x97   :  { %v1426_v29 = vor.u32 %v1854_v26, %v1423_v27  ;;  %v1506_v26 = vor.u32 %v1874_v14, %v1503_v19  ;;  %v1485_v27 = vld [vmem:[#allocation4 + $0x148] sm:$0xf] }
  0x98   :  { %582 = vmatpush.bf16.msra.mxu1 %v1478_v35  ;;  %596 = vmatpush.bf16.msra.mxu2 %v1354_v36  ;;  %v1406_v36 = vor.u32 %v1852_v33, %v1405_v32  ;;  %v1358_v32 = vor.u32 %v1840_v21, %v1357_v20  ;;  %v1486_v33 = vor.u32 %v1872_v28, %v1485_v27  ;;  %v1924_v28 = vld [vmem:[#allocation6 + $0xf4] sm:$0xf0] }
  0x99   :  { %570 = vmatpush.bf16.msra.mxu0 %v1318_v55 }
  0x9a   :  { %610 = vmatpush.bf16.msra.mxu3 %v1482_v39  ;;  %v1407_v39 = vld [vmem:[#allocation4 + $0xb8] sm:$0xf0] }
  0x9b   :  { %v1410_v42 = vor.u32 %v1850_v38, %v1407_v39  ;;  %v1487_v38 = vld [vmem:[#allocation4 + $0x158] sm:$0xf0]  ;;  %v1341_v39 = vld [vmem:[#allocation4 + $0x28] sm:$0xf] }
  0x9c   :  { %583 = vmatpush.bf16.msra.mxu1 %v1462_v47  ;;  %597 = vmatpush.bf16.msra.mxu2 %v1338_v48  ;;  %v1848_v47 = vld [vmem:[#allocation4 + $0x94] sm:$0xf0]  ;;  %v1517_v48 = vld [vmem:[#allocation4 + $0x188] sm:$0xf] }
  0x9d   :  { %619 = vmatpush.bf16.msrb.mxu0 %v1438_v6  ;;  %v1390_v55 = vor.u32 %v1848_v47, %v1389_v45  ;;  %v1518_v56 = vor.u32 %v1880_v49, %v1517_v48  ;;  %v1876_v6 = vld [vmem:[#allocation4 + $0x174] sm:$0xf0] }
  0x9e   :  { %611 = vmatpush.bf16.msra.mxu3 %v1466_v51  ;;  %v1502_v10 = vor.u32 %v1876_v6, %v1501_v5  ;;  %v1868_v45 = vld [vmem:[#allocation4 + $0x134] sm:$0xf0] }
  0x9f   :  { %v1470_v49 = vor.u32 %v1868_v45, %v1469_v44  ;;  %v1954_v44 = vld [vmem:[#allocation6 + $0x1e4] sm:$0xf0] }
  0xa0   :  { %584 = vmatpush.bf16.msra.mxu1 %v1446_v60  ;;  %598 = vmatpush.bf16.msra.mxu2 %v1322_v61  ;;  %v1394_v60 = vor.u32 %v1846_v52, %v1391_v53  ;;  %v1866_v52 = vld [vmem:[#allocation4 + $0x12c] sm:$0xf] }
  0xa1   :  { %620 = vmatpush.bf16.msrb.mxu0 %v1422_v24 }
  0xa2   :  { %612 = vmatpush.bf16.msra.mxu3 %v1450_v2  ;;  %v1373_v2 = vld [vmem:[#allocation4 + $0x68] sm:$0xf] }
  0xa3   :  { %v1374_v4 = vor.u32 %v1844_v3, %v1373_v2  ;;  %v1830_v2 = vld [vmem:[#allocation4 + $0xc] sm:$0xf]  ;;  %v1327_v3 = vld [vmem:[#allocation4 + $0x18] sm:$0xf0] }
  0xa4   :  { %633 = vmatpush.bf16.msrb.mxu1 %v1566_v7  ;;  %647 = vmatpush.bf16.msrb.mxu2 %v1442_v13  ;;  %v1842_v7 = vld [vmem:[#allocation4 + $0x6c] sm:$0xf]  ;;  %v1375_v13 = vld [vmem:[#allocation4 + $0x78] sm:$0xf0] }
  0xa5   :  { %621 = vmatpush.bf16.msrb.mxu0 %v1406_v36 }
  0xa6   :  { %661 = vmatpush.bf16.msrb.mxu3 %v1570_v18  ;;  %v1378_v18 = vor.u32 %v1842_v7, %v1375_v13  ;;  %v1330_v13 = vor.u32 %v1830_v2, %v1327_v3  ;;  %v1900_v3 = vld [vmem:[#allocation6 + $0x34] sm:$0xf0] }
  0xa8   :  { %634 = vmatpush.bf16.msrb.mxu1 %v1550_v25  ;;  %648 = vmatpush.bf16.msrb.mxu2 %v1426_v29  ;;  %v1838_v29 = vld [vmem:[#allocation4 + $0x4c] sm:$0xf] }
  0xa9   :  { %622 = vmatpush.bf16.msrb.mxu0 %v1390_v55  ;;  %v1362_v37 = vor.u32 %v1838_v29, %v1359_v34  ;;  %v1325_v55 = vld [vmem:[#allocation4 + $0x8] sm:$0xf]  ;;  %v1757_v29 = vld [vmem:[#allocation6 + $0x170] sm:$0xf] }
  0xaa   :  { %662 = vmatpush.bf16.msrb.mxu3 %v1554_v31  ;;  %v142_v31 = vperm.slane %v2139_v0, 1  ;;  %v1906_v0 = vld [vmem:[#allocation6 + $0x64] sm:$0xf0] }
  0xac   :  { %635 = vmatpush.bf16.msrb.mxu1 %v1534_v41  ;;  %649 = vmatpush.bf16.msrb.mxu2 %v1410_v42 }
  0xad   :  { %623 = vmatpush.bf16.msrb.mxu0 %v1374_v4  ;;  %v1862_v4 = vld [vmem:[#allocation4 + $0x10c] sm:$0xf] }
  0xae   :  { %663 = vmatpush.bf16.msrb.mxu3 %v1538_v46  ;;  %v1834_v46 = vld [vmem:[#allocation4 + $0x2c] sm:$0xf] }
  0xb0   :  { %636 = vmatpush.bf16.msrb.mxu1 %v1518_v56  ;;  %650 = vmatpush.bf16.msrb.mxu2 %v1394_v60  ;;  %v1832_v56 = vld [vmem:[#allocation4 + $0x14] sm:$0xf0]  ;;  %v1453_v60 = vld [vmem:[#allocation4 + $0x108] sm:$0xf] }
  0xb1   :  { %624 = vmatpush.bf16.msrb.mxu0 %v1358_v32  ;;  %v1326_v6 = vor.u32 %v1832_v56, %v1325_v55  ;;  %v1821_v32 = vld [vmem:[#allocation6 + $0x1f0] sm:$0xf]  ;;  %v1605_v55 = vld [vmem:[#allocation6 + $0x40] sm:$0xf] }
  0xb2   :  { %664 = vmatpush.bf16.msrb.mxu3 %v1522_v62 }
  0xb4   :  { %637 = vmatpush.bf16.msrb.mxu1 %v1502_v10  ;;  %651 = vmatpush.bf16.msrb.mxu2 %v1378_v18 }
  0xb6   :  { %665 = vmatpush.bf16.msrb.mxu3 %v1506_v26  ;;  %v1693_v26 = vld [vmem:[#allocation6 + $0xf0] sm:$0xf] }
  0xb8   :  { %638 = vmatpush.bf16.msrb.mxu1 %v1486_v33  ;;  %652 = vmatpush.bf16.msrb.mxu2 %v1362_v37  ;;  %v1685_v37 = vld [vmem:[#allocation6 + $0xe0] sm:$0xf] }
  0xbc   :  { %639 = vmatpush.bf16.msrb.mxu1 %v1470_v49  ;;  %v1677_v49 = vld [vmem:[#allocation6 + $0xd0] sm:$0xf] }
  0xfe   :  { %v97_v59 = vpop.xlane.xlu1 %96 }
  0xff   :  { %v101_v1 = vmul.f32 %v97_v59, %v2101_v12  ;;  %v2132_v59 = vld [vmem:[%s2224_s1] sm:$0x3] }
 0x100   :  { %v131_v63 = vperm.slane %v2132_v59, 0  ;;  %v132_v8 = vperm.slane %v2132_v59, 1  ;;  %v1956_v59 = vld [vmem:[#allocation6 + $0x1f4] sm:$0xf0] }
 0x101   :  { %v2122_v11 = vadd.f32 1e-06, %v101_v1 }
 0x103   :  { %1966 = vrsqrt.f32 %v2122_v11  ;;  %vm111_vm2 = vweird.f32 %v2122_v11 }
 0x106   :  { %v100_v35 = vpop.xlane.xlu1 %99 }
 0x107   :  { %v102_v40 = vmul.f32 %v100_v35, %v2101_v12 }
 0x109   :  { %v1967_v50 = vpop.eup %1966  ;;  %v2126_v51 = vadd.f32 1e-06, %v102_v40  ;;  %v1836_v40 = vld [vmem:[#allocation4 + $0x34] sm:$0xf0] }
 0x10a   :  { %v106_v54 = vmul.f32 %v1967_v50, %v2122_v11  ;;  %vm112_vm1 = vweird.f32 %v1967_v50  ;;  %v1870_v11 = vld [vmem:[#allocation4 + $0x14c] sm:$0xf]  ;;  %v1342_v48 = vor.u32 %v1836_v40, %v1341_v39  ;;  %v1749_v40 = vld [vmem:[#allocation6 + $0x160] sm:$0xf] }
 0x10b   :  { %1968 = vrsqrt.f32 %v2126_v51  ;;  %vm113_vm3 = vmor %vm111_vm2, %vm112_vm1  ;;  %v1490_v43 = vor.u32 %v1870_v11, %v1487_v38  ;;  %vm121_vm5 = vweird.f32 %v2126_v51  ;;  %v1922_v38 = vld [vmem:[#allocation6 + $0xe4] sm:$0xf0] }
 0x10c   :  { %v107_v61 = vmul.f32 %v1967_v50, %v106_v54  ;;  %625 = vmatpush.bf16.msrb.mxu0 %v1342_v48  ;;  %v1904_v48 = vld [vmem:[#allocation6 + $0x54] sm:$0xf0] }
 0x10d   :  { %666 = vmatpush.bf16.msrb.mxu3 %v1490_v43  ;;  %v1813_v43 = vld [vmem:[#allocation6 + $0x1e0] sm:$0xf] }
 0x10e   :  { %v108_v1 = vmul.f32 0.5, %v107_v61  ;;  %v1864_v61 = vld [vmem:[#allocation4 + $0x114] sm:$0xf0] }
 0x10f   :  { %v1454_v7 = vor.u32 %v1864_v61, %v1453_v60  ;;  %v1918_v60 = vld [vmem:[#allocation6 + $0xc4] sm:$0xf0] }
 0x110   :  { %v109_v9 = vsub.f32 1.5, %v108_v1  ;;  %626 = vmatpush.bf16.msrb.mxu0 %v1326_v6 }
 0x111   :  { %v2142_v17 = vpop.eup %1968  ;;  %640 = vmatpush.bf16.msrb.mxu1 %v1454_v7  ;;  %v1589_v7 = vld [vmem:[#allocation6 + $0x20] sm:$0xf] }
 0x112   :  { %v110_v24 = vmul.f32 %v1967_v50, %v109_v9  ;;  %v116_v25 = vmul.f32 %v2142_v17, %v2126_v51  ;;  %vm122_vm4 = vweird.f32 %v2142_v17  ;;  %v1455_v9 = vld [vmem:[#allocation4 + $0x118] sm:$0xf0] }
 0x113   :  { %vm123_vm6 = vmor %vm121_vm5, %vm122_vm4  ;;  %v1458_v18 = vor.u32 %v1862_v4, %v1455_v9  ;;  %v1661_v4 = vld [vmem:[#allocation6 + $0xb0] sm:$0xf] }
 0x114   :  { %v114_v35 = vsel %vm113_vm3, %v1967_v50, %v110_v24  ;;  %v117_v36 = vmul.f32 %v2142_v17, %v116_v25  ;;  %v1343_v50 = vld [vmem:[#allocation4 + $0x38] sm:$0xf0] }
 0x115   :  { %v125_v41 = vmul.f32 %v114_v35, %v2104_v15  ;;  %v126_v42 = vmul.f32 %v114_v35, %v2106_v16  ;;  %v1346_v15 = vor.u32 %v1834_v46, %v1343_v50  ;;  %v1471_v16 = vld [vmem:[#allocation4 + $0x138] sm:$0xf0]  ;;  %v1613_v46 = vld [vmem:[#allocation6 + $0x50] sm:$0xf]  ;;  %v1920_v50 = vld [vmem:[#allocation6 + $0xd4] sm:$0xf0] }
 0x116   :  { %v118_v47 = vmul.f32 0.5, %v117_v36  ;;  %v1474_v58 = vor.u32 %v1866_v52, %v1471_v16  ;;  %v1621_v36 = vld [vmem:[#allocation6 + $0x60] sm:$0xf]  ;;  %v1614_v16 = vor.u32 %v1904_v48, %v1613_v46  ;;  %v1678_v56 = vor.u32 %v1920_v50, %v1677_v49  ;;  %v1930_v46 = vld [vmem:[#allocation6 + $0x124] sm:$0xf0] }
 0x117   :  { %v135_v53 = vmul.f32 %v131_v63, %v125_v41  ;;  %v136_v54 = vmul.f32 %v132_v8, %v126_v42  ;;  %653 = vmatpush.bf16.msrb.mxu2 %v1346_v15  ;;  %v1822_v41 = vor.u32 %v1956_v59, %v1821_v32  ;;  %v1938_v42 = vld [vmem:[#allocation6 + $0x164] sm:$0xf0]  ;;  %v1622_v45 = vor.u32 %v1906_v0, %v1621_v36  ;;  %v1936_v15 = vld [vmem:[#allocation6 + $0x154] sm:$0xf0]  ;;  %v1805_v59 = vld [vmem:[#allocation6 + $0x1d0] sm:$0xf] }
 0x118   :  { %v119_v57 = vsub.f32 1.5, %v118_v47  ;;  %667 = vmatpush.bf16.msrb.mxu3 %v1474_v58  ;;  %v1686_v47 = vor.u32 %v1922_v38, %v1685_v37  ;;  %v1750_v52 = vor.u32 %v1938_v42, %v1749_v40  ;;  %v1669_v58 = vld [vmem:[#allocation6 + $0xc0] sm:$0xf]  ;;  %v1912_v32 = vld [vmem:[#allocation6 + $0x94] sm:$0xf0] }
 0x119   :  { %v145_v62 = vadd.f32 %v141_v30, %v135_v53  ;;  %v146_v1 = vadd.f32 %v142_v31, %v136_v54  ;;  %v1814_v53 = vor.u32 %v1954_v44, %v1813_v43  ;;  %v1741_v54 = vld [vmem:[#allocation6 + $0x150] sm:$0xf]  ;;  %v1670_v2 = vor.u32 %v1918_v60, %v1669_v58  ;;  %v1905_v36 = vld [vmem:[#allocation6 + $0x64] sm:$0xf]  ;;  %v1623_v0 = vld [vmem:[#allocation6 + $0x68] sm:$0xf0] }
 0x11a   :  { %v120_v5 = vmul.f32 %v2142_v17, %v119_v57  ;;  %v1902_v57 = vld [vmem:[#allocation6 + $0x44] sm:$0xf0]  ;;  %v1742_v61 = vor.u32 %v1936_v15, %v1741_v54  ;;  %v1637_v37 = vld [vmem:[#allocation6 + $0x80] sm:$0xf]  ;;  %v1923_v42 = vld [vmem:[#allocation6 + $0xf4] sm:$0xf] }
 0x11b   :  { %v149_v10 = vpack.c.bf16 %v146_v1, %v145_v62  ;;  %654 = vmatpush.bf16.msrb.mxu2 %v1330_v13  ;;  %v1606_v62 = vor.u32 %v1902_v57, %v1605_v55  ;;  %v1597_v1 = vld [vmem:[#allocation6 + $0x30] sm:$0xf]  ;;  %v1653_v13 = vld [vmem:[#allocation6 + $0xa0] sm:$0xf]  ;;  %v1910_v38 = vld [vmem:[#allocation6 + $0x84] sm:$0xf0] }
 0x11c   :  { %v124_v14 = vsel %vm123_vm6, %v2142_v17, %v120_v5  ;;  %668 = vmatpush.bf16.msrb.mxu3 %v1458_v18  ;;  %v1916_v5 = vld [vmem:[#allocation6 + $0xb4] sm:$0xf0]  ;;  %v1598_v6 = vor.u32 %v1900_v3, %v1597_v1  ;;  %v1797_v40 = vld [vmem:[#allocation6 + $0x1c0] sm:$0xf]  ;;  %v1695_v44 = vld [vmem:[#allocation6 + $0xf8] sm:$0xf0] }
 0x11d   :  { %151 = vst [vmem:[#allocation3] sm:$0xff] %v149_v10  ;;  %v127_v19 = vmul.f32 %v124_v14, %v2113_v22  ;;  %v128_v51 = vmul.f32 %v124_v14, %v2115_v23  ;;  %v1629_v22 = vld [vmem:[#allocation6 + $0x70] sm:$0xf]  ;;  %v1908_v23 = vld [vmem:[#allocation6 + $0x74] sm:$0xf0]  ;;  %v1662_v9 = vor.u32 %v1916_v5, %v1661_v4 }
 0x11e   :  { %v1898_v10 = vld [vmem:[#allocation6 + $0x24] sm:$0xf0]  ;;  %v1903_v49 = vld [vmem:[#allocation6 + $0x54] sm:$0xf]  ;;  %v1615_v50 = vld [vmem:[#allocation6 + $0x58] sm:$0xf0] }
 0x11f   :  { %v137_v20 = vmul.f32 %v131_v63, %v127_v19  ;;  %v138_v21 = vmul.f32 %v132_v8, %v128_v51  ;;  %v1940_v63 = vld [vmem:[#allocation6 + $0x174] sm:$0xf0]  ;;  %v1914_v14 = vld [vmem:[#allocation6 + $0xa4] sm:$0xf0]  ;;  %v1590_v18 = vor.u32 %v1898_v10, %v1589_v7  ;;  %v1581_v51 = vld [vmem:[#allocation6 + $0x10] sm:$0xf] }
 0x120   :  { %v1758_v39 = vor.u32 %v1940_v63, %v1757_v29  ;;  %v1654_v19 = vor.u32 %v1914_v14, %v1653_v13  ;;  %v1645_v63 = vld [vmem:[#allocation6 + $0x90] sm:$0xf]  ;;  %v1948_v54 = vld [vmem:[#allocation6 + $0x1b4] sm:$0xf0]  ;;  %v1687_v55 = vld [vmem:[#allocation6 + $0xe8] sm:$0xf0] }
 0x121   :  { %v147_v17 = vadd.f32 %v141_v30, %v137_v20  ;;  %v148_v24 = vadd.f32 %v142_v31, %v138_v21  ;;  %v1630_v30 = vor.u32 %v1908_v23, %v1629_v22  ;;  %v1694_v31 = vor.u32 %v1924_v28, %v1693_v26  ;;  %v1896_v20 = vld [vmem:[#allocation6 + $0x14] sm:$0xf0]  ;;  %v1934_v23 = vld [vmem:[#allocation6 + $0x144] sm:$0xf0]  ;;  %v1907_v26 = vld [vmem:[#allocation6 + $0x74] sm:$0xf] }
 0x122   :  { %v1582_v21 = vor.u32 %v1896_v20, %v1581_v51  ;;  %v1709_v57 = vld [vmem:[#allocation6 + $0x110] sm:$0xf]  ;;  %v1928_v58 = vld [vmem:[#allocation6 + $0x114] sm:$0xf0]  ;;  %v1946_v3 = vld [vmem:[#allocation6 + $0x1a4] sm:$0xf0] }
 0x123   :  { %v150_v25 = vpack.c.bf16 %v148_v24, %v147_v17  ;;  %v1573_v17 = vld [vmem:[#allocation6] sm:$0xf]  ;;  %v1894_v24 = vld [vmem:[#allocation6 + $0x4] sm:$0xf0]  ;;  %v1710_v60 = vor.u32 %v1928_v58, %v1709_v57  ;;  %v1919_v5 = vld [vmem:[#allocation6 + $0xd4] sm:$0xf] }
 0x124   :  { %v1309_v27 = vld [vmem:[#allocation3] sm:$0xf]  ;;  %v1827_v33 = vld [vmem:[#allocation3 + $0x4] sm:$0xf]  ;;  %v1574_v22 = vor.u32 %v1894_v24, %v1573_v17  ;;  %v1926_v10 = vld [vmem:[#allocation6 + $0x104] sm:$0xf0] }
 0x125   :  { %152 = vst [vmem:[#allocation3 + $0x8] sm:$0xff] %v150_v25  ;;  %v1733_v25 = vld [vmem:[#allocation6 + $0x140] sm:$0xf]  ;;  %v1899_v14 = vld [vmem:[#allocation6 + $0x34] sm:$0xf] }
 0x126   :  { %v1734_v28 = vor.u32 %v1934_v23, %v1733_v25  ;;  %v1939_v51 = vld [vmem:[#allocation6 + $0x174] sm:$0xf]  ;;  %v1759_v20 = vld [vmem:[#allocation6 + $0x178] sm:$0xf0]  ;;  %v1944_v24 = vld [vmem:[#allocation6 + $0x194] sm:$0xf0] }
 0x127   :  { %v1762_v17 = vor.u32 %v1939_v51, %v1759_v20  ;;  %v1917_v25 = vld [vmem:[#allocation6 + $0xc4] sm:$0xf]  ;;  %v1951_v57 = vld [vmem:[#allocation6 + $0x1d4] sm:$0xf] }
 0x12c   :  { %v1828_v8 = vld [vmem:[#allocation3 + $0x4] sm:$0xf0]  ;;  %v1311_v34 = vld [vmem:[#allocation3 + $0x8] sm:$0xf0] }
 0x12d   :  { %v1310_v11 = vor.u32 %v1828_v8, %v1309_v27  ;;  %v1314_v35 = vor.u32 %v1827_v33, %v1311_v34  ;;  %v1631_v27 = vld [vmem:[#allocation6 + $0x78] sm:$0xf0]  ;;  %v1646_v8 = vor.u32 %v1912_v32, %v1645_v63  ;;  %v1952_v33 = vld [vmem:[#allocation6 + $0x1d4] sm:$0xf0]  ;;  %v1751_v32 = vld [vmem:[#allocation6 + $0x168] sm:$0xf0] }
 0x12e   :  { %v1634_v29 = vor.u32 %v1907_v26, %v1631_v27  ;;  %v1806_v34 = vor.u32 %v1952_v33, %v1805_v59  ;;  %v1897_v27 = vld [vmem:[#allocation6 + $0x24] sm:$0xf]  ;;  %v1765_v59 = vld [vmem:[#allocation6 + $0x180] sm:$0xf] }
 0x12f   :  { %571 = vmatmul.bf16.vlgmr.msra.gmra.mxu0 %v1310_v11  ;;  %585 = vmatmul.bf16.vlgmr.msra.gmra.mxu1 %v1314_v35 }
 0x130   :  { %599 = vmatmul.bf16.vlgmr.msra.gmra.mxu2 %v1310_v11  ;;  %613 = vmatmul.bf16.vlgmr.msra.gmra.mxu3 %v1314_v35 }
 0x131   :  { %1075 = vmatpush.bf16.msra.mxu0 %v1630_v30  ;;  %1089 = vmatpush.bf16.msra.mxu1 %v1694_v31  ;;  %v1626_v31 = vor.u32 %v1905_v36, %v1623_v0  ;;  %v1955_v36 = vld [vmem:[#allocation6 + $0x1f4] sm:$0xf]  ;;  %v1823_v0 = vld [vmem:[#allocation6 + $0x1f8] sm:$0xf0] }
 0x132   :  { %1103 = vmatpush.bf16.msra.mxu2 %v1758_v39  ;;  %1117 = vmatpush.bf16.msra.mxu3 %v1822_v41  ;;  %v1638_v39 = vor.u32 %v1910_v38, %v1637_v37  ;;  %v1950_v41 = vld [vmem:[#allocation6 + $0x1c4] sm:$0xf0]  ;;  %v1895_v37 = vld [vmem:[#allocation6 + $0x14] sm:$0xf]  ;;  %v1583_v38 = vld [vmem:[#allocation6 + $0x18] sm:$0xf0] }
 0x133   :  { %v1798_v43 = vor.u32 %v1950_v41, %v1797_v40  ;;  %v1586_v40 = vor.u32 %v1895_v37, %v1583_v38  ;;  %v1743_v41 = vld [vmem:[#allocation6 + $0x158] sm:$0xf0] }
 0x135   :  { %1076 = vmatpush.bf16.msra.mxu0 %v1622_v45  ;;  %1090 = vmatpush.bf16.msra.mxu1 %v1686_v47  ;;  %v1717_v45 = vld [vmem:[#allocation6 + $0x120] sm:$0xf]  ;;  %v1698_v47 = vor.u32 %v1923_v42, %v1695_v44  ;;  %v1655_v44 = vld [vmem:[#allocation6 + $0xa8] sm:$0xf0] }
 0x136   :  { %1104 = vmatpush.bf16.msra.mxu2 %v1750_v52  ;;  %1118 = vmatpush.bf16.msra.mxu3 %v1814_v53  ;;  %v1718_v48 = vor.u32 %v1930_v46, %v1717_v45  ;;  %v1618_v52 = vor.u32 %v1903_v49, %v1615_v50  ;;  %v1789_v53 = vld [vmem:[#allocation6 + $0x1b0] sm:$0xf]  ;;  %v1953_v45 = vld [vmem:[#allocation6 + $0x1e4] sm:$0xf]  ;;  %v1575_v50 = vld [vmem:[#allocation6 + $0x8] sm:$0xf0] }
 0x137   :  { %v1790_v15 = vor.u32 %v1948_v54, %v1789_v53  ;;  %v1893_v49 = vld [vmem:[#allocation6 + $0x4] sm:$0xf]  ;;  %v2180_v53 = vld [vmem:[%s2227_s4] sm:$0xf] }
 0x138   :  { %v1578_v54 = vor.u32 %v1893_v49, %v1575_v50  ;;  %v1941_v49 = vld [vmem:[#allocation6 + $0x184] sm:$0xf]  ;;  %v1767_v50 = vld [vmem:[#allocation6 + $0x188] sm:$0xf0] }
 0x139   :  { %1077 = vmatpush.bf16.msra.mxu0 %v1614_v16  ;;  %1091 = vmatpush.bf16.msra.mxu1 %v1678_v56  ;;  %v1921_v16 = vld [vmem:[#allocation6 + $0xe4] sm:$0xf] }
 0x13a   :  { %1105 = vmatpush.bf16.msra.mxu2 %v1742_v61  ;;  %1119 = vmatpush.bf16.msra.mxu3 %v1806_v34  ;;  %v1690_v56 = vor.u32 %v1921_v16, %v1687_v55  ;;  %v1901_v61 = vld [vmem:[#allocation6 + $0x44] sm:$0xf]  ;;  %v1911_v55 = vld [vmem:[#allocation6 + $0x94] sm:$0xf] }
 0x13d   :  { %1078 = vmatpush.bf16.msra.mxu0 %v1606_v62  ;;  %1092 = vmatpush.bf16.msra.mxu1 %v1670_v2  ;;  %v1607_v62 = vld [vmem:[#allocation6 + $0x48] sm:$0xf0]  ;;  %v1781_v2 = vld [vmem:[#allocation6 + $0x1a0] sm:$0xf] }
 0x13e   :  { %1106 = vmatpush.bf16.msra.mxu2 %v1734_v28  ;;  %1120 = vmatpush.bf16.msra.mxu3 %v1798_v43  ;;  %v1610_v1 = vor.u32 %v1901_v61, %v1607_v62  ;;  %v1782_v4 = vor.u32 %v1946_v3, %v1781_v2  ;;  %v1591_v28 = vld [vmem:[#allocation6 + $0x28] sm:$0xf0]  ;;  %v1913_v43 = vld [vmem:[#allocation6 + $0xa4] sm:$0xf]  ;;  %v1931_v2 = vld [vmem:[#allocation6 + $0x134] sm:$0xf] }
 0x13f   :  { %627 = vmatmul.bf16.vlgmr.msrb.gmra.mxu0 %v1310_v11  ;;  %641 = vmatmul.bf16.vlgmr.msrb.gmra.mxu1 %v1314_v35  ;;  %v1594_v63 = vor.u32 %v1897_v27, %v1591_v28  ;;  %v1658_v46 = vor.u32 %v1913_v43, %v1655_v44  ;;  %v1727_v3 = vld [vmem:[#allocation6 + $0x138] sm:$0xf0]  ;;  %v1927_v28 = vld [vmem:[#allocation6 + $0x114] sm:$0xf] }
 0x140   :  { %655 = vmatmul.bf16.vlgmr.msrb.gmra.mxu2 %v1310_v11  ;;  %669 = vmatmul.bf16.vlgmr.msrb.gmra.mxu3 %v1314_v35  ;;  %v1725_v11 = vld [vmem:[#allocation6 + $0x130] sm:$0xf]  ;;  %v1932_v35 = vld [vmem:[#allocation6 + $0x134] sm:$0xf0] }
 0x141   :  { %1079 = vmatpush.bf16.msra.mxu0 %v1598_v6  ;;  %1093 = vmatpush.bf16.msra.mxu1 %v1662_v9  ;;  %v1726_v30 = vor.u32 %v1932_v35, %v1725_v11  ;;  %v1679_v6 = vld [vmem:[#allocation6 + $0xd8] sm:$0xf0]  ;;  %v1701_v9 = vld [vmem:[#allocation6 + $0x100] sm:$0xf]  ;;  %v1915_v11 = vld [vmem:[#allocation6 + $0xb4] sm:$0xf] }
 0x142   :  { %1121 = vmatpush.bf16.msra.mxu3 %v1790_v15  ;;  %v1682_v7 = vor.u32 %v1919_v5, %v1679_v6  ;;  %v1702_v13 = vor.u32 %v1926_v10, %v1701_v9  ;;  %v1663_v35 = vld [vmem:[#allocation6 + $0xb8] sm:$0xf0]  ;;  %v1735_v15 = vld [vmem:[#allocation6 + $0x148] sm:$0xf0]  ;;  %v1730_v5 = vor.u32 %v1931_v2, %v1727_v3  ;;  %v1909_v6 = vld [vmem:[#allocation6 + $0x84] sm:$0xf] }
 0x143   :  { %1107 = vmatpush.bf16.msra.mxu2 %v1726_v30  ;;  %v1666_v30 = vor.u32 %v1915_v11, %v1663_v35  ;;  %v1949_v9 = vld [vmem:[#allocation6 + $0x1c4] sm:$0xf]  ;;  %v1703_v11 = vld [vmem:[#allocation6 + $0x108] sm:$0xf0] }
 0x145   :  { %1080 = vmatpush.bf16.msra.mxu0 %v1590_v18  ;;  %1094 = vmatpush.bf16.msra.mxu1 %v1654_v19  ;;  %v1599_v18 = vld [vmem:[#allocation6 + $0x38] sm:$0xf0] }
 0x146   :  { %1122 = vmatpush.bf16.msra.mxu3 %v1782_v4  ;;  %v1602_v19 = vor.u32 %v1899_v14, %v1599_v18  ;;  %v225_v4 = vperm.slane %v2180_v53, 0  ;;  %v1929_v18 = vld [vmem:[#allocation6 + $0x124] sm:$0xf] }
 0x147   :  { %1108 = vmatpush.bf16.msra.mxu2 %v1718_v48 }
 0x149   :  { %1081 = vmatpush.bf16.msra.mxu0 %v1582_v21  ;;  %1095 = vmatpush.bf16.msra.mxu1 %v1646_v8  ;;  %v1773_v21 = vld [vmem:[#allocation6 + $0x190] sm:$0xf]  ;;  %v1942_v8 = vld [vmem:[#allocation6 + $0x184] sm:$0xf0] }
 0x14a   :  { %v1774_v23 = vor.u32 %v1944_v24, %v1773_v21  ;;  %v1766_v34 = vor.u32 %v1942_v8, %v1765_v59  ;;  %v1947_v21 = vld [vmem:[#allocation6 + $0x1b4] sm:$0xf]  ;;  %v226_v24 = vperm.slane %v2180_v53, 1 }
 0x14b   :  { %1109 = vmatpush.bf16.msra.mxu2 %v1710_v60  ;;  %v1807_v60 = vld [vmem:[#allocation6 + $0x1d8] sm:$0xf0] }
 0x14c   :  { %1123 = vmatpush.bf16.msra.mxu3 %v1774_v23 }
 0x14d   :  { %1082 = vmatpush.bf16.msra.mxu0 %v1574_v22  ;;  %1096 = vmatpush.bf16.msra.mxu1 %v1638_v39  ;;  %v1671_v22 = vld [vmem:[#allocation6 + $0xc8] sm:$0xf0]  ;;  %v1935_v39 = vld [vmem:[#allocation6 + $0x154] sm:$0xf] }
 0x14e   :  { %v1674_v26 = vor.u32 %v1917_v25, %v1671_v22  ;;  %v1746_v42 = vor.u32 %v1935_v39, %v1743_v41 }
 0x14f   :  { %1110 = vmatpush.bf16.msra.mxu2 %v1702_v13  ;;  %v1799_v13 = vld [vmem:[#allocation6 + $0x1c8] sm:$0xf0] }
 0x150   :  { %1124 = vmatpush.bf16.msra.mxu3 %v1766_v34  ;;  %v1802_v14 = vor.u32 %v1949_v9, %v1799_v13  ;;  %v1925_v34 = vld [vmem:[#allocation6 + $0x104] sm:$0xf] }
 0x151   :  { %1131 = vmatpush.bf16.msrb.mxu0 %v1634_v29  ;;  %1145 = vmatpush.bf16.msrb.mxu1 %v1698_v47  ;;  %v1937_v29 = vld [vmem:[#allocation6 + $0x164] sm:$0xf]  ;;  %v1815_v47 = vld [vmem:[#allocation6 + $0x1e8] sm:$0xf0]  ;;  %v1706_v37 = vor.u32 %v1925_v34, %v1703_v11 }
 0x152   :  { %v1754_v33 = vor.u32 %v1937_v29, %v1751_v32  ;;  %v1818_v48 = vor.u32 %v1953_v45, %v1815_v47  ;;  %v1711_v29 = vld [vmem:[#allocation6 + $0x118] sm:$0xf0] }
 0x153   :  { %1159 = vmatpush.bf16.msrb.mxu2 %v1762_v17  ;;  %v1791_v17 = vld [vmem:[#allocation6 + $0x1b8] sm:$0xf0]  ;;  %v1714_v8 = vor.u32 %v1927_v28, %v1711_v29 }
 0x154   :  { %v1794_v23 = vor.u32 %v1947_v21, %v1791_v17 }
 0x155   :  { %1132 = vmatpush.bf16.msrb.mxu0 %v1626_v31  ;;  %1146 = vmatpush.bf16.msrb.mxu1 %v1690_v56  ;;  %v1826_v31 = vor.u32 %v1955_v36, %v1823_v0  ;;  %v1647_v56 = vld [vmem:[#allocation6 + $0x98] sm:$0xf0]  ;;  %v1943_v36 = vld [vmem:[#allocation6 + $0x194] sm:$0xf] }
 0x156   :  { %v1650_v58 = vor.u32 %v1911_v55, %v1647_v56  ;;  %v1775_v0 = vld [vmem:[#allocation6 + $0x198] sm:$0xf0] }
 0x157   :  { %1160 = vmatpush.bf16.msrb.mxu2 %v1754_v33  ;;  %1173 = vmatpush.bf16.msrb.mxu3 %v1826_v31  ;;  %v1783_v33 = vld [vmem:[#allocation6 + $0x1a8] sm:$0xf0] }
 0x159   :  { %1133 = vmatpush.bf16.msrb.mxu0 %v1618_v52  ;;  %1147 = vmatpush.bf16.msrb.mxu1 %v1682_v7  ;;  %v1933_v52 = vld [vmem:[#allocation6 + $0x144] sm:$0xf]  ;;  %v1639_v7 = vld [vmem:[#allocation6 + $0x88] sm:$0xf0] }
 0x15a   :  { %v1738_v16 = vor.u32 %v1933_v52, %v1735_v15  ;;  %v1642_v10 = vor.u32 %v1909_v6, %v1639_v7 }
 0x15b   :  { %1161 = vmatpush.bf16.msrb.mxu2 %v1746_v42  ;;  %1174 = vmatpush.bf16.msrb.mxu3 %v1818_v48  ;;  %v227_v48 = vperm.slane %v2180_v53, 2 }
 0x15d   :  { %1134 = vmatpush.bf16.msrb.mxu0 %v1610_v1  ;;  %1148 = vmatpush.bf16.msrb.mxu1 %v1674_v26  ;;  %v1810_v1 = vor.u32 %v1951_v57, %v1807_v60  ;;  %v228_v60 = vperm.slane %v2180_v53, 3 }
 0x15f   :  { %1162 = vmatpush.bf16.msrb.mxu2 %v1738_v16  ;;  %1175 = vmatpush.bf16.msrb.mxu3 %v1810_v1 }
 0x161   :  { %1135 = vmatpush.bf16.msrb.mxu0 %v1602_v19  ;;  %1149 = vmatpush.bf16.msrb.mxu1 %v1666_v30  ;;  %v1719_v19 = vld [vmem:[#allocation6 + $0x128] sm:$0xf0] }
 0x162   :  { %v1722_v20 = vor.u32 %v1929_v18, %v1719_v19 }
 0x163   :  { %1163 = vmatpush.bf16.msrb.mxu2 %v1730_v5  ;;  %1176 = vmatpush.bf16.msrb.mxu3 %v1802_v14 }
 0x165   :  { %1136 = vmatpush.bf16.msrb.mxu0 %v1594_v63  ;;  %1150 = vmatpush.bf16.msrb.mxu1 %v1658_v46  ;;  %v1945_v63 = vld [vmem:[#allocation6 + $0x1a4] sm:$0xf] }
 0x166   :  { %v1786_v35 = vor.u32 %v1945_v63, %v1783_v33  ;;  %v1202_v63 = vld [vmem:[%s2229_s6] sm:$0x3] }
 0x167   :  { %1164 = vmatpush.bf16.msrb.mxu2 %v1722_v20  ;;  %1177 = vmatpush.bf16.msrb.mxu3 %v1794_v23  ;;  %v1204_v34 = vperm.slane %v1202_v63, 0 }
 0x169   :  { %1137 = vmatpush.bf16.msrb.mxu0 %v1586_v40  ;;  %1151 = vmatpush.bf16.msrb.mxu1 %v1650_v58  ;;  %v1778_v40 = vor.u32 %v1943_v36, %v1775_v0 }
 0x16b   :  { %1165 = vmatpush.bf16.msrb.mxu2 %v1714_v8  ;;  %1178 = vmatpush.bf16.msrb.mxu3 %v1786_v35  ;;  %v1205_v35 = vperm.slane %v1202_v63, 1 }
 0x16d   :  { %1138 = vmatpush.bf16.msrb.mxu0 %v1578_v54  ;;  %1152 = vmatpush.bf16.msrb.mxu1 %v1642_v10  ;;  %v1770_v54 = vor.u32 %v1941_v49, %v1767_v50 }
 0x16f   :  { %1166 = vmatpush.bf16.msrb.mxu2 %v1706_v37  ;;  %1179 = vmatpush.bf16.msrb.mxu3 %v1778_v40 }
 0x173   :  { %1180 = vmatpush.bf16.msrb.mxu3 %v1770_v54 }
 0x1ac   :  { %v572_v61 = vpop.f32.mrf.mxu0  ;;  %v586_v62 = vpop.f32.mrf.mxu1 }
 0x1ad   :  { %v573_v51 = vadd.f32 %v572_v61, %v225_v4 }
 0x1af   :  { %v587_v32 = vadd.f32 %v586_v62, %v573_v51 }
 0x1b1   :  { %v675_v38 = vmax.f32 %v587_v32, 0.0 }
 0x1b3   :  { %v600_v25 = vpop.f32.mrf.mxu2  ;;  %v614_v22 = vpop.f32.mrf.mxu3 }
 0x1b4   :  { %v574_v26 = vpop.f32.mrf.mxu0  ;;  %v588_v27 = vpop.f32.mrf.mxu1  ;;  %v601_v31 = vadd.f32 %v600_v25, %v226_v24 }
 0x1b5   :  { %v575_v59 = vadd.f32 %v574_v26, %v225_v4 }
 0x1b6   :  { %v615_v44 = vadd.f32 %v614_v22, %v601_v31 }
 0x1b7   :  { %v589_v30 = vadd.f32 %v588_v27, %v575_v59 }
 0x1b8   :  { %v676_v15 = vmax.f32 %v615_v44, 0.0 }
 0x1b9   :  { %v679_v39 = vmax.f32 %v589_v30, 0.0 }
 0x1bb   :  { %v683_v41 = vpack.c.bf16 %v679_v39, %v675_v38  ;;  %v602_v42 = vpop.f32.mrf.mxu2  ;;  %v616_v43 = vpop.f32.mrf.mxu3  ;;  %v1212_v38 = vld [vmem:[%s2223_s0] sm:$0xff]  ;;  %v1213_v39 = vld [vmem:[%s2223_s0 + $0x8] sm:$0xff] }
 0x1bc   :  { %v603_v45 = vadd.f32 %v602_v42, %v226_v24  ;;  %v628_v46 = vpop.f32.mrf.mxu0  ;;  %v642_v47 = vpop.f32.mrf.mxu1 }
 0x1bd   :  { %1083 = vmatmul.bf16.vlgmr.msra.gmra.mxu0 %v683_v41  ;;  %v629_v55 = vadd.f32 %v628_v46, %v227_v48 }
 0x1be   :  { %v617_v52 = vadd.f32 %v616_v43, %v603_v45 }
 0x1bf   :  { %v643_v62 = vadd.f32 %v642_v47, %v629_v55 }
 0x1c0   :  { %v680_v16 = vmax.f32 %v617_v52, 0.0 }
 0x1c1   :  { %v677_v5 = vmax.f32 %v643_v62, 0.0 }
 0x1c2   :  { %v684_v56 = vpack.c.bf16 %v680_v16, %v676_v15  ;;  %v1214_v15 = vld [vmem:[%s2223_s0 + $0x10] sm:$0xff]  ;;  %v1215_v16 = vld [vmem:[%s2223_s0 + $0x18] sm:$0xff] }
 0x1c3   :  { %v656_v57 = vpop.f32.mrf.mxu2  ;;  %v670_v58 = vpop.f32.mrf.mxu3 }
 0x1c4   :  { %1097 = vmatmul.bf16.vlgmr.msra.gmra.mxu1 %v684_v56  ;;  %v630_v61 = vpop.f32.mrf.mxu0  ;;  %v644_v2 = vpop.f32.mrf.mxu1  ;;  %v657_v4 = vadd.f32 %v656_v57, %v228_v60 }
 0x1c5   :  { %v631_v1 = vadd.f32 %v630_v61, %v227_v48 }
 0x1c6   :  { %v671_v10 = vadd.f32 %v670_v58, %v657_v4 }
 0x1c7   :  { %v645_v3 = vadd.f32 %v644_v2, %v631_v1 }
 0x1c8   :  { %v678_v19 = vmax.f32 %v671_v10, 0.0 }
 0x1c9   :  { %v681_v6 = vmax.f32 %v645_v3, 0.0 }
 0x1cb   :  { %v685_v7 = vpack.c.bf16 %v681_v6, %v677_v5  ;;  %v658_v9 = vpop.f32.mrf.mxu2  ;;  %v672_v14 = vpop.f32.mrf.mxu3 }
 0x1cc   :  { %v659_v13 = vadd.f32 %v658_v9, %v228_v60 }
 0x1cd   :  { %1111 = vmatmul.bf16.vlgmr.msra.gmra.mxu2 %v685_v7  ;;  %1139 = vmatmul.bf16.vlgmr.msrb.gmra.mxu0 %v683_v41 }
 0x1ce   :  { %v673_v18 = vadd.f32 %v672_v14, %v659_v13 }
 0x1d0   :  { %v682_v51 = vmax.f32 %v673_v18, 0.0 }
 0x1d2   :  { %v686_v53 = vpack.c.bf16 %v682_v51, %v678_v19 }
 0x1d4   :  { %1125 = vmatmul.bf16.vlgmr.msra.gmra.mxu3 %v686_v53  ;;  %1153 = vmatmul.bf16.vlgmr.msrb.gmra.mxu1 %v684_v56 }
 0x1dd   :  { %1167 = vmatmul.bf16.vlgmr.msrb.gmra.mxu2 %v685_v7 }
 0x1e4   :  { %1181 = vmatmul.bf16.vlgmr.msrb.gmra.mxu3 %v686_v53 }
 0x23a   :  { %v1084_v21 = vpop.f32.mrf.mxu0 }
 0x241   :  { %v1098_v20 = vpop.f32.mrf.mxu1 }
 0x242   :  { %v1086_v25 = vpop.f32.mrf.mxu0  ;;  %v1099_v28 = vadd.f32 %v1098_v20, %v1084_v21 }
 0x249   :  { %v1100_v24 = vpop.f32.mrf.mxu1 }
 0x24a   :  { %v1140_v29 = vpop.f32.mrf.mxu0  ;;  %v1101_v36 = vadd.f32 %v1100_v24, %v1086_v25 }
 0x250   :  { %v1112_v17 = vpop.f32.mrf.mxu2 }
 0x251   :  { %v1154_v26 = vpop.f32.mrf.mxu1  ;;  %v1113_v59 = vadd.f32 %v1112_v17, %v1099_v28  ;;  %v1287_v28 = vld [vmem:[%s2231_s8] sm:$0x3] }
 0x252   :  { %v1155_v8 = vadd.f32 %v1154_v26, %v1140_v29  ;;  %v1142_v42 = vpop.f32.mrf.mxu0 }
 0x257   :  { %v1126_v22 = vpop.f32.mrf.mxu3 }
 0x258   :  { %v1114_v23 = vpop.f32.mrf.mxu2  ;;  %v1127_v33 = vadd.f32 %v1126_v22, %v1113_v59 }
 0x259   :  { %v1156_v37 = vpop.f32.mrf.mxu1  ;;  %v1115_v40 = vadd.f32 %v1114_v23, %v1101_v36  ;;  %v1277_v23 = vld [vmem:[%s2230_s7] sm:$0x3] }
 0x25a   :  { %v1208_v0 = vadd.f32 %v1204_v34, %v1127_v33  ;;  %v1157_v44 = vadd.f32 %v1156_v37, %v1142_v42  ;;  %v1279_v63 = vperm.slane %v1277_v23, 0  ;;  %v1289_v33 = vperm.slane %v1287_v28, 0 }
 0x25c   :  { %v1216_v46 = vadd.f32 %v1212_v38, %v1208_v0 }
 0x25f   :  { %v1128_v27 = vpop.f32.mrf.mxu3 }
 0x260   :  { %v1168_v32 = vpop.f32.mrf.mxu2  ;;  %v1129_v45 = vadd.f32 %v1128_v27, %v1115_v40 }
 0x261   :  { %v1169_v11 = vadd.f32 %v1168_v32, %v1155_v8  ;;  %v1280_v32 = vperm.slane %v1277_v23, 1 }
 0x262   :  { %v1210_v52 = vadd.f32 %v1204_v34, %v1129_v45  ;;  %v1290_v34 = vperm.slane %v1287_v28, 1 }
 0x264   :  { %v1218_v56 = vadd.f32 %v1214_v15, %v1210_v52 }
 0x267   :  { %v1182_v30 = vpop.f32.mrf.mxu3 }
 0x268   :  { %v1183_v31 = vadd.f32 %v1182_v30, %v1169_v11  ;;  %v1170_v43 = vpop.f32.mrf.mxu2 }
 0x269   :  { %v1171_v48 = vadd.f32 %v1170_v43, %v1157_v44 }
 0x26a   :  { %v1209_v41 = vadd.f32 %v1205_v35, %v1183_v31 }
 0x26c   :  { %v1217_v47 = vadd.f32 %v1213_v39, %v1209_v41 }
 0x26e   :  { %v1220_v49 = vadd.f32 %v1217_v47, %v1216_v46 }
 0x26f   :  { %v1184_v50 = vpop.f32.mrf.mxu3 }
 0x270   :  { %v1185_v54 = vadd.f32 %v1184_v50, %v1171_v48  ;;  %1221 = vadd.xlane.f32.xlu2 %v1220_v49 }
 0x272   :  { %v1211_v55 = vadd.f32 %v1205_v35, %v1185_v54 }
 0x274   :  { %v1219_v57 = vadd.f32 %v1215_v16, %v1211_v55 }
 0x276   :  { %v1223_v58 = vadd.f32 %v1219_v57, %v1218_v56 }
 0x278   :  { %1224 = vadd.xlane.f32.xlu2 %v1223_v58 }
 0x2e3   :  { %v1222_v60 = vpop.xlane.xlu2 %1221 }
 0x2e4   :  { %v1233_v61 = vmul.f32 %v1222_v60, %v2101_v12 }
 0x2e6   :  { %v1235_v62 = vsub.f32 %v1216_v46, %v1233_v61  ;;  %v1236_v1 = vsub.f32 %v1217_v47, %v1233_v61 }
 0x2e8   :  { %v1239_v2 = vmul.f32 %v1235_v62, %v1235_v62  ;;  %v1240_v3 = vmul.f32 %v1236_v1, %v1236_v1 }
 0x2ea   :  { %v1243_v4 = vadd.f32 %v1240_v3, %v1239_v2 }
 0x2eb   :  { %v1225_v5 = vpop.xlane.xlu2 %1224 }
 0x2ec   :  { %v1234_v6 = vmul.f32 %v1225_v5, %v2101_v12  ;;  %1244 = vadd.xlane.f32.xlu0 %v1243_v4 }
 0x2ee   :  { %v1237_v7 = vsub.f32 %v1218_v56, %v1234_v6  ;;  %v1238_v9 = vsub.f32 %v1219_v57, %v1234_v6 }
 0x2f0   :  { %v1241_v10 = vmul.f32 %v1237_v7, %v1237_v7  ;;  %v1242_v13 = vmul.f32 %v1238_v9, %v1238_v9 }
 0x2f2   :  { %v1246_v14 = vadd.f32 %v1242_v13, %v1241_v10 }
 0x2f4   :  { %1247 = vadd.xlane.f32.xlu1 %v1246_v14 }
 0x35f   :  { %v1245_v18 = vpop.xlane.xlu0 %1244 }
 0x360   :  { %v1249_v19 = vmul.f32 %v1245_v18, %v2101_v12 }
 0x362   :  { %v1251_v51 = vadd.f32 1e-06, %v1249_v19 }
 0x364   :  { %1970 = vrsqrt.f32 %v1251_v51  ;;  %vm1259_vm8 = vweird.f32 %v1251_v51 }
 0x367   :  { %v1248_v53 = vpop.xlane.xlu1 %1247 }
 0x368   :  { %v1250_v20 = vmul.f32 %v1248_v53, %v2101_v12 }
 0x36a   :  { %v1971_v21 = vpop.eup %1970  ;;  %v1252_v17 = vadd.f32 1e-06, %v1250_v20 }
 0x36b   :  { %v1254_v24 = vmul.f32 %v1971_v21, %v1251_v51  ;;  %vm1260_vm7 = vweird.f32 %v1971_v21 }
 0x36c   :  { %1972 = vrsqrt.f32 %v1252_v17  ;;  %vm1261_vm9 = vmor %vm1259_vm8, %vm1260_vm7  ;;  %vm1269_vm11 = vweird.f32 %v1252_v17 }
 0x36d   :  { %v1255_v25 = vmul.f32 %v1971_v21, %v1254_v24 }
 0x36f   :  { %v1256_v22 = vmul.f32 0.5, %v1255_v25 }
 0x371   :  { %v1257_v26 = vsub.f32 1.5, %v1256_v22 }
 0x372   :  { %v1973_v27 = vpop.eup %1972 }
 0x373   :  { %v1258_v29 = vmul.f32 %v1971_v21, %v1257_v26  ;;  %v1264_v12 = vmul.f32 %v1973_v27, %v1252_v17  ;;  %vm1270_vm10 = vweird.f32 %v1973_v27 }
 0x374   :  { %vm1271_vm12 = vmor %vm1269_vm11, %vm1270_vm10 }
 0x375   :  { %v1262_v59 = vsel %vm1261_vm9, %v1971_v21, %v1258_v29  ;;  %v1265_v8 = vmul.f32 %v1973_v27, %v1264_v12 }
 0x376   :  { %v1273_v11 = vmul.f32 %v1262_v59, %v1235_v62  ;;  %v1274_v35 = vmul.f32 %v1262_v59, %v1236_v1 }
 0x377   :  { %v1266_v30 = vmul.f32 0.5, %v1265_v8 }
 0x378   :  { %v1283_v36 = vmul.f32 %v1279_v63, %v1273_v11  ;;  %v1284_v0 = vmul.f32 %v1280_v32, %v1274_v35 }
 0x379   :  { %v1267_v31 = vsub.f32 1.5, %v1266_v30 }
 0x37a   :  { %v1293_v37 = vadd.f32 %v1289_v33, %v1283_v36  ;;  %v1294_v38 = vadd.f32 %v1290_v34, %v1284_v0 }
 0x37b   :  { %v1268_v39 = vmul.f32 %v1973_v27, %v1267_v31 }
 0x37c   :  { %1297 = vst [vmem:[%s2232_s9] sm:$0xff] %v1293_v37 }
 0x37d   :  { %1298 = vst [vmem:[%s2232_s9 + $0x8] sm:$0xff] %v1294_v38  ;;  %v1272_v40 = vsel %vm1271_vm12, %v1973_v27, %v1268_v39 }
 0x37e   :  { %v1275_v41 = vmul.f32 %v1272_v40, %v1237_v7  ;;  %v1276_v42 = vmul.f32 %v1272_v40, %v1238_v9 }
 0x380   :  { %v1285_v43 = vmul.f32 %v1279_v63, %v1275_v41  ;;  %v1286_v44 = vmul.f32 %v1280_v32, %v1276_v42 }
 0x382   :  { %v1295_v45 = vadd.f32 %v1289_v33, %v1285_v43  ;;  %v1296_v46 = vadd.f32 %v1290_v34, %v1286_v44 }
 0x384   :  { %1299 = vst [vmem:[%s2232_s9 + $0x10] sm:$0xff] %v1295_v45 }
 0x385   :  { %1300 = vst [vmem:[%s2232_s9 + $0x18] sm:$0xff] %v1296_v46 }
 0x386   :  { %1305 = vsyncpa [#allocation5], 1 }
 0x387   :  { %1306 = vsyncpa [#allocation7], 1 }

</bundles_post_ra>
